<compile_context>
chip_gen: v6e
topology: v6e:2x2x1
jax: 0.10.0
libtpu: 0.0.40
codegen_flags: <defaults>
</compile_context>

<pallas_src>
import functools

import jax
import jax.numpy as jnp
from jax.experimental import pallas as pl
from jax.experimental.pallas import tpu as pltpu

NEG_SLOPE = 0.01   # PyTorch nn.LeakyReLU default
BN_EPS = 1e-5      # PyTorch nn.BatchNorm2d default


# ----------------------------------------------------------------------------
# Pallas kernels
# ----------------------------------------------------------------------------

def _conv_body(x_ref, w_ref, b_ref, *, H, W):
    """3x3 'same' conv as 9 shift-matmuls over a row-flattened padded plane,
    then BN-folded bias and LeakyReLU.

    x_ref: ((H+3)*(W+2), Cin)  zero-padded (top1/bottom2/left1/right1),
           row-major flattened input plane for one batch element.
    w_ref: (9, Cin, Cout)      BN-folded weights, tap order (dy, dx) row-major.
    b_ref: (1, Cout)           conv bias folded with BN scale/shift.

    Returns the "wide" (H*(W+2), Cout) activation; columns W and W+1 of every
    logical row are junk (wrap-around of the flattened layout) and are sliced
    away / masked by the caller.
    """
    Wp = W + 2
    MW = H * Wp
    Cin, Cout = w_ref.shape[1], w_ref.shape[2]
    acc = jnp.zeros((MW, Cout), jnp.float32)
    for t in range(9):
        dy, dx = divmod(t, 3)
        win = x_ref[pl.ds(dy * Wp + dx, MW), :]          # (MW, Cin) shifted view
        if Cin == 1:
            # Layer1 (Cin=1): contraction dim of 1 -> outer product on the VPU;
            # skip a pointless MXU round-trip for a K=1 "matmul".
            acc = acc + win * w_ref[t]                   # (MW,1) * (1,Cout)
        else:
            acc = acc + jnp.dot(win, w_ref[t],
                                preferred_element_type=jnp.float32)
    y = acc + b_ref[...]                                 # bias + BN (folded)
    return jnp.maximum(y, NEG_SLOPE * y)                 # LeakyReLU


def _conv_bn_lrelu_kernel(x_ref, w_ref, b_ref, o_ref, *, H, W):
    o_ref[...] = _conv_body(x_ref, w_ref, b_ref, H=H, W=W).astype(o_ref.dtype)


def _conv_bn_lrelu_head_kernel(x_ref, w_ref, b_ref, pool_ref, fcw_ref, fcb_ref,
                               o_ref, logit_ref, *, H, W):
    y = _conv_body(x_ref, w_ref, b_ref, H=H, W=W)
    o_ref[...] = y.astype(o_ref.dtype)
    # Global average pool as a masked (1, MW) @ (MW, Cout) mat-vec; pool_ref
    # zeroes the 2 junk columns per row and carries the 1/(H*W) scaling.
    pooled = jnp.dot(pool_ref[...], y, preferred_element_type=jnp.float32)
    logits = jnp.dot(pooled, fcw_ref[...],
                     preferred_element_type=jnp.float32) + fcb_ref[...]
    logit_ref[...] = logits.astype(logit_ref.dtype)


# ----------------------------------------------------------------------------
# Wrappers (light XLA glue: halo-pad, flatten, 2x2 pools)
# ----------------------------------------------------------------------------

def _pad_flatten(x):
    """(N,H,W,C) -> zero-pad (top1/bottom2/left1/right1) and flatten the plane
    row-major to (N, (H+3)*(W+2), C). Only a 1-pixel halo hits HBM."""
    N, H, W, C = x.shape
    xp = jnp.pad(x, ((0, 0), (1, 2), (1, 1), (0, 0)))
    return xp.reshape(N, (H + 3) * (W + 2), C)


def _maxpool2x2(x):
    """2x2 stride-2 max pool in plain JAX (XLA fuses it; not worth a kernel)."""
    N, H, W, C = x.shape
    return x.reshape(N, H // 2, 2, W // 2, 2, C).max(axis=(2, 4))


def conv3x3_bn_lrelu(x, w9, b, *, pool):
    """Fused 3x3 conv (pad=1) + folded BN + LeakyReLU; grid=(N,) so v7x gets
    >=2 parallel blocks. Optional 2x2 max pool on the sliced output."""
    N, H, W, C = x.shape
    Cout = w9.shape[-1]
    Wp, MW = W + 2, H * (W + 2)
    xf = _pad_flatten(x)
    Fin = xf.shape[1]
    wide = pl.pallas_call(
        functools.partial(_conv_bn_lrelu_kernel, H=H, W=W),
        out_shape=jax.ShapeDtypeStruct((N, MW, Cout), jnp.float32),
        grid=(N,),
        in_specs=[
            pl.BlockSpec((None, Fin, C), lambda n: (n, 0, 0)),
            pl.BlockSpec((9, C, Cout), lambda n: (0, 0, 0)),
            pl.BlockSpec((1, Cout), lambda n: (0, 0)),
        ],
        out_specs=pl.BlockSpec((None, MW, Cout), lambda n: (n, 0, 0)),
        compiler_params=pltpu.CompilerParams(
            dimension_semantics=("parallel",)),
    )(xf, w9, b)
    out = wide.reshape(N, H, Wp, Cout)[:, :, :W, :]
    return _maxpool2x2(out) if pool else out


def conv3x3_bn_lrelu_gap_fc(x, w9, b, fc_w, fc_b):
    """Layer-3 conv + folded BN + LeakyReLU with GAP + Linear fused as an
    in-kernel epilogue. Returns (layer3_activation NHWC, logits)."""
    N, H, W, C = x.shape
    Cout = w9.shape[-1]
    NC = fc_w.shape[-1]
    Wp, MW = W + 2, H * (W + 2)
    xf = _pad_flatten(x)
    Fin = xf.shape[1]
    # GAP weights: 1/(H*W) on valid columns, 0 on the 2 junk columns per row.
    col = jnp.arange(MW, dtype=jnp.int32) % Wp
    pool_w = jnp.where(col < W, 1.0 / (H * W), 0.0).astype(jnp.float32)
    pool_w = pool_w.reshape(1, MW)

    wide, logits = pl.pallas_call(
        functools.partial(_conv_bn_lrelu_head_kernel, H=H, W=W),
        out_shape=(jax.ShapeDtypeStruct((N, MW, Cout), jnp.float32),
                   jax.ShapeDtypeStruct((N, 1, NC), jnp.float32)),
        grid=(N,),
        in_specs=[
            pl.BlockSpec((None, Fin, C), lambda n: (n, 0, 0)),
            pl.BlockSpec((9, C, Cout), lambda n: (0, 0, 0)),
            pl.BlockSpec((1, Cout), lambda n: (0, 0)),
            pl.BlockSpec((1, MW), lambda n: (0, 0)),
            pl.BlockSpec((Cout, NC), lambda n: (0, 0)),
            pl.BlockSpec((1, NC), lambda n: (0, 0)),
        ],
        out_specs=(pl.BlockSpec((None, MW, Cout), lambda n: (n, 0, 0)),
                   pl.BlockSpec((None, 1, NC), lambda n: (n, 0, 0))),
        compiler_params=pltpu.CompilerParams(
            dimension_semantics=("parallel",)),
    )(xf, w9, b, pool_w, fc_w, fc_b)

    act = wide.reshape(N, H, Wp, Cout)[:, :, :W, :]
    return act, logits.reshape(N, NC)


# ----------------------------------------------------------------------------
# Parameter construction (deterministic, synthetic; BN + bias folded at init)
# ----------------------------------------------------------------------------

def init_params(key, input_channels=1, num_classes=10):
    keys = jax.random.split(key, 20)
    it = iter(keys)

    def conv_bn_folded(cin, cout):
        # PyTorch-layout conv weight + bias, plus synthetic BN inference stats.
        w = 0.1 * jax.random.normal(next(it), (cout, cin, 3, 3), jnp.float32)
        bias = 0.1 * jax.random.normal(next(it), (cout,), jnp.float32)
        gamma = 1.0 + 0.1 * jax.random.normal(next(it), (cout,), jnp.float32)
        beta = 0.1 * jax.random.normal(next(it), (cout,), jnp.float32)
        mean = 0.1 * jax.random.normal(next(it), (cout,), jnp.float32)
        var = 0.5 + jax.random.uniform(next(it), (cout,), jnp.float32)
        scale = gamma / jnp.sqrt(var + BN_EPS)
        shift = beta - mean * scale
        # fold: y = (x*W + b)*scale + shift  ==  x*(W*scale) + (b*scale + shift)
        w9 = jnp.transpose(w, (2, 3, 1, 0)).reshape(9, cin, cout) * scale
        b_fold = (bias * scale + shift).reshape(1, cout)
        return w9, b_fold

    p = {}
    p["w1"], p["b1"] = conv_bn_folded(input_channels, 16)   # KKLayer + BN1
    p["w2"], p["b2"] = conv_bn_folded(16, 32)                # conv2 + BN2
    p["w3"], p["b3"] = conv_bn_folded(32, 64)                # conv3 + BN3
    # nn.Linear(64, num_classes): torch weight is (num_classes, 64); store W^T.
    p["fc_w"] = 0.1 * jax.random.normal(next(it), (64, num_classes), jnp.float32)
    p["fc_b"] = 0.1 * jax.random.normal(next(it), (1, num_classes), jnp.float32)
    return p


# ----------------------------------------------------------------------------
# Forward pass
# ----------------------------------------------------------------------------

@jax.jit
def sliding_projection_net_forward(x_nchw, params):
    x = jnp.transpose(x_nchw, (0, 2, 3, 1))  # NCHW -> NHWC

    # layer1: MaxPool -> KKLayer(3x3 proj) -> BN -> LeakyReLU -> MaxPool
    x = _maxpool2x2(x)
    layer1_out = conv3x3_bn_lrelu(x, params["w1"], params["b1"], pool=True)

    # layer2: Conv3x3 -> BN -> LeakyReLU -> MaxPool
    layer2_out = conv3x3_bn_lrelu(layer1_out, params["w2"], params["b2"],
                                  pool=True)

    # layer3: Conv3x3 -> BN -> LeakyReLU, with GAP + Linear fused in-kernel
    layer3_out, logits = conv3x3_bn_lrelu_gap_fc(
        layer2_out, params["w3"], params["b3"], params["fc_w"], params["fc_b"])

    to_nchw = lambda t: jnp.transpose(t, (0, 3, 1, 2))
    return logits, [to_nchw(layer1_out), to_nchw(layer2_out), to_nchw(layer3_out)]


# ----------------------------------------------------------------------------
# Main
# ----------------------------------------------------------------------------

if __name__ == "__main__":
    key = jax.random.PRNGKey(0)
    k_x, k_p = jax.random.split(key)

    N, C_IN, H, W = 2, 1, 32, 32
    NUM_CLASSES = 10

    x = jax.random.normal(k_x, (N, C_IN, H, W), jnp.float32)
    params = init_params(k_p, input_channels=C_IN, num_classes=NUM_CLASSES)

    logits, feats = sliding_projection_net_forward(x, params)
    logits = jax.block_until_ready(logits)
    feats = [jax.block_until_ready(f) for f in feats]

    assert logits.shape == (N, NUM_CLASSES)
    assert feats[0].shape == (N, 16, 8, 8)
    assert feats[1].shape == (N, 32, 4, 4)
    assert feats[2].shape == (N, 64, 4, 4)
    assert all(bool(jnp.all(jnp.isfinite(f))) for f in [logits] + feats)

    print("KERNEL_OK")
</pallas_src>

<mosaic_0001>
module attributes {stable_mosaic.version = 11 : i64} {
  func.func @_conv_bn_lrelu_kernel(%arg0: i32, %arg1: memref<1x342x1xf32, #tpu.memory_space<vmem>>, %arg2: memref<9x1x16xf32, #tpu.memory_space<vmem>>, %arg3: memref<1x16xf32, #tpu.memory_space<vmem>>, %arg4: memref<1x288x16xf32, #tpu.memory_space<vmem>>) attributes {dimension_semantics = [#tpu.dimension_semantics<parallel>], iteration_bounds = array<i64: 2>, scalar_prefetch = 0 : i64, scratch_operands = 0 : i64, tpu.core_type = #tpu.core_type<tc>, window_params = [{transform_indices = @transform_0, window_bounds = array<i64: 1, 342, 1>}, {pipeline_mode = #tpu.pipeline_mode<synchronous>, transform_indices = @transform_1, window_bounds = array<i64: 9, 1, 16>}, {pipeline_mode = #tpu.pipeline_mode<synchronous>, transform_indices = @transform_2, window_bounds = array<i64: 1, 16>}, {transform_indices = @transform_3, window_bounds = array<i64: 1, 288, 16>}]} {
    %cst = arith.constant 0.000000e+00 : f32
    %0 = vector.broadcast %cst : f32 to vector<288x16xf32>
    %c0 = arith.constant 0 : index
    %c0_0 = arith.constant 0 : index
    %c0_1 = arith.constant 0 : index
    %1 = vector.load %arg1[%c0, %c0_0, %c0_1] : memref<1x342x1xf32, #tpu.memory_space<vmem>>, vector<1x288x1xf32>
    %2 = vector.shape_cast %1 : vector<1x288x1xf32> to vector<288x1xf32>
    %c0_2 = arith.constant 0 : index
    %c0_3 = arith.constant 0 : index
    %c0_4 = arith.constant 0 : index
    %3 = vector.load %arg2[%c0_2, %c0_3, %c0_4] : memref<9x1x16xf32, #tpu.memory_space<vmem>>, vector<1x1x16xf32>
    %4 = vector.shape_cast %3 : vector<1x1x16xf32> to vector<1x16xf32>
    %5 = vector.broadcast %2 : vector<288x1xf32> to vector<288x16xf32>
    %6 = vector.broadcast %4 : vector<1x16xf32> to vector<288x16xf32>
    %7 = arith.mulf %5, %6 : vector<288x16xf32>
    %8 = arith.addf %0, %7 : vector<288x16xf32>
    %c0_5 = arith.constant 0 : index
    %c1 = arith.constant 1 : index
    %c0_6 = arith.constant 0 : index
    %9 = vector.load %arg1[%c0_5, %c1, %c0_6] : memref<1x342x1xf32, #tpu.memory_space<vmem>>, vector<1x288x1xf32>
    %10 = vector.shape_cast %9 : vector<1x288x1xf32> to vector<288x1xf32>
    %c1_7 = arith.constant 1 : index
    %c0_8 = arith.constant 0 : index
    %c0_9 = arith.constant 0 : index
    %11 = vector.load %arg2[%c1_7, %c0_8, %c0_9] : memref<9x1x16xf32, #tpu.memory_space<vmem>>, vector<1x1x16xf32>
    %12 = vector.shape_cast %11 : vector<1x1x16xf32> to vector<1x16xf32>
    %13 = vector.broadcast %10 : vector<288x1xf32> to vector<288x16xf32>
    %14 = vector.broadcast %12 : vector<1x16xf32> to vector<288x16xf32>
    %15 = arith.mulf %13, %14 : vector<288x16xf32>
    %16 = arith.addf %8, %15 : vector<288x16xf32>
    %c0_10 = arith.constant 0 : index
    %c2 = arith.constant 2 : index
    %c0_11 = arith.constant 0 : index
    %17 = vector.load %arg1[%c0_10, %c2, %c0_11] : memref<1x342x1xf32, #tpu.memory_space<vmem>>, vector<1x288x1xf32>
    %18 = vector.shape_cast %17 : vector<1x288x1xf32> to vector<288x1xf32>
    %c2_12 = arith.constant 2 : index
    %c0_13 = arith.constant 0 : index
    %c0_14 = arith.constant 0 : index
    %19 = vector.load %arg2[%c2_12, %c0_13, %c0_14] : memref<9x1x16xf32, #tpu.memory_space<vmem>>, vector<1x1x16xf32>
    %20 = vector.shape_cast %19 : vector<1x1x16xf32> to vector<1x16xf32>
    %21 = vector.broadcast %18 : vector<288x1xf32> to vector<288x16xf32>
    %22 = vector.broadcast %20 : vector<1x16xf32> to vector<288x16xf32>
    %23 = arith.mulf %21, %22 : vector<288x16xf32>
    %24 = arith.addf %16, %23 : vector<288x16xf32>
    %c0_15 = arith.constant 0 : index
    %c18 = arith.constant 18 : index
    %c0_16 = arith.constant 0 : index
    %25 = vector.load %arg1[%c0_15, %c18, %c0_16] : memref<1x342x1xf32, #tpu.memory_space<vmem>>, vector<1x288x1xf32>
    %26 = vector.shape_cast %25 : vector<1x288x1xf32> to vector<288x1xf32>
    %c3 = arith.constant 3 : index
    %c0_17 = arith.constant 0 : index
    %c0_18 = arith.constant 0 : index
    %27 = vector.load %arg2[%c3, %c0_17, %c0_18] : memref<9x1x16xf32, #tpu.memory_space<vmem>>, vector<1x1x16xf32>
    %28 = vector.shape_cast %27 : vector<1x1x16xf32> to vector<1x16xf32>
    %29 = vector.broadcast %26 : vector<288x1xf32> to vector<288x16xf32>
    %30 = vector.broadcast %28 : vector<1x16xf32> to vector<288x16xf32>
    %31 = arith.mulf %29, %30 : vector<288x16xf32>
    %32 = arith.addf %24, %31 : vector<288x16xf32>
    %c0_19 = arith.constant 0 : index
    %c19 = arith.constant 19 : index
    %c0_20 = arith.constant 0 : index
    %33 = vector.load %arg1[%c0_19, %c19, %c0_20] : memref<1x342x1xf32, #tpu.memory_space<vmem>>, vector<1x288x1xf32>
    %34 = vector.shape_cast %33 : vector<1x288x1xf32> to vector<288x1xf32>
    %c4 = arith.constant 4 : index
    %c0_21 = arith.constant 0 : index
    %c0_22 = arith.constant 0 : index
    %35 = vector.load %arg2[%c4, %c0_21, %c0_22] : memref<9x1x16xf32, #tpu.memory_space<vmem>>, vector<1x1x16xf32>
    %36 = vector.shape_cast %35 : vector<1x1x16xf32> to vector<1x16xf32>
    %37 = vector.broadcast %34 : vector<288x1xf32> to vector<288x16xf32>
    %38 = vector.broadcast %36 : vector<1x16xf32> to vector<288x16xf32>
    %39 = arith.mulf %37, %38 : vector<288x16xf32>
    %40 = arith.addf %32, %39 : vector<288x16xf32>
    %c0_23 = arith.constant 0 : index
    %c20 = arith.constant 20 : index
    %c0_24 = arith.constant 0 : index
    %41 = vector.load %arg1[%c0_23, %c20, %c0_24] : memref<1x342x1xf32, #tpu.memory_space<vmem>>, vector<1x288x1xf32>
    %42 = vector.shape_cast %41 : vector<1x288x1xf32> to vector<288x1xf32>
    %c5 = arith.constant 5 : index
    %c0_25 = arith.constant 0 : index
    %c0_26 = arith.constant 0 : index
    %43 = vector.load %arg2[%c5, %c0_25, %c0_26] : memref<9x1x16xf32, #tpu.memory_space<vmem>>, vector<1x1x16xf32>
    %44 = vector.shape_cast %43 : vector<1x1x16xf32> to vector<1x16xf32>
    %45 = vector.broadcast %42 : vector<288x1xf32> to vector<288x16xf32>
    %46 = vector.broadcast %44 : vector<1x16xf32> to vector<288x16xf32>
    %47 = arith.mulf %45, %46 : vector<288x16xf32>
    %48 = arith.addf %40, %47 : vector<288x16xf32>
    %c0_27 = arith.constant 0 : index
    %c36 = arith.constant 36 : index
    %c0_28 = arith.constant 0 : index
    %49 = vector.load %arg1[%c0_27, %c36, %c0_28] : memref<1x342x1xf32, #tpu.memory_space<vmem>>, vector<1x288x1xf32>
    %50 = vector.shape_cast %49 : vector<1x288x1xf32> to vector<288x1xf32>
    %c6 = arith.constant 6 : index
    %c0_29 = arith.constant 0 : index
    %c0_30 = arith.constant 0 : index
    %51 = vector.load %arg2[%c6, %c0_29, %c0_30] : memref<9x1x16xf32, #tpu.memory_space<vmem>>, vector<1x1x16xf32>
    %52 = vector.shape_cast %51 : vector<1x1x16xf32> to vector<1x16xf32>
    %53 = vector.broadcast %50 : vector<288x1xf32> to vector<288x16xf32>
    %54 = vector.broadcast %52 : vector<1x16xf32> to vector<288x16xf32>
    %55 = arith.mulf %53, %54 : vector<288x16xf32>
    %56 = arith.addf %48, %55 : vector<288x16xf32>
    %c0_31 = arith.constant 0 : index
    %c37 = arith.constant 37 : index
    %c0_32 = arith.constant 0 : index
    %57 = vector.load %arg1[%c0_31, %c37, %c0_32] : memref<1x342x1xf32, #tpu.memory_space<vmem>>, vector<1x288x1xf32>
    %58 = vector.shape_cast %57 : vector<1x288x1xf32> to vector<288x1xf32>
    %c7 = arith.constant 7 : index
    %c0_33 = arith.constant 0 : index
    %c0_34 = arith.constant 0 : index
    %59 = vector.load %arg2[%c7, %c0_33, %c0_34] : memref<9x1x16xf32, #tpu.memory_space<vmem>>, vector<1x1x16xf32>
    %60 = vector.shape_cast %59 : vector<1x1x16xf32> to vector<1x16xf32>
    %61 = vector.broadcast %58 : vector<288x1xf32> to vector<288x16xf32>
    %62 = vector.broadcast %60 : vector<1x16xf32> to vector<288x16xf32>
    %63 = arith.mulf %61, %62 : vector<288x16xf32>
    %64 = arith.addf %56, %63 : vector<288x16xf32>
    %c0_35 = arith.constant 0 : index
    %c38 = arith.constant 38 : index
    %c0_36 = arith.constant 0 : index
    %65 = vector.load %arg1[%c0_35, %c38, %c0_36] : memref<1x342x1xf32, #tpu.memory_space<vmem>>, vector<1x288x1xf32>
    %66 = vector.shape_cast %65 : vector<1x288x1xf32> to vector<288x1xf32>
    %c8 = arith.constant 8 : index
    %c0_37 = arith.constant 0 : index
    %c0_38 = arith.constant 0 : index
    %67 = vector.load %arg2[%c8, %c0_37, %c0_38] : memref<9x1x16xf32, #tpu.memory_space<vmem>>, vector<1x1x16xf32>
    %68 = vector.shape_cast %67 : vector<1x1x16xf32> to vector<1x16xf32>
    %69 = vector.broadcast %66 : vector<288x1xf32> to vector<288x16xf32>
    %70 = vector.broadcast %68 : vector<1x16xf32> to vector<288x16xf32>
    %71 = arith.mulf %69, %70 : vector<288x16xf32>
    %72 = arith.addf %64, %71 : vector<288x16xf32>
    %c0_39 = arith.constant 0 : index
    %c0_40 = arith.constant 0 : index
    %73 = vector.load %arg3[%c0_39, %c0_40] : memref<1x16xf32, #tpu.memory_space<vmem>>, vector<1x16xf32>
    %74 = vector.broadcast %73 : vector<1x16xf32> to vector<288x16xf32>
    %75 = arith.addf %72, %74 : vector<288x16xf32>
    %cst_41 = arith.constant 0.00999999977 : f32
    %76 = vector.broadcast %cst_41 : f32 to vector<288x16xf32>
    %77 = arith.mulf %76, %75 : vector<288x16xf32>
    %78 = arith.maximumf %75, %77 : vector<288x16xf32>
    %c0_42 = arith.constant 0 : index
    %c0_43 = arith.constant 0 : index
    %c0_44 = arith.constant 0 : index
    %79 = vector.load %arg4[%c0_42, %c0_43, %c0_44] : memref<1x288x16xf32, #tpu.memory_space<vmem>>, vector<1x288x16xf32>
    %80 = vector.shape_cast %79 : vector<1x288x16xf32> to vector<288x16xf32>
    %81 = vector.shape_cast %78 : vector<288x16xf32> to vector<1x288x16xf32>
    tpu.vector_store %arg4[%c0_42, %c0_43, %c0_44], %81 {strides = array<i32>} : memref<1x288x16xf32, #tpu.memory_space<vmem>>, vector<1x288x16xf32>,
    return
  }
  func.func @transform_0(%arg0: i32) -> (i32, i32, i32) {
    %c0_i32 = arith.constant 0 : i32
    %c0_i32_0 = arith.constant 0 : i32
    %c0_i32_1 = arith.constant 0 : i32
    return %arg0, %c0_i32, %c0_i32_0 : i32, i32, i32
  }
  func.func @transform_1(%arg0: i32) -> (i32, i32, i32) {
    %c0_i32 = arith.constant 0 : i32
    %c0_i32_0 = arith.constant 0 : i32
    %c0_i32_1 = arith.constant 0 : i32
    %c0_i32_2 = arith.constant 0 : i32
    return %c0_i32, %c0_i32_0, %c0_i32_1 : i32, i32, i32
  }
  func.func @transform_2(%arg0: i32) -> (i32, i32) {
    %c0_i32 = arith.constant 0 : i32
    %c0_i32_0 = arith.constant 0 : i32
    %c0_i32_1 = arith.constant 0 : i32
    return %c0_i32, %c0_i32_0 : i32, i32
  }
  func.func @transform_3(%arg0: i32) -> (i32, i32, i32) {
    %c0_i32 = arith.constant 0 : i32
    %c0_i32_0 = arith.constant 0 : i32
    %c0_i32_1 = arith.constant 0 : i32
    return %arg0, %c0_i32, %c0_i32_0 : i32, i32, i32
  }
}

module attributes {stable_mosaic.version = 11 : i64} {
  func.func @_conv_bn_lrelu_kernel(%arg0: i32, %arg1: memref<1x110x16xf32, #tpu.memory_space<vmem>>, %arg2: memref<9x16x32xf32, #tpu.memory_space<vmem>>, %arg3: memref<1x32xf32, #tpu.memory_space<vmem>>, %arg4: memref<1x80x32xf32, #tpu.memory_space<vmem>>) attributes {dimension_semantics = [#tpu.dimension_semantics<parallel>], iteration_bounds = array<i64: 2>, scalar_prefetch = 0 : i64, scratch_operands = 0 : i64, tpu.core_type = #tpu.core_type<tc>, window_params = [{transform_indices = @transform_0, window_bounds = array<i64: 1, 110, 16>}, {pipeline_mode = #tpu.pipeline_mode<synchronous>, transform_indices = @transform_1, window_bounds = array<i64: 9, 16, 32>}, {pipeline_mode = #tpu.pipeline_mode<synchronous>, transform_indices = @transform_2, window_bounds = array<i64: 1, 32>}, {transform_indices = @transform_3, window_bounds = array<i64: 1, 80, 32>}]} {
    %cst = arith.constant 0.000000e+00 : f32
    %0 = vector.broadcast %cst : f32 to vector<80x32xf32>
    %c0 = arith.constant 0 : index
    %c0_0 = arith.constant 0 : index
    %c0_1 = arith.constant 0 : index
    %1 = vector.load %arg1[%c0, %c0_0, %c0_1] : memref<1x110x16xf32, #tpu.memory_space<vmem>>, vector<1x80x16xf32>
    %2 = vector.shape_cast %1 : vector<1x80x16xf32> to vector<80x16xf32>
    %c0_2 = arith.constant 0 : index
    %c0_3 = arith.constant 0 : index
    %c0_4 = arith.constant 0 : index
    %3 = vector.load %arg2[%c0_2, %c0_3, %c0_4] : memref<9x16x32xf32, #tpu.memory_space<vmem>>, vector<1x16x32xf32>
    %4 = vector.shape_cast %3 : vector<1x16x32xf32> to vector<16x32xf32>
    %cst_5 = arith.constant dense<0.000000e+00> : vector<80x32xf32>
    %5 = tpu.matmul %2, %4, %cst_5 {dimension_numbers = #tpu.dot_dimension_numbers<[1], [0], [0], [1], [0, 0, 1, 1], [], []>} : vector<80x16xf32>, vector<16x32xf32>, vector<80x32xf32> -> vector<80x32xf32>
    %6 = arith.addf %0, %5 : vector<80x32xf32>
    %c0_6 = arith.constant 0 : index
    %c1 = arith.constant 1 : index
    %c0_7 = arith.constant 0 : index
    %7 = vector.load %arg1[%c0_6, %c1, %c0_7] : memref<1x110x16xf32, #tpu.memory_space<vmem>>, vector<1x80x16xf32>
    %8 = vector.shape_cast %7 : vector<1x80x16xf32> to vector<80x16xf32>
    %c1_8 = arith.constant 1 : index
    %c0_9 = arith.constant 0 : index
    %c0_10 = arith.constant 0 : index
    %9 = vector.load %arg2[%c1_8, %c0_9, %c0_10] : memref<9x16x32xf32, #tpu.memory_space<vmem>>, vector<1x16x32xf32>
    %10 = vector.shape_cast %9 : vector<1x16x32xf32> to vector<16x32xf32>
    %cst_11 = arith.constant dense<0.000000e+00> : vector<80x32xf32>
    %11 = tpu.matmul %8, %10, %cst_11 {dimension_numbers = #tpu.dot_dimension_numbers<[1], [0], [0], [1], [0, 0, 1, 1], [], []>} : vector<80x16xf32>, vector<16x32xf32>, vector<80x32xf32> -> vector<80x32xf32>
    %12 = arith.addf %6, %11 : vector<80x32xf32>
    %c0_12 = arith.constant 0 : index
    %c2 = arith.constant 2 : index
    %c0_13 = arith.constant 0 : index
    %13 = vector.load %arg1[%c0_12, %c2, %c0_13] : memref<1x110x16xf32, #tpu.memory_space<vmem>>, vector<1x80x16xf32>
    %14 = vector.shape_cast %13 : vector<1x80x16xf32> to vector<80x16xf32>
    %c2_14 = arith.constant 2 : index
    %c0_15 = arith.constant 0 : index
    %c0_16 = arith.constant 0 : index
    %15 = vector.load %arg2[%c2_14, %c0_15, %c0_16] : memref<9x16x32xf32, #tpu.memory_space<vmem>>, vector<1x16x32xf32>
    %16 = vector.shape_cast %15 : vector<1x16x32xf32> to vector<16x32xf32>
    %cst_17 = arith.constant dense<0.000000e+00> : vector<80x32xf32>
    %17 = tpu.matmul %14, %16, %cst_17 {dimension_numbers = #tpu.dot_dimension_numbers<[1], [0], [0], [1], [0, 0, 1, 1], [], []>} : vector<80x16xf32>, vector<16x32xf32>, vector<80x32xf32> -> vector<80x32xf32>
    %18 = arith.addf %12, %17 : vector<80x32xf32>
    %c0_18 = arith.constant 0 : index
    %c10 = arith.constant 10 : index
    %c0_19 = arith.constant 0 : index
    %19 = vector.load %arg1[%c0_18, %c10, %c0_19] : memref<1x110x16xf32, #tpu.memory_space<vmem>>, vector<1x80x16xf32>
    %20 = vector.shape_cast %19 : vector<1x80x16xf32> to vector<80x16xf32>
    %c3 = arith.constant 3 : index
    %c0_20 = arith.constant 0 : index
    %c0_21 = arith.constant 0 : index
    %21 = vector.load %arg2[%c3, %c0_20, %c0_21] : memref<9x16x32xf32, #tpu.memory_space<vmem>>, vector<1x16x32xf32>
    %22 = vector.shape_cast %21 : vector<1x16x32xf32> to vector<16x32xf32>
    %cst_22 = arith.constant dense<0.000000e+00> : vector<80x32xf32>
    %23 = tpu.matmul %20, %22, %cst_22 {dimension_numbers = #tpu.dot_dimension_numbers<[1], [0], [0], [1], [0, 0, 1, 1], [], []>} : vector<80x16xf32>, vector<16x32xf32>, vector<80x32xf32> -> vector<80x32xf32>
    %24 = arith.addf %18, %23 : vector<80x32xf32>
    %c0_23 = arith.constant 0 : index
    %c11 = arith.constant 11 : index
    %c0_24 = arith.constant 0 : index
    %25 = vector.load %arg1[%c0_23, %c11, %c0_24] : memref<1x110x16xf32, #tpu.memory_space<vmem>>, vector<1x80x16xf32>
    %26 = vector.shape_cast %25 : vector<1x80x16xf32> to vector<80x16xf32>
    %c4 = arith.constant 4 : index
    %c0_25 = arith.constant 0 : index
    %c0_26 = arith.constant 0 : index
    %27 = vector.load %arg2[%c4, %c0_25, %c0_26] : memref<9x16x32xf32, #tpu.memory_space<vmem>>, vector<1x16x32xf32>
    %28 = vector.shape_cast %27 : vector<1x16x32xf32> to vector<16x32xf32>
    %cst_27 = arith.constant dense<0.000000e+00> : vector<80x32xf32>
    %29 = tpu.matmul %26, %28, %cst_27 {dimension_numbers = #tpu.dot_dimension_numbers<[1], [0], [0], [1], [0, 0, 1, 1], [], []>} : vector<80x16xf32>, vector<16x32xf32>, vector<80x32xf32> -> vector<80x32xf32>
    %30 = arith.addf %24, %29 : vector<80x32xf32>
    %c0_28 = arith.constant 0 : index
    %c12 = arith.constant 12 : index
    %c0_29 = arith.constant 0 : index
    %31 = vector.load %arg1[%c0_28, %c12, %c0_29] : memref<1x110x16xf32, #tpu.memory_space<vmem>>, vector<1x80x16xf32>
    %32 = vector.shape_cast %31 : vector<1x80x16xf32> to vector<80x16xf32>
    %c5 = arith.constant 5 : index
    %c0_30 = arith.constant 0 : index
    %c0_31 = arith.constant 0 : index
    %33 = vector.load %arg2[%c5, %c0_30, %c0_31] : memref<9x16x32xf32, #tpu.memory_space<vmem>>, vector<1x16x32xf32>
    %34 = vector.shape_cast %33 : vector<1x16x32xf32> to vector<16x32xf32>
    %cst_32 = arith.constant dense<0.000000e+00> : vector<80x32xf32>
    %35 = tpu.matmul %32, %34, %cst_32 {dimension_numbers = #tpu.dot_dimension_numbers<[1], [0], [0], [1], [0, 0, 1, 1], [], []>} : vector<80x16xf32>, vector<16x32xf32>, vector<80x32xf32> -> vector<80x32xf32>
    %36 = arith.addf %30, %35 : vector<80x32xf32>
    %c0_33 = arith.constant 0 : index
    %c20 = arith.constant 20 : index
    %c0_34 = arith.constant 0 : index
    %37 = vector.load %arg1[%c0_33, %c20, %c0_34] : memref<1x110x16xf32, #tpu.memory_space<vmem>>, vector<1x80x16xf32>
    %38 = vector.shape_cast %37 : vector<1x80x16xf32> to vector<80x16xf32>
    %c6 = arith.constant 6 : index
    %c0_35 = arith.constant 0 : index
    %c0_36 = arith.constant 0 : index
    %39 = vector.load %arg2[%c6, %c0_35, %c0_36] : memref<9x16x32xf32, #tpu.memory_space<vmem>>, vector<1x16x32xf32>
    %40 = vector.shape_cast %39 : vector<1x16x32xf32> to vector<16x32xf32>
    %cst_37 = arith.constant dense<0.000000e+00> : vector<80x32xf32>
    %41 = tpu.matmul %38, %40, %cst_37 {dimension_numbers = #tpu.dot_dimension_numbers<[1], [0], [0], [1], [0, 0, 1, 1], [], []>} : vector<80x16xf32>, vector<16x32xf32>, vector<80x32xf32> -> vector<80x32xf32>
    %42 = arith.addf %36, %41 : vector<80x32xf32>
    %c0_38 = arith.constant 0 : index
    %c21 = arith.constant 21 : index
    %c0_39 = arith.constant 0 : index
    %43 = vector.load %arg1[%c0_38, %c21, %c0_39] : memref<1x110x16xf32, #tpu.memory_space<vmem>>, vector<1x80x16xf32>
    %44 = vector.shape_cast %43 : vector<1x80x16xf32> to vector<80x16xf32>
    %c7 = arith.constant 7 : index
    %c0_40 = arith.constant 0 : index
    %c0_41 = arith.constant 0 : index
    %45 = vector.load %arg2[%c7, %c0_40, %c0_41] : memref<9x16x32xf32, #tpu.memory_space<vmem>>, vector<1x16x32xf32>
    %46 = vector.shape_cast %45 : vector<1x16x32xf32> to vector<16x32xf32>
    %cst_42 = arith.constant dense<0.000000e+00> : vector<80x32xf32>
    %47 = tpu.matmul %44, %46, %cst_42 {dimension_numbers = #tpu.dot_dimension_numbers<[1], [0], [0], [1], [0, 0, 1, 1], [], []>} : vector<80x16xf32>, vector<16x32xf32>, vector<80x32xf32> -> vector<80x32xf32>
    %48 = arith.addf %42, %47 : vector<80x32xf32>
    %c0_43 = arith.constant 0 : index
    %c22 = arith.constant 22 : index
    %c0_44 = arith.constant 0 : index
    %49 = vector.load %arg1[%c0_43, %c22, %c0_44] : memref<1x110x16xf32, #tpu.memory_space<vmem>>, vector<1x80x16xf32>
    %50 = vector.shape_cast %49 : vector<1x80x16xf32> to vector<80x16xf32>
    %c8 = arith.constant 8 : index
    %c0_45 = arith.constant 0 : index
    %c0_46 = arith.constant 0 : index
    %51 = vector.load %arg2[%c8, %c0_45, %c0_46] : memref<9x16x32xf32, #tpu.memory_space<vmem>>, vector<1x16x32xf32>
    %52 = vector.shape_cast %51 : vector<1x16x32xf32> to vector<16x32xf32>
    %cst_47 = arith.constant dense<0.000000e+00> : vector<80x32xf32>
    %53 = tpu.matmul %50, %52, %cst_47 {dimension_numbers = #tpu.dot_dimension_numbers<[1], [0], [0], [1], [0, 0, 1, 1], [], []>} : vector<80x16xf32>, vector<16x32xf32>, vector<80x32xf32> -> vector<80x32xf32>
    %54 = arith.addf %48, %53 : vector<80x32xf32>
    %c0_48 = arith.constant 0 : index
    %c0_49 = arith.constant 0 : index
    %55 = vector.load %arg3[%c0_48, %c0_49] : memref<1x32xf32, #tpu.memory_space<vmem>>, vector<1x32xf32>
    %56 = vector.broadcast %55 : vector<1x32xf32> to vector<80x32xf32>
    %57 = arith.addf %54, %56 : vector<80x32xf32>
    %cst_50 = arith.constant 0.00999999977 : f32
    %58 = vector.broadcast %cst_50 : f32 to vector<80x32xf32>
    %59 = arith.mulf %58, %57 : vector<80x32xf32>
    %60 = arith.maximumf %57, %59 : vector<80x32xf32>
    %c0_51 = arith.constant 0 : index
    %c0_52 = arith.constant 0 : index
    %c0_53 = arith.constant 0 : index
    %61 = vector.load %arg4[%c0_51, %c0_52, %c0_53] : memref<1x80x32xf32, #tpu.memory_space<vmem>>, vector<1x80x32xf32>
    %62 = vector.shape_cast %61 : vector<1x80x32xf32> to vector<80x32xf32>
    %63 = vector.shape_cast %60 : vector<80x32xf32> to vector<1x80x32xf32>
    tpu.vector_store %arg4[%c0_51, %c0_52, %c0_53], %63 {strides = array<i32>} : memref<1x80x32xf32, #tpu.memory_space<vmem>>, vector<1x80x32xf32>,
    return
  }
  func.func @transform_0(%arg0: i32) -> (i32, i32, i32) {
    %c0_i32 = arith.constant 0 : i32
    %c0_i32_0 = arith.constant 0 : i32
    %c0_i32_1 = arith.constant 0 : i32
    return %arg0, %c0_i32, %c0_i32_0 : i32, i32, i32
  }
  func.func @transform_1(%arg0: i32) -> (i32, i32, i32) {
    %c0_i32 = arith.constant 0 : i32
    %c0_i32_0 = arith.constant 0 : i32
    %c0_i32_1 = arith.constant 0 : i32
    %c0_i32_2 = arith.constant 0 : i32
    return %c0_i32, %c0_i32_0, %c0_i32_1 : i32, i32, i32
  }
  func.func @transform_2(%arg0: i32) -> (i32, i32) {
    %c0_i32 = arith.constant 0 : i32
    %c0_i32_0 = arith.constant 0 : i32
    %c0_i32_1 = arith.constant 0 : i32
    return %c0_i32, %c0_i32_0 : i32, i32
  }
  func.func @transform_3(%arg0: i32) -> (i32, i32, i32) {
    %c0_i32 = arith.constant 0 : i32
    %c0_i32_0 = arith.constant 0 : i32
    %c0_i32_1 = arith.constant 0 : i32
    return %arg0, %c0_i32, %c0_i32_0 : i32, i32, i32
  }
}

module attributes {stable_mosaic.version = 11 : i64} {
  func.func @_conv_bn_lrelu_head_kernel(%arg0: i32, %arg1: memref<1x42x32xf32, #tpu.memory_space<vmem>>, %arg2: memref<9x32x64xf32, #tpu.memory_space<vmem>>, %arg3: memref<1x64xf32, #tpu.memory_space<vmem>>, %arg4: memref<1x24xf32, #tpu.memory_space<vmem>>, %arg5: memref<64x10xf32, #tpu.memory_space<vmem>>, %arg6: memref<1x10xf32, #tpu.memory_space<vmem>>, %arg7: memref<1x24x64xf32, #tpu.memory_space<vmem>>, %arg8: memref<1x1x10xf32, #tpu.memory_space<vmem>>) attributes {dimension_semantics = [#tpu.dimension_semantics<parallel>], iteration_bounds = array<i64: 2>, scalar_prefetch = 0 : i64, scratch_operands = 0 : i64, tpu.core_type = #tpu.core_type<tc>, window_params = [{transform_indices = @transform_0, window_bounds = array<i64: 1, 42, 32>}, {pipeline_mode = #tpu.pipeline_mode<synchronous>, transform_indices = @transform_1, window_bounds = array<i64: 9, 32, 64>}, {pipeline_mode = #tpu.pipeline_mode<synchronous>, transform_indices = @transform_2, window_bounds = array<i64: 1, 64>}, {pipeline_mode = #tpu.pipeline_mode<synchronous>, transform_indices = @transform_3, window_bounds = array<i64: 1, 24>}, {pipeline_mode = #tpu.pipeline_mode<synchronous>, transform_indices = @transform_4, window_bounds = array<i64: 64, 10>}, {pipeline_mode = #tpu.pipeline_mode<synchronous>, transform_indices = @transform_5, window_bounds = array<i64: 1, 10>}, {transform_indices = @transform_6, window_bounds = array<i64: 1, 24, 64>}, {transform_indices = @transform_7, window_bounds = array<i64: 1, 1, 10>}]} {
    %cst = arith.constant 0.000000e+00 : f32
    %0 = vector.broadcast %cst : f32 to vector<24x64xf32>
    %c0 = arith.constant 0 : index
    %c0_0 = arith.constant 0 : index
    %c0_1 = arith.constant 0 : index
    %1 = vector.load %arg1[%c0, %c0_0, %c0_1] : memref<1x42x32xf32, #tpu.memory_space<vmem>>, vector<1x24x32xf32>
    %2 = vector.shape_cast %1 : vector<1x24x32xf32> to vector<24x32xf32>
    %c0_2 = arith.constant 0 : index
    %c0_3 = arith.constant 0 : index
    %c0_4 = arith.constant 0 : index
    %3 = vector.load %arg2[%c0_2, %c0_3, %c0_4] : memref<9x32x64xf32, #tpu.memory_space<vmem>>, vector<1x32x64xf32>
    %4 = vector.shape_cast %3 : vector<1x32x64xf32> to vector<32x64xf32>
    %cst_5 = arith.constant dense<0.000000e+00> : vector<24x64xf32>
    %5 = tpu.matmul %2, %4, %cst_5 {dimension_numbers = #tpu.dot_dimension_numbers<[1], [0], [0], [1], [0, 0, 1, 1], [], []>} : vector<24x32xf32>, vector<32x64xf32>, vector<24x64xf32> -> vector<24x64xf32>
    %6 = arith.addf %0, %5 : vector<24x64xf32>
    %c0_6 = arith.constant 0 : index
    %c1 = arith.constant 1 : index
    %c0_7 = arith.constant 0 : index
    %7 = vector.load %arg1[%c0_6, %c1, %c0_7] : memref<1x42x32xf32, #tpu.memory_space<vmem>>, vector<1x24x32xf32>
    %8 = vector.shape_cast %7 : vector<1x24x32xf32> to vector<24x32xf32>
    %c1_8 = arith.constant 1 : index
    %c0_9 = arith.constant 0 : index
    %c0_10 = arith.constant 0 : index
    %9 = vector.load %arg2[%c1_8, %c0_9, %c0_10] : memref<9x32x64xf32, #tpu.memory_space<vmem>>, vector<1x32x64xf32>
    %10 = vector.shape_cast %9 : vector<1x32x64xf32> to vector<32x64xf32>
    %cst_11 = arith.constant dense<0.000000e+00> : vector<24x64xf32>
    %11 = tpu.matmul %8, %10, %cst_11 {dimension_numbers = #tpu.dot_dimension_numbers<[1], [0], [0], [1], [0, 0, 1, 1], [], []>} : vector<24x32xf32>, vector<32x64xf32>, vector<24x64xf32> -> vector<24x64xf32>
    %12 = arith.addf %6, %11 : vector<24x64xf32>
    %c0_12 = arith.constant 0 : index
    %c2 = arith.constant 2 : index
    %c0_13 = arith.constant 0 : index
    %13 = vector.load %arg1[%c0_12, %c2, %c0_13] : memref<1x42x32xf32, #tpu.memory_space<vmem>>, vector<1x24x32xf32>
    %14 = vector.shape_cast %13 : vector<1x24x32xf32> to vector<24x32xf32>
    %c2_14 = arith.constant 2 : index
    %c0_15 = arith.constant 0 : index
    %c0_16 = arith.constant 0 : index
    %15 = vector.load %arg2[%c2_14, %c0_15, %c0_16] : memref<9x32x64xf32, #tpu.memory_space<vmem>>, vector<1x32x64xf32>
    %16 = vector.shape_cast %15 : vector<1x32x64xf32> to vector<32x64xf32>
    %cst_17 = arith.constant dense<0.000000e+00> : vector<24x64xf32>
    %17 = tpu.matmul %14, %16, %cst_17 {dimension_numbers = #tpu.dot_dimension_numbers<[1], [0], [0], [1], [0, 0, 1, 1], [], []>} : vector<24x32xf32>, vector<32x64xf32>, vector<24x64xf32> -> vector<24x64xf32>
    %18 = arith.addf %12, %17 : vector<24x64xf32>
    %c0_18 = arith.constant 0 : index
    %c6 = arith.constant 6 : index
    %c0_19 = arith.constant 0 : index
    %19 = vector.load %arg1[%c0_18, %c6, %c0_19] : memref<1x42x32xf32, #tpu.memory_space<vmem>>, vector<1x24x32xf32>
    %20 = vector.shape_cast %19 : vector<1x24x32xf32> to vector<24x32xf32>
    %c3 = arith.constant 3 : index
    %c0_20 = arith.constant 0 : index
    %c0_21 = arith.constant 0 : index
    %21 = vector.load %arg2[%c3, %c0_20, %c0_21] : memref<9x32x64xf32, #tpu.memory_space<vmem>>, vector<1x32x64xf32>
    %22 = vector.shape_cast %21 : vector<1x32x64xf32> to vector<32x64xf32>
    %cst_22 = arith.constant dense<0.000000e+00> : vector<24x64xf32>
    %23 = tpu.matmul %20, %22, %cst_22 {dimension_numbers = #tpu.dot_dimension_numbers<[1], [0], [0], [1], [0, 0, 1, 1], [], []>} : vector<24x32xf32>, vector<32x64xf32>, vector<24x64xf32> -> vector<24x64xf32>
    %24 = arith.addf %18, %23 : vector<24x64xf32>
    %c0_23 = arith.constant 0 : index
    %c7 = arith.constant 7 : index
    %c0_24 = arith.constant 0 : index
    %25 = vector.load %arg1[%c0_23, %c7, %c0_24] : memref<1x42x32xf32, #tpu.memory_space<vmem>>, vector<1x24x32xf32>
    %26 = vector.shape_cast %25 : vector<1x24x32xf32> to vector<24x32xf32>
    %c4 = arith.constant 4 : index
    %c0_25 = arith.constant 0 : index
    %c0_26 = arith.constant 0 : index
    %27 = vector.load %arg2[%c4, %c0_25, %c0_26] : memref<9x32x64xf32, #tpu.memory_space<vmem>>, vector<1x32x64xf32>
    %28 = vector.shape_cast %27 : vector<1x32x64xf32> to vector<32x64xf32>
    %cst_27 = arith.constant dense<0.000000e+00> : vector<24x64xf32>
    %29 = tpu.matmul %26, %28, %cst_27 {dimension_numbers = #tpu.dot_dimension_numbers<[1], [0], [0], [1], [0, 0, 1, 1], [], []>} : vector<24x32xf32>, vector<32x64xf32>, vector<24x64xf32> -> vector<24x64xf32>
    %30 = arith.addf %24, %29 : vector<24x64xf32>
    %c0_28 = arith.constant 0 : index
    %c8 = arith.constant 8 : index
    %c0_29 = arith.constant 0 : index
    %31 = vector.load %arg1[%c0_28, %c8, %c0_29] : memref<1x42x32xf32, #tpu.memory_space<vmem>>, vector<1x24x32xf32>
    %32 = vector.shape_cast %31 : vector<1x24x32xf32> to vector<24x32xf32>
    %c5 = arith.constant 5 : index
    %c0_30 = arith.constant 0 : index
    %c0_31 = arith.constant 0 : index
    %33 = vector.load %arg2[%c5, %c0_30, %c0_31] : memref<9x32x64xf32, #tpu.memory_space<vmem>>, vector<1x32x64xf32>
    %34 = vector.shape_cast %33 : vector<1x32x64xf32> to vector<32x64xf32>
    %cst_32 = arith.constant dense<0.000000e+00> : vector<24x64xf32>
    %35 = tpu.matmul %32, %34, %cst_32 {dimension_numbers = #tpu.dot_dimension_numbers<[1], [0], [0], [1], [0, 0, 1, 1], [], []>} : vector<24x32xf32>, vector<32x64xf32>, vector<24x64xf32> -> vector<24x64xf32>
    %36 = arith.addf %30, %35 : vector<24x64xf32>
    %c0_33 = arith.constant 0 : index
    %c12 = arith.constant 12 : index
    %c0_34 = arith.constant 0 : index
    %37 = vector.load %arg1[%c0_33, %c12, %c0_34] : memref<1x42x32xf32, #tpu.memory_space<vmem>>, vector<1x24x32xf32>
    %38 = vector.shape_cast %37 : vector<1x24x32xf32> to vector<24x32xf32>
    %c6_35 = arith.constant 6 : index
    %c0_36 = arith.constant 0 : index
    %c0_37 = arith.constant 0 : index
    %39 = vector.load %arg2[%c6_35, %c0_36, %c0_37] : memref<9x32x64xf32, #tpu.memory_space<vmem>>, vector<1x32x64xf32>
    %40 = vector.shape_cast %39 : vector<1x32x64xf32> to vector<32x64xf32>
    %cst_38 = arith.constant dense<0.000000e+00> : vector<24x64xf32>
    %41 = tpu.matmul %38, %40, %cst_38 {dimension_numbers = #tpu.dot_dimension_numbers<[1], [0], [0], [1], [0, 0, 1, 1], [], []>} : vector<24x32xf32>, vector<32x64xf32>, vector<24x64xf32> -> vector<24x64xf32>
    %42 = arith.addf %36, %41 : vector<24x64xf32>
    %c0_39 = arith.constant 0 : index
    %c13 = arith.constant 13 : index
    %c0_40 = arith.constant 0 : index
    %43 = vector.load %arg1[%c0_39, %c13, %c0_40] : memref<1x42x32xf32, #tpu.memory_space<vmem>>, vector<1x24x32xf32>
    %44 = vector.shape_cast %43 : vector<1x24x32xf32> to vector<24x32xf32>
    %c7_41 = arith.constant 7 : index
    %c0_42 = arith.constant 0 : index
    %c0_43 = arith.constant 0 : index
    %45 = vector.load %arg2[%c7_41, %c0_42, %c0_43] : memref<9x32x64xf32, #tpu.memory_space<vmem>>, vector<1x32x64xf32>
    %46 = vector.shape_cast %45 : vector<1x32x64xf32> to vector<32x64xf32>
    %cst_44 = arith.constant dense<0.000000e+00> : vector<24x64xf32>
    %47 = tpu.matmul %44, %46, %cst_44 {dimension_numbers = #tpu.dot_dimension_numbers<[1], [0], [0], [1], [0, 0, 1, 1], [], []>} : vector<24x32xf32>, vector<32x64xf32>, vector<24x64xf32> -> vector<24x64xf32>
    %48 = arith.addf %42, %47 : vector<24x64xf32>
    %c0_45 = arith.constant 0 : index
    %c14 = arith.constant 14 : index
    %c0_46 = arith.constant 0 : index
    %49 = vector.load %arg1[%c0_45, %c14, %c0_46] : memref<1x42x32xf32, #tpu.memory_space<vmem>>, vector<1x24x32xf32>
    %50 = vector.shape_cast %49 : vector<1x24x32xf32> to vector<24x32xf32>
    %c8_47 = arith.constant 8 : index
    %c0_48 = arith.constant 0 : index
    %c0_49 = arith.constant 0 : index
    %51 = vector.load %arg2[%c8_47, %c0_48, %c0_49] : memref<9x32x64xf32, #tpu.memory_space<vmem>>, vector<1x32x64xf32>
    %52 = vector.shape_cast %51 : vector<1x32x64xf32> to vector<32x64xf32>
    %cst_50 = arith.constant dense<0.000000e+00> : vector<24x64xf32>
    %53 = tpu.matmul %50, %52, %cst_50 {dimension_numbers = #tpu.dot_dimension_numbers<[1], [0], [0], [1], [0, 0, 1, 1], [], []>} : vector<24x32xf32>, vector<32x64xf32>, vector<24x64xf32> -> vector<24x64xf32>
    %54 = arith.addf %48, %53 : vector<24x64xf32>
    %c0_51 = arith.constant 0 : index
    %c0_52 = arith.constant 0 : index
    %55 = vector.load %arg3[%c0_51, %c0_52] : memref<1x64xf32, #tpu.memory_space<vmem>>, vector<1x64xf32>
    %56 = vector.broadcast %55 : vector<1x64xf32> to vector<24x64xf32>
    %57 = arith.addf %54, %56 : vector<24x64xf32>
    %cst_53 = arith.constant 0.00999999977 : f32
    %58 = vector.broadcast %cst_53 : f32 to vector<24x64xf32>
    %59 = arith.mulf %58, %57 : vector<24x64xf32>
    %60 = arith.maximumf %57, %59 : vector<24x64xf32>
    %c0_54 = arith.constant 0 : index
    %c0_55 = arith.constant 0 : index
    %c0_56 = arith.constant 0 : index
    %61 = vector.load %arg7[%c0_54, %c0_55, %c0_56] : memref<1x24x64xf32, #tpu.memory_space<vmem>>, vector<1x24x64xf32>
    %62 = vector.shape_cast %61 : vector<1x24x64xf32> to vector<24x64xf32>
    %63 = vector.shape_cast %60 : vector<24x64xf32> to vector<1x24x64xf32>
    tpu.vector_store %arg7[%c0_54, %c0_55, %c0_56], %63 {strides = array<i32>} : memref<1x24x64xf32, #tpu.memory_space<vmem>>, vector<1x24x64xf32>,
    %c0_57 = arith.constant 0 : index
    %c0_58 = arith.constant 0 : index
    %64 = vector.load %arg4[%c0_57, %c0_58] : memref<1x24xf32, #tpu.memory_space<vmem>>, vector<1x24xf32>
    %cst_59 = arith.constant dense<0.000000e+00> : vector<1x64xf32>
    %65 = tpu.matmul %64, %60, %cst_59 {dimension_numbers = #tpu.dot_dimension_numbers<[1], [0], [0], [1], [0, 0, 1, 1], [], []>} : vector<1x24xf32>, vector<24x64xf32>, vector<1x64xf32> -> vector<1x64xf32>
    %c0_60 = arith.constant 0 : index
    %c0_61 = arith.constant 0 : index
    %66 = vector.load %arg5[%c0_60, %c0_61] : memref<64x10xf32, #tpu.memory_space<vmem>>, vector<64x10xf32>
    %cst_62 = arith.constant dense<0.000000e+00> : vector<1x10xf32>
    %67 = tpu.matmul %65, %66, %cst_62 {dimension_numbers = #tpu.dot_dimension_numbers<[1], [0], [0], [1], [0, 0, 1, 1], [], []>} : vector<1x64xf32>, vector<64x10xf32>, vector<1x10xf32> -> vector<1x10xf32>
    %c0_63 = arith.constant 0 : index
    %c0_64 = arith.constant 0 : index
    %68 = vector.load %arg6[%c0_63, %c0_64] : memref<1x10xf32, #tpu.memory_space<vmem>>, vector<1x10xf32>
    %69 = arith.addf %67, %68 : vector<1x10xf32>
    %c0_65 = arith.constant 0 : index
    %c0_66 = arith.constant 0 : index
    %c0_67 = arith.constant 0 : index
    %70 = vector.load %arg8[%c0_65, %c0_66, %c0_67] : memref<1x1x10xf32, #tpu.memory_space<vmem>>, vector<1x1x10xf32>
    %71 = vector.shape_cast %70 : vector<1x1x10xf32> to vector<1x10xf32>
    %72 = vector.shape_cast %69 : vector<1x10xf32> to vector<1x1x10xf32>
    tpu.vector_store %arg8[%c0_65, %c0_66, %c0_67], %72 {strides = array<i32>} : memref<1x1x10xf32, #tpu.memory_space<vmem>>, vector<1x1x10xf32>,
    return
  }
  func.func @transform_0(%arg0: i32) -> (i32, i32, i32) {
    %c0_i32 = arith.constant 0 : i32
    %c0_i32_0 = arith.constant 0 : i32
    %c0_i32_1 = arith.constant 0 : i32
    return %arg0, %c0_i32, %c0_i32_0 : i32, i32, i32
  }
  func.func @transform_1(%arg0: i32) -> (i32, i32, i32) {
    %c0_i32 = arith.constant 0 : i32
    %c0_i32_0 = arith.constant 0 : i32
    %c0_i32_1 = arith.constant 0 : i32
    %c0_i32_2 = arith.constant 0 : i32
    return %c0_i32, %c0_i32_0, %c0_i32_1 : i32, i32, i32
  }
  func.func @transform_2(%arg0: i32) -> (i32, i32) {
    %c0_i32 = arith.constant 0 : i32
    %c0_i32_0 = arith.constant 0 : i32
    %c0_i32_1 = arith.constant 0 : i32
    return %c0_i32, %c0_i32_0 : i32, i32
  }
  func.func @transform_3(%arg0: i32) -> (i32, i32) {
    %c0_i32 = arith.constant 0 : i32
    %c0_i32_0 = arith.constant 0 : i32
    %c0_i32_1 = arith.constant 0 : i32
    return %c0_i32, %c0_i32_0 : i32, i32
  }
  func.func @transform_4(%arg0: i32) -> (i32, i32) {
    %c0_i32 = arith.constant 0 : i32
    %c0_i32_0 = arith.constant 0 : i32
    %c0_i32_1 = arith.constant 0 : i32
    return %c0_i32, %c0_i32_0 : i32, i32
  }
  func.func @transform_5(%arg0: i32) -> (i32, i32) {
    %c0_i32 = arith.constant 0 : i32
    %c0_i32_0 = arith.constant 0 : i32
    %c0_i32_1 = arith.constant 0 : i32
    return %c0_i32, %c0_i32_0 : i32, i32
  }
  func.func @transform_6(%arg0: i32) -> (i32, i32, i32) {
    %c0_i32 = arith.constant 0 : i32
    %c0_i32_0 = arith.constant 0 : i32
    %c0_i32_1 = arith.constant 0 : i32
    return %arg0, %c0_i32, %c0_i32_0 : i32, i32, i32
  }
  func.func @transform_7(%arg0: i32) -> (i32, i32, i32) {
    %c0_i32 = arith.constant 0 : i32
    %c0_i32_0 = arith.constant 0 : i32
    %c0_i32_1 = arith.constant 0 : i32
    return %arg0, %c0_i32, %c0_i32_0 : i32, i32, i32
  }
}

</mosaic_0001>

<bundles_post_ra>
// kernel: sliding_projection_net_forward.3
= control target key start
LH: loop header
LB: loop body
LE: loop exit
PB: predicated region body
PF: predicated region fallthrough
CT: control target
= control target key end

     0   :  { %s3110_s12 = smov 0   ;;  %s5516_s0 = inlined_call_operand.vmem [shape: f32[2,342,1], index: 0, kind: input, shape index: {}]   ;;  %s5517_s1 = inlined_call_operand.vmem [shape: f32[9,1,16], index: 1, kind: input, shape index: {}]   ;;  %s5518_s2 = inlined_call_operand.vmem [shape: f32[1,16], index: 2, kind: input, shape index: {}]   ;;  %s5519_s3 = inlined_call_operand.vmem [shape: f32[2,288,16], index: 3, kind: output, shape index: {}]  }
   0x1 LB: > { %s3041_s13 = sadd.s32 4294967295, %s3087_s12   ;;  %p3045_p0 = scmp.ge.s32.totalorder %s3087_s12, 1  ;;  %s3087_s12 = sphi %s3110_s12, %s13_s12  }
   0x2   : > { %p137_p1 = scmp.lt.s32.totalorder %s3087_s12, 3 }
   0x4   : > { %p138_p2 = pnand %p3045_p0, %p137_p1 }
   0x6   : > { %141 = sbr.rel (%p138_p2) target bundleno = 799 (0x31f), region = 32 }
   0xb   : > { %p161_p3 = scmp.lt.s32.totalorder %s3041_s13, 1  ;;  %v3089_v0 = vmov 0   ;;  %vm2949_vm0 = vcmask 130048  }
   0xc   : > { %3080 = vset.pattern.permute.xlu1 %v3089_v0  ;;  %3079 = vset.pattern.permute.xlu0 %v3089_v0 }
   0xd   : > { %s5987_s13 = smov (!%p161_p3, %s3041_s13), 1 }
   0xe   : > { %s3068_s14 = smul.u32 344, %s5987_s13 }
   0xf   : > { %s3069_s11 = smul.u32 288, %s5987_s13 }
  0x10   : > { %s3124_s17 = scalar_lea.vmem %s5516_s0, %s3068_s14 }
  0x11   : > { %v173_v1 = vld [vmem:[%s3124_s17 + $0x10] sm:$0xff]  ;;  %v171_v2 = vld [vmem:[%s3124_s17] sm:$0xff]  ;;  %v174_v3 = vld [vmem:[%s3124_s17 + $0x18] sm:$0xff]  ;;  %s5343_s15 = scalar_lea.vmem %s5519_s3, %s3069_s11 }
  0x12   : > { %220 = vperm.xlu1 %3080, %v173_v1   ;;  %210 = vperm.xlu0 %3079, %v171_v2   ;;  %v172_v4 = vld [vmem:[%s3124_s17 + $0x8] sm:$0xff]  ;;  %v175_v6 = vld [vmem:[%s3124_s17 + $0x20] sm:$0xff]  ;;  %v178_v7 = vld [vmem:[%s3124_s17 + $0x38] sm:$0xff] }
  0x13   : > { %v176_v5 = vld [vmem:[%s3124_s17 + $0x28] sm:$0xff]  ;;  %v177_v8 = vld [vmem:[%s3124_s17 + $0x30] sm:$0xff]  ;;  %v179_v10 = vld [vmem:[%s3124_s17 + $0x40] sm:$0xff] }
  0x14   : > { %v180_v9 = vld [vmem:[%s3124_s17 + $0x48] sm:$0xff]  ;;  %v182_v11 = vld [vmem:[%s3124_s17 + $0x58] sm:$0xff]  ;;  %v181_v12 = vld [vmem:[%s3124_s17 + $0x50] sm:$0xff] }
  0x15   : > { %v184_v13 = vld [vmem:[%s3124_s17 + $0x68] sm:$0xff]  ;;  %v183_v14 = vld [vmem:[%s3124_s17 + $0x60] sm:$0xff]  ;;  %v186_v15 = vld [vmem:[%s3124_s17 + $0x78] sm:$0xff] }
  0x16   : > { %225 = vperm.xlu1 %3080, %v174_v3   ;;  %215 = vperm.xlu0 %3079, %v172_v4   ;;  %v185_v16 = vld [vmem:[%s3124_s17 + $0x70] sm:$0xff]  ;;  %v188_v17 = vld [vmem:[%s3124_s17 + $0x88] sm:$0xff]  ;;  %v187_v18 = vld [vmem:[%s3124_s17 + $0x80] sm:$0xff] }
  0x17   : > { %v190_v19 = vld [vmem:[%s3124_s17 + $0x98] sm:$0xff]  ;;  %v189_v20 = vld [vmem:[%s3124_s17 + $0x90] sm:$0xff]  ;;  %v192_v21 = vld [vmem:[%s3124_s17 + $0xa8] sm:$0xff] }
  0x18   : > { %v191_v22 = vld [vmem:[%s3124_s17 + $0xa0] sm:$0xff]  ;;  %v194_v23 = vld [vmem:[%s3124_s17 + $0xb8] sm:$0xff]  ;;  %v193_v24 = vld [vmem:[%s3124_s17 + $0xb0] sm:$0xff] }
  0x19   : > { %v196_v25 = vld [vmem:[%s3124_s17 + $0xc8] sm:$0xff]  ;;  %v195_v26 = vld [vmem:[%s3124_s17 + $0xc0] sm:$0xff]  ;;  %v198_v27 = vld [vmem:[%s3124_s17 + $0xd8] sm:$0xff] }
  0x1a   : > { %235 = vperm.xlu1 %3080, %v176_v5   ;;  %230 = vperm.xlu0 %3079, %v175_v6   ;;  %v197_v28 = vld [vmem:[%s3124_s17 + $0xd0] sm:$0xff]  ;;  %v200_v29 = vld [vmem:[%s3124_s17 + $0xe8] sm:$0xff]  ;;  %v199_v30 = vld [vmem:[%s3124_s17 + $0xe0] sm:$0xff] }
  0x1b   : > { %v202_v31 = vld [vmem:[%s3124_s17 + $0xf8] sm:$0xff]  ;;  %v201_v32 = vld [vmem:[%s3124_s17 + $0xf0] sm:$0xff]  ;;  %v204_v33 = vld [vmem:[%s3124_s17 + $0x108] sm:$0xff] }
  0x1c   : > { %v203_v34 = vld [vmem:[%s3124_s17 + $0x100] sm:$0xff]  ;;  %v206_v35 = vld [vmem:[%s3124_s17 + $0x118] sm:$0xff]  ;;  %v205_v36 = vld [vmem:[%s3124_s17 + $0x110] sm:$0xff] }
  0x1d   : > { %v467_v37 = vld [vmem:[%s3124_s17 + $0x9] sm:$0xff]  ;;  %v466_v38 = vld [vmem:[%s3124_s17 + $0x1] sm:$0xff]  ;;  %v469_v39 = vld [vmem:[%s3124_s17 + $0x19] sm:$0xff] }
  0x1e   : > { %245 = vperm.xlu1 %3080, %v178_v7   ;;  %240 = vperm.xlu0 %3079, %v177_v8   ;;  %v468_v40 = vld [vmem:[%s3124_s17 + $0x11] sm:$0xff]  ;;  %v471_v41 = vld [vmem:[%s3124_s17 + $0x29] sm:$0xff]  ;;  %v470_v42 = vld [vmem:[%s3124_s17 + $0x21] sm:$0xff] }
  0x1f   : > { %v473_v43 = vld [vmem:[%s3124_s17 + $0x39] sm:$0xff]  ;;  %v472_v44 = vld [vmem:[%s3124_s17 + $0x31] sm:$0xff]  ;;  %v475_v45 = vld [vmem:[%s3124_s17 + $0x49] sm:$0xff] }
  0x20   : > { %v474_v46 = vld [vmem:[%s3124_s17 + $0x41] sm:$0xff]  ;;  %v477_v47 = vld [vmem:[%s3124_s17 + $0x59] sm:$0xff]  ;;  %v476_v48 = vld [vmem:[%s3124_s17 + $0x51] sm:$0xff] }
  0x21   : > { %v479_v49 = vld [vmem:[%s3124_s17 + $0x69] sm:$0xff]  ;;  %v478_v50 = vld [vmem:[%s3124_s17 + $0x61] sm:$0xff]  ;;  %v481_v51 = vld [vmem:[%s3124_s17 + $0x79] sm:$0xff] }
  0x22   : > { %255 = vperm.xlu1 %3080, %v180_v9   ;;  %250 = vperm.xlu0 %3079, %v179_v10   ;;  %v480_v52 = vld [vmem:[%s3124_s17 + $0x71] sm:$0xff]  ;;  %v483_v53 = vld [vmem:[%s3124_s17 + $0x89] sm:$0xff]  ;;  %v482_v54 = vld [vmem:[%s3124_s17 + $0x81] sm:$0xff] }
  0x23   : > { %v485_v55 = vld [vmem:[%s3124_s17 + $0x99] sm:$0xff]  ;;  %v484_v56 = vld [vmem:[%s3124_s17 + $0x91] sm:$0xff]  ;;  %v487_v57 = vld [vmem:[%s3124_s17 + $0xa9] sm:$0xff] }
  0x24   : > { %v486_v58 = vld [vmem:[%s3124_s17 + $0xa1] sm:$0xff]  ;;  %v489_v59 = vld [vmem:[%s3124_s17 + $0xb9] sm:$0xff]  ;;  %v488_v60 = vld [vmem:[%s3124_s17 + $0xb1] sm:$0xff] }
  0x25   : > { %v491_v61 = vld [vmem:[%s3124_s17 + $0xc9] sm:$0xff]  ;;  %v490_v62 = vld [vmem:[%s3124_s17 + $0xc1] sm:$0xff]  ;;  %v493_v63 = vld [vmem:[%s3124_s17 + $0xd9] sm:$0xff] }
  0x26   : > { %265 = vperm.xlu1 %3080, %v182_v11   ;;  %260 = vperm.xlu0 %3079, %v181_v12   ;;  %v492_v0 = vld [vmem:[%s3124_s17 + $0xd1] sm:$0xff]  ;;  %v495_v3 = vld [vmem:[%s3124_s17 + $0xe9] sm:$0xff]  ;;  %v494_v4 = vld [vmem:[%s3124_s17 + $0xe1] sm:$0xff] }
  0x27   : > { %v497_v7 = vld [vmem:[%s3124_s17 + $0xf9] sm:$0xff]  ;;  %v496_v8 = vld [vmem:[%s3124_s17 + $0xf1] sm:$0xff]  ;;  %v499_v11 = vld [vmem:[%s3124_s17 + $0x109] sm:$0xff] }
  0x28   : > { %v498_v12 = vld [vmem:[%s3124_s17 + $0x101] sm:$0xff] }
  0x2a   : > { %275 = vperm.xlu1 %3080, %v184_v13   ;;  %270 = vperm.xlu0 %3079, %v183_v14  }
  0x2e   : > { %285 = vperm.xlu1 %3080, %v186_v15   ;;  %280 = vperm.xlu0 %3079, %v185_v16   ;;  %v501_v15 = vld [vmem:[%s3124_s17 + $0x119] sm:$0xff]  ;;  %v500_v16 = vld [vmem:[%s3124_s17 + $0x111] sm:$0xff] }
  0x32   : > { %295 = vperm.xlu1 %3080, %v188_v17   ;;  %290 = vperm.xlu0 %3079, %v187_v18  }
  0x36   : > { %305 = vperm.xlu1 %3080, %v190_v19   ;;  %300 = vperm.xlu0 %3079, %v189_v20   ;;  %v763_v19 = vld [vmem:[%s3124_s17 + $0xa] sm:$0xff]  ;;  %v762_v20 = vld [vmem:[%s3124_s17 + $0x2] sm:$0xff] }
  0x3a   : > { %315 = vperm.xlu1 %3080, %v192_v21   ;;  %310 = vperm.xlu0 %3079, %v191_v22  }
  0x3e   : > { %325 = vperm.xlu1 %3080, %v194_v23   ;;  %320 = vperm.xlu0 %3079, %v193_v24   ;;  %v3225_v23 = vld [vmem:[%s3124_s17 + $0x1a] sm:$0xff]  ;;  %v3228_v24 = vld [vmem:[%s3124_s17 + $0x12] sm:$0xff] }
  0x42   : > { %335 = vperm.xlu1 %3080, %v196_v25   ;;  %330 = vperm.xlu0 %3079, %v195_v26  }
  0x46   : > { %345 = vperm.xlu1 %3080, %v198_v27   ;;  %340 = vperm.xlu0 %3079, %v197_v28   ;;  %v3237_v27 = vld [vmem:[%s3124_s17 + $0x2a] sm:$0xff]  ;;  %v3240_v28 = vld [vmem:[%s3124_s17 + $0x22] sm:$0xff] }
  0x4a   : > { %355 = vperm.xlu1 %3080, %v200_v29   ;;  %350 = vperm.xlu0 %3079, %v199_v30  }
  0x4e   : > { %365 = vperm.xlu1 %3080, %v202_v31   ;;  %360 = vperm.xlu0 %3079, %v201_v32   ;;  %v3249_v31 = vld [vmem:[%s3124_s17 + $0x3a] sm:$0xff]  ;;  %v3252_v32 = vld [vmem:[%s3124_s17 + $0x32] sm:$0xff] }
  0x52   : > { %375 = vperm.xlu1 %3080, %v204_v33   ;;  %370 = vperm.xlu0 %3079, %v203_v34  }
  0x56   : > { %385 = vperm.xlu1 %3080, %v206_v35   ;;  %380 = vperm.xlu0 %3079, %v205_v36   ;;  %v3261_v35 = vld [vmem:[%s3124_s17 + $0x4a] sm:$0xff]  ;;  %v3264_v36 = vld [vmem:[%s3124_s17 + $0x42] sm:$0xff] }
  0x5a   : > { %511 = vperm.xlu1 %3080, %v467_v37   ;;  %506 = vperm.xlu0 %3079, %v466_v38  }
  0x5e   : > { %521 = vperm.xlu1 %3080, %v469_v39   ;;  %516 = vperm.xlu0 %3079, %v468_v40   ;;  %v3273_v39 = vld [vmem:[%s3124_s17 + $0x5a] sm:$0xff]  ;;  %v3276_v40 = vld [vmem:[%s3124_s17 + $0x52] sm:$0xff] }
  0x62   : > { %531 = vperm.xlu1 %3080, %v471_v41   ;;  %526 = vperm.xlu0 %3079, %v470_v42  }
  0x66   : > { %541 = vperm.xlu1 %3080, %v473_v43   ;;  %536 = vperm.xlu0 %3079, %v472_v44   ;;  %v3285_v43 = vld [vmem:[%s3124_s17 + $0x6a] sm:$0xff]  ;;  %v3288_v44 = vld [vmem:[%s3124_s17 + $0x62] sm:$0xff] }
  0x6a   : > { %551 = vperm.xlu1 %3080, %v475_v45   ;;  %546 = vperm.xlu0 %3079, %v474_v46  }
  0x6e   : > { %561 = vperm.xlu1 %3080, %v477_v47   ;;  %556 = vperm.xlu0 %3079, %v476_v48   ;;  %v3297_v47 = vld [vmem:[%s3124_s17 + $0x7a] sm:$0xff]  ;;  %v3300_v48 = vld [vmem:[%s3124_s17 + $0x72] sm:$0xff] }
  0x72   : > { %571 = vperm.xlu1 %3080, %v479_v49   ;;  %566 = vperm.xlu0 %3079, %v478_v50  }
  0x76   : > { %581 = vperm.xlu1 %3080, %v481_v51   ;;  %576 = vperm.xlu0 %3079, %v480_v52   ;;  %v3309_v51 = vld [vmem:[%s3124_s17 + $0x8a] sm:$0xff]  ;;  %v3312_v52 = vld [vmem:[%s3124_s17 + $0x82] sm:$0xff] }
  0x7a   : > { %591 = vperm.xlu1 %3080, %v483_v53   ;;  %586 = vperm.xlu0 %3079, %v482_v54  }
  0x7e   : > { %601 = vperm.xlu1 %3080, %v485_v55   ;;  %596 = vperm.xlu0 %3079, %v484_v56   ;;  %v3321_v55 = vld [vmem:[%s3124_s17 + $0x9a] sm:$0xff]  ;;  %v3324_v56 = vld [vmem:[%s3124_s17 + $0x92] sm:$0xff] }
  0x82   : > { %611 = vperm.xlu1 %3080, %v487_v57   ;;  %606 = vperm.xlu0 %3079, %v486_v58  }
  0x86   : > { %621 = vperm.xlu1 %3080, %v489_v59   ;;  %616 = vperm.xlu0 %3079, %v488_v60   ;;  %v3333_v59 = vld [vmem:[%s3124_s17 + $0xaa] sm:$0xff]  ;;  %v3336_v60 = vld [vmem:[%s3124_s17 + $0xa2] sm:$0xff] }
  0x8a   : > { %631 = vperm.xlu1 %3080, %v491_v61   ;;  %626 = vperm.xlu0 %3079, %v490_v62  }
  0x8d   : > { %v3190_v1 = vpop.permute.xlu1 %220  ;;  %v3192_v2 = vpop.permute.xlu0 %210 }
  0x8e   : > { %641 = vperm.xlu1 %3080, %v493_v63   ;;  %636 = vperm.xlu0 %3079, %v492_v0   ;;  %v3345_v63 = vld [vmem:[%s3124_s17 + $0xba] sm:$0xff]  ;;  %v3348_v0 = vld [vmem:[%s3124_s17 + $0xb2] sm:$0xff] }
  0x91   : > { %v3196_v5 = vpop.permute.xlu1 %225  ;;  %v3198_v6 = vpop.permute.xlu0 %215 }
  0x92   : > { %651 = vperm.xlu1 %3080, %v495_v3   ;;  %646 = vperm.xlu0 %3079, %v494_v4  }
  0x95   : > { %v3202_v9 = vpop.permute.xlu1 %235  ;;  %v3204_v10 = vpop.permute.xlu0 %230 }
  0x96   : > { %661 = vperm.xlu1 %3080, %v497_v7   ;;  %656 = vperm.xlu0 %3079, %v496_v8   ;;  %v3357_v7 = vld [vmem:[%s3124_s17 + $0xca] sm:$0xff]  ;;  %v3360_v8 = vld [vmem:[%s3124_s17 + $0xc2] sm:$0xff] }
  0x99   : > { %v3208_v13 = vpop.permute.xlu1 %245  ;;  %v3210_v14 = vpop.permute.xlu0 %240 }
  0x9a   : > { %671 = vperm.xlu1 %3080, %v499_v11   ;;  %666 = vperm.xlu0 %3079, %v498_v12  }
  0x9d   : > { %v3214_v17 = vpop.permute.xlu1 %255  ;;  %v3216_v18 = vpop.permute.xlu0 %250 }
  0x9e   : > { %681 = vperm.xlu1 %3080, %v501_v15   ;;  %676 = vperm.xlu0 %3079, %v500_v16   ;;  %v3369_v15 = vld [vmem:[%s3124_s17 + $0xda] sm:$0xff]  ;;  %v3372_v16 = vld [vmem:[%s3124_s17 + $0xd2] sm:$0xff] }
  0xa1   : > { %v3220_v21 = vpop.permute.xlu1 %265  ;;  %v3222_v22 = vpop.permute.xlu0 %260 }
  0xa2   : > { %807 = vperm.xlu1 %3080, %v763_v19   ;;  %802 = vperm.xlu0 %3079, %v762_v20  }
  0xa5   : > { %v3230_v25 = vpop.permute.xlu1 %275  ;;  %v3232_v26 = vpop.permute.xlu0 %270 }
  0xa6   : > { %817 = vperm.xlu1 %3080, %v3225_v23   ;;  %812 = vperm.xlu0 %3079, %v3228_v24  }
  0xa9   : > { %v3242_v29 = vpop.permute.xlu1 %285  ;;  %v3244_v30 = vpop.permute.xlu0 %280 }
  0xaa   : > { %827 = vperm.xlu1 %3080, %v3237_v27   ;;  %822 = vperm.xlu0 %3079, %v3240_v28  }
  0xad   : > { %v3254_v33 = vpop.permute.xlu1 %295  ;;  %v3256_v34 = vpop.permute.xlu0 %290 }
  0xae   : > { %837 = vperm.xlu1 %3080, %v3249_v31   ;;  %832 = vperm.xlu0 %3079, %v3252_v32  }
  0xb1   : > { %v3266_v37 = vpop.permute.xlu1 %305  ;;  %v3268_v38 = vpop.permute.xlu0 %300 }
  0xb2   : > { %847 = vperm.xlu1 %3080, %v3261_v35   ;;  %842 = vperm.xlu0 %3079, %v3264_v36  }
  0xb5   : > { %v3278_v41 = vpop.permute.xlu1 %315  ;;  %v3280_v42 = vpop.permute.xlu0 %310 }
  0xb6   : > { %857 = vperm.xlu1 %3080, %v3273_v39   ;;  %852 = vperm.xlu0 %3079, %v3276_v40  }
  0xb9   : > { %v3290_v45 = vpop.permute.xlu1 %325  ;;  %v3292_v46 = vpop.permute.xlu0 %320 }
  0xba   : > { %867 = vperm.xlu1 %3080, %v3285_v43   ;;  %862 = vperm.xlu0 %3079, %v3288_v44  }
  0xbd   : > { %v3302_v49 = vpop.permute.xlu1 %335  ;;  %v3304_v50 = vpop.permute.xlu0 %330 }
  0xbe   : > { %5520 = vst [vmem:[#allocation2_spill] sm:$0xff] %v3302_v49  ;;  %5521 = vst [vmem:[#allocation3_spill] sm:$0xff] %v3304_v50  ;;  %877 = vperm.xlu1 %3080, %v3297_v47   ;;  %872 = vperm.xlu0 %3079, %v3300_v48  }
  0xc1   : > { %v3314_v53 = vpop.permute.xlu1 %345  ;;  %v3316_v54 = vpop.permute.xlu0 %340 }
  0xc2   : > { %5522 = vst [vmem:[#allocation4_spill] sm:$0xff] %v3314_v53  ;;  %5523 = vst [vmem:[#allocation5_spill] sm:$0xff] %v3316_v54  ;;  %887 = vperm.xlu1 %3080, %v3309_v51   ;;  %882 = vperm.xlu0 %3079, %v3312_v52   ;;  %v3417_v54 = vld [vmem:[%s3124_s17 + $0x11a] sm:$0xff] }
  0xc5   : > { %v3326_v57 = vpop.permute.xlu1 %355  ;;  %v3328_v58 = vpop.permute.xlu0 %350 }
  0xc6   : > { %5524 = vst [vmem:[#allocation6_spill] sm:$0xff] %v3326_v57  ;;  %5525 = vst [vmem:[#allocation7_spill] sm:$0xff] %v3328_v58  ;;  %897 = vperm.xlu1 %3080, %v3321_v55   ;;  %892 = vperm.xlu0 %3079, %v3324_v56  }
  0xc9   : > { %v3338_v61 = vpop.permute.xlu1 %365  ;;  %v3340_v62 = vpop.permute.xlu0 %360 }
  0xca   : > { %5526 = vst [vmem:[#allocation8_spill] sm:$0xff] %v3338_v61  ;;  %5527 = vst [vmem:[#allocation9_spill] sm:$0xff] %v3340_v62  ;;  %907 = vperm.xlu1 %3080, %v3333_v59   ;;  %902 = vperm.xlu0 %3079, %v3336_v60  }
  0xcd   : > { %v3350_v3 = vpop.permute.xlu1 %375  ;;  %v3352_v4 = vpop.permute.xlu0 %370 }
  0xce   : > { %5528 = vst [vmem:[#allocation10_spill] sm:$0xff] %v3350_v3  ;;  %5529 = vst [vmem:[#allocation11_spill] sm:$0xff] %v3352_v4  ;;  %917 = vperm.xlu1 %3080, %v3345_v63   ;;  %912 = vperm.xlu0 %3079, %v3348_v0  }
  0xd1   : > { %v3362_v11 = vpop.permute.xlu1 %385  ;;  %v3364_v12 = vpop.permute.xlu0 %380 }
  0xd2   : > { %5530 = vst [vmem:[#allocation12_spill] sm:$0xff] %v3362_v11  ;;  %5531 = vst [vmem:[#allocation13_spill] sm:$0xff] %v3364_v12  ;;  %927 = vperm.xlu1 %3080, %v3357_v7   ;;  %922 = vperm.xlu0 %3079, %v3360_v8   ;;  %v3381_v12 = vld [vmem:[%s3124_s17 + $0xea] sm:$0xff]  ;;  %v3384_v11 = vld [vmem:[%s3124_s17 + $0xe2] sm:$0xff] }
  0xd5   : > { %v3374_v19 = vpop.permute.xlu1 %511  ;;  %v3376_v20 = vpop.permute.xlu0 %506 }
  0xd6   : > { %5532 = vst [vmem:[#allocation14_spill] sm:$0xff] %v3374_v19  ;;  %5533 = vst [vmem:[#allocation15_spill] sm:$0xff] %v3376_v20  ;;  %937 = vperm.xlu1 %3080, %v3369_v15   ;;  %932 = vperm.xlu0 %3079, %v3372_v16   ;;  %v3393_v20 = vld [vmem:[%s3124_s17 + $0xfa] sm:$0xff]  ;;  %v3396_v19 = vld [vmem:[%s3124_s17 + $0xf2] sm:$0xff] }
  0xd9   : > { %v3386_v4 = vpop.permute.xlu1 %521  ;;  %v3388_v3 = vpop.permute.xlu0 %516 }
  0xda   : > { %5534 = vst [vmem:[#allocation16_spill] sm:$0xff] %v3386_v4  ;;  %5535 = vst [vmem:[#allocation17_spill] sm:$0xff] %v3388_v3  ;;  %947 = vperm.xlu1 %3080, %v3381_v12   ;;  %942 = vperm.xlu0 %3079, %v3384_v11   ;;  %v3405_v4 = vld [vmem:[%s3124_s17 + $0x10a] sm:$0xff]  ;;  %v3408_v3 = vld [vmem:[%s3124_s17 + $0x102] sm:$0xff] }
  0xdd   : > { %v3398_v62 = vpop.permute.xlu1 %531  ;;  %v3400_v61 = vpop.permute.xlu0 %526 }
  0xde   : > { %5536 = vst [vmem:[#allocation18_spill] sm:$0xff] %v3398_v62  ;;  %5537 = vst [vmem:[#allocation19_spill] sm:$0xff] %v3400_v61  ;;  %957 = vperm.xlu1 %3080, %v3393_v20   ;;  %952 = vperm.xlu0 %3079, %v3396_v19   ;;  %v3420_v62 = vld [vmem:[%s3124_s17 + $0x112] sm:$0xff] }
  0xe1   : > { %v3410_v58 = vpop.permute.xlu1 %541  ;;  %v3412_v57 = vpop.permute.xlu0 %536 }
  0xe2   : > { %5538 = vst [vmem:[#allocation20_spill] sm:$0xff] %v3410_v58  ;;  %5539 = vst [vmem:[#allocation21_spill] sm:$0xff] %v3412_v57  ;;  %967 = vperm.xlu1 %3080, %v3405_v4   ;;  %962 = vperm.xlu0 %3079, %v3408_v3  }
  0xe5   : > { %v3422_v61 = vpop.permute.xlu1 %551  ;;  %v3424_v53 = vpop.permute.xlu0 %546 }
  0xe6   : > { %5540 = vst [vmem:[#allocation22_spill] sm:$0xff] %v3422_v61  ;;  %5541 = vst [vmem:[#allocation23_spill] sm:$0xff] %v3424_v53  ;;  %977 = vperm.xlu1 %3080, %v3417_v54   ;;  %972 = vperm.xlu0 %3079, %v3420_v62  }
  0xe9   : > { %v3428_v50 = vpop.permute.xlu1 %561  ;;  %v3430_v58 = vpop.permute.xlu0 %556 }
  0xea   : > { %5542 = vst [vmem:[#allocation24_spill] sm:$0xff] %v3428_v50  ;;  %5543 = vst [vmem:[#allocation25_spill] sm:$0xff] %v3430_v58  ;;  %1103 = vperm.xlu1 %3080, %v3225_v23   ;;  %1098 = vperm.xlu0 %3079, %v3228_v24  }
  0xed   : > { %v3434_v57 = vpop.permute.xlu1 %571  ;;  %v3436_v49 = vpop.permute.xlu0 %566 }
  0xee   : > { %5544 = vst [vmem:[#allocation26_spill] sm:$0xff] %v3434_v57  ;;  %5545 = vst [vmem:[#allocation27_spill] sm:$0xff] %v3436_v49  ;;  %1113 = vperm.xlu1 %3080, %v3237_v27   ;;  %1108 = vperm.xlu0 %3079, %v3240_v28  }
  0xf1   : > { %v3440_v53 = vpop.permute.xlu1 %581  ;;  %v3442_v61 = vpop.permute.xlu0 %576 }
  0xf2   : > { %5546 = vst [vmem:[#allocation28_spill] sm:$0xff] %v3440_v53  ;;  %5547 = vst [vmem:[#allocation29_spill] sm:$0xff] %v3442_v61  ;;  %1123 = vperm.xlu1 %3080, %v3249_v31   ;;  %1118 = vperm.xlu0 %3079, %v3252_v32   ;;  %v3843_v53 = vld [vmem:[%s3124_s17 + $0x12c] sm:$0xff] }
  0xf5   : > { %v3446_v58 = vpop.permute.xlu1 %591  ;;  %v3448_v23 = vpop.permute.xlu0 %586 }
  0xf6   : > { %5548 = vst [vmem:[#allocation30_spill] sm:$0xff] %v3446_v58  ;;  %5549 = vst [vmem:[#allocation31_spill] sm:$0xff] %v3448_v23  ;;  %1133 = vperm.xlu1 %3080, %v3261_v35   ;;  %1128 = vperm.xlu0 %3079, %v3264_v36  }
  0xf9   : > { %v3452_v24 = vpop.permute.xlu1 %601  ;;  %v3454_v27 = vpop.permute.xlu0 %596 }
  0xfa   : > { %5550 = vst [vmem:[#allocation32_spill] sm:$0xff] %v3452_v24  ;;  %5551 = vst [vmem:[#allocation33_spill] sm:$0xff] %v3454_v27  ;;  %1143 = vperm.xlu1 %3080, %v3273_v39   ;;  %1138 = vperm.xlu0 %3079, %v3276_v40  }
  0xfd   : > { %v3458_v28 = vpop.permute.xlu1 %611  ;;  %v3460_v31 = vpop.permute.xlu0 %606 }
  0xfe   : > { %5552 = vst [vmem:[#allocation34_spill] sm:$0xff] %v3458_v28  ;;  %5553 = vst [vmem:[#allocation35_spill] sm:$0xff] %v3460_v31  ;;  %1153 = vperm.xlu1 %3080, %v3285_v43   ;;  %1148 = vperm.xlu0 %3079, %v3288_v44  }
 0x101   : > { %v3464_v32 = vpop.permute.xlu1 %621  ;;  %v3466_v35 = vpop.permute.xlu0 %616 }
 0x102   : > { %5554 = vst [vmem:[#allocation36_spill] sm:$0xff] %v3464_v32  ;;  %5555 = vst [vmem:[#allocation37_spill] sm:$0xff] %v3466_v35  ;;  %1163 = vperm.xlu1 %3080, %v3297_v47   ;;  %1158 = vperm.xlu0 %3079, %v3300_v48  }
 0x105   : > { %v3470_v36 = vpop.permute.xlu1 %631  ;;  %v3472_v39 = vpop.permute.xlu0 %626 }
 0x106   : > { %5556 = vst [vmem:[#allocation38_spill] sm:$0xff] %v3470_v36  ;;  %5557 = vst [vmem:[#allocation39_spill] sm:$0xff] %v3472_v39  ;;  %1173 = vperm.xlu1 %3080, %v3309_v51   ;;  %1168 = vperm.xlu0 %3079, %v3312_v52  }
 0x109   : > { %v3476_v40 = vpop.permute.xlu1 %641  ;;  %v3478_v43 = vpop.permute.xlu0 %636 }
 0x10a   : > { %5558 = vst [vmem:[#allocation40_spill] sm:$0xff] %v3476_v40  ;;  %5559 = vst [vmem:[#allocation41_spill] sm:$0xff] %v3478_v43  ;;  %1183 = vperm.xlu1 %3080, %v3321_v55   ;;  %1178 = vperm.xlu0 %3079, %v3324_v56  }
 0x10d   : > { %v3482_v44 = vpop.permute.xlu1 %651  ;;  %v3484_v47 = vpop.permute.xlu0 %646 }
 0x10e   : > { %5560 = vst [vmem:[#allocation42_spill] sm:$0xff] %v3482_v44  ;;  %5561 = vst [vmem:[#allocation43_spill] sm:$0xff] %v3484_v47  ;;  %1193 = vperm.xlu1 %3080, %v3333_v59   ;;  %1188 = vperm.xlu0 %3079, %v3336_v60  }
 0x111   : > { %v3488_v48 = vpop.permute.xlu1 %661  ;;  %v3490_v51 = vpop.permute.xlu0 %656 }
 0x112   : > { %5562 = vst [vmem:[#allocation44_spill] sm:$0xff] %v3488_v48  ;;  %5563 = vst [vmem:[#allocation45_spill] sm:$0xff] %v3490_v51  ;;  %1203 = vperm.xlu1 %3080, %v3345_v63   ;;  %1198 = vperm.xlu0 %3079, %v3348_v0  }
 0x115   : > { %v3494_v52 = vpop.permute.xlu1 %671  ;;  %v3496_v55 = vpop.permute.xlu0 %666 }
 0x116   : > { %5564 = vst [vmem:[#allocation46_spill] sm:$0xff] %v3494_v52  ;;  %5565 = vst [vmem:[#allocation47_spill] sm:$0xff] %v3496_v55  ;;  %1213 = vperm.xlu1 %3080, %v3357_v7   ;;  %1208 = vperm.xlu0 %3079, %v3360_v8  }
 0x119   : > { %v3500_v56 = vpop.permute.xlu1 %681  ;;  %v3502_v59 = vpop.permute.xlu0 %676 }
 0x11a   : > { %5566 = vst [vmem:[#allocation48_spill] sm:$0xff] %v3500_v56  ;;  %5567 = vst [vmem:[#allocation49_spill] sm:$0xff] %v3502_v59  ;;  %1223 = vperm.xlu1 %3080, %v3369_v15   ;;  %1218 = vperm.xlu0 %3079, %v3372_v16   ;;  %v1093_v16 = vld [vmem:[%s3124_s17 + $0x12a] sm:$0xff] }
 0x11d   : > { %v3506_v60 = vpop.permute.xlu1 %807  ;;  %v3508_v63 = vpop.permute.xlu0 %802 }
 0x11e   : > { %5568 = vst [vmem:[#allocation50_spill] sm:$0xff] %v3506_v60  ;;  %5569 = vst [vmem:[#allocation51_spill] sm:$0xff] %v3508_v63  ;;  %1233 = vperm.xlu1 %3080, %v3381_v12   ;;  %1228 = vperm.xlu0 %3079, %v3384_v11  }
 0x121   : > { %v3512_v0 = vpop.permute.xlu1 %817  ;;  %v3514_v7 = vpop.permute.xlu0 %812 }
 0x122   : > { %5570 = vst [vmem:[#allocation52_spill] sm:$0xff] %v3512_v0  ;;  %5571 = vst [vmem:[#allocation53_spill] sm:$0xff] %v3514_v7  ;;  %1243 = vperm.xlu1 %3080, %v3393_v20   ;;  %1238 = vperm.xlu0 %3079, %v3396_v19   ;;  %v1092_v19 = vld [vmem:[%s3124_s17 + $0x122] sm:$0xff] }
 0x125   : > { %v3518_v8 = vpop.permute.xlu1 %827  ;;  %v3520_v15 = vpop.permute.xlu0 %822 }
 0x126   : > { %5572 = vst [vmem:[#allocation54_spill] sm:$0xff] %v3518_v8  ;;  %5573 = vst [vmem:[#allocation55_spill] sm:$0xff] %v3520_v15  ;;  %1253 = vperm.xlu1 %3080, %v3405_v4   ;;  %1248 = vperm.xlu0 %3079, %v3408_v3   ;;  %v1355_v3 = vld [vmem:[%s3124_s17 + $0x1b] sm:$0xff]  ;;  %v1354_v4 = vld [vmem:[%s3124_s17 + $0x13] sm:$0xff] }
 0x129   : > { %v3524_v12 = vpop.permute.xlu1 %837  ;;  %v3526_v11 = vpop.permute.xlu0 %832 }
 0x12a   : > { %5574 = vst [vmem:[#allocation56_spill] sm:$0xff] %v3524_v12  ;;  %5575 = vst [vmem:[#allocation57_spill] sm:$0xff] %v3526_v11  ;;  %1263 = vperm.xlu1 %3080, %v3417_v54   ;;  %1258 = vperm.xlu0 %3079, %v3420_v62   ;;  %v1357_v54 = vld [vmem:[%s3124_s17 + $0x2b] sm:$0xff]  ;;  %v1356_v62 = vld [vmem:[%s3124_s17 + $0x23] sm:$0xff] }
 0x12d   : > { %v3532_v20 = vpop.permute.xlu1 %847  ;;  %v3534_v15 = vpop.permute.xlu0 %842 }
 0x12e   : > { %5576 = vst [vmem:[#allocation58_spill] sm:$0xff] %v3532_v20  ;;  %5577 = vst [vmem:[#allocation59_spill] sm:$0xff] %v3534_v15  ;;  %1273 = vperm.xlu1 %3080, %v1093_v16   ;;  %1268 = vperm.xlu0 %3079, %v1092_v19   ;;  %v1359_v16 = vld [vmem:[%s3124_s17 + $0x3b] sm:$0xff]  ;;  %v1358_v19 = vld [vmem:[%s3124_s17 + $0x33] sm:$0xff] }
 0x131   : > { %v3538_v12 = vpop.permute.xlu1 %857  ;;  %v3540_v11 = vpop.permute.xlu0 %852 }
 0x132   : > { %5578 = vst [vmem:[#allocation60_spill] sm:$0xff] %v3538_v12  ;;  %5579 = vst [vmem:[#allocation61_spill] sm:$0xff] %v3540_v11  ;;  %1399 = vperm.xlu1 %3080, %v1355_v3   ;;  %1394 = vperm.xlu0 %3079, %v1354_v4   ;;  %v1361_v3 = vld [vmem:[%s3124_s17 + $0x4b] sm:$0xff]  ;;  %v1360_v4 = vld [vmem:[%s3124_s17 + $0x43] sm:$0xff] }
 0x135   : > { %v3544_v8 = vpop.permute.xlu1 %867  ;;  %v3546_v20 = vpop.permute.xlu0 %862 }
 0x136   : > { %5580 = vst [vmem:[#allocation62_spill] sm:$0xff] %v3544_v8  ;;  %5581 = vst [vmem:[#allocation63_spill] sm:$0xff] %v3546_v20  ;;  %1409 = vperm.xlu1 %3080, %v1357_v54   ;;  %1404 = vperm.xlu0 %3079, %v1356_v62   ;;  %v1363_v54 = vld [vmem:[%s3124_s17 + $0x5b] sm:$0xff]  ;;  %v1362_v62 = vld [vmem:[%s3124_s17 + $0x53] sm:$0xff] }
 0x139   : > { %v3550_v15 = vpop.permute.xlu1 %877  ;;  %v3552_v12 = vpop.permute.xlu0 %872 }
 0x13a   : > { %5582 = vst [vmem:[#allocation64_spill] sm:$0xff] %v3550_v15  ;;  %5583 = vst [vmem:[#allocation65_spill] sm:$0xff] %v3552_v12  ;;  %1419 = vperm.xlu1 %3080, %v1359_v16   ;;  %1414 = vperm.xlu0 %3079, %v1358_v19   ;;  %v1365_v16 = vld [vmem:[%s3124_s17 + $0x6b] sm:$0xff]  ;;  %v1364_v19 = vld [vmem:[%s3124_s17 + $0x63] sm:$0xff] }
 0x13d   : > { %v3556_v11 = vpop.permute.xlu1 %887  ;;  %v3558_v8 = vpop.permute.xlu0 %882 }
 0x13e   : > { %5584 = vst [vmem:[#allocation66_spill] sm:$0xff] %v3556_v11  ;;  %5585 = vst [vmem:[#allocation67_spill] sm:$0xff] %v3558_v8  ;;  %1429 = vperm.xlu1 %3080, %v1361_v3   ;;  %1424 = vperm.xlu0 %3079, %v1360_v4   ;;  %v1367_v3 = vld [vmem:[%s3124_s17 + $0x7b] sm:$0xff]  ;;  %v1366_v4 = vld [vmem:[%s3124_s17 + $0x73] sm:$0xff] }
 0x141   : > { %v3562_v20 = vpop.permute.xlu1 %897  ;;  %v3564_v15 = vpop.permute.xlu0 %892 }
 0x142   : > { %5586 = vst [vmem:[#allocation68_spill] sm:$0xff] %v3562_v20  ;;  %5587 = vst [vmem:[#allocation69_spill] sm:$0xff] %v3564_v15  ;;  %1439 = vperm.xlu1 %3080, %v1363_v54   ;;  %1434 = vperm.xlu0 %3079, %v1362_v62   ;;  %v1369_v54 = vld [vmem:[%s3124_s17 + $0x8b] sm:$0xff]  ;;  %v1368_v62 = vld [vmem:[%s3124_s17 + $0x83] sm:$0xff] }
 0x145   : > { %v3568_v12 = vpop.permute.xlu1 %907  ;;  %v3570_v11 = vpop.permute.xlu0 %902 }
 0x146   : > { %5588 = vst [vmem:[#allocation70_spill] sm:$0xff] %v3568_v12  ;;  %5589 = vst [vmem:[#allocation71_spill] sm:$0xff] %v3570_v11  ;;  %1449 = vperm.xlu1 %3080, %v1365_v16   ;;  %1444 = vperm.xlu0 %3079, %v1364_v19   ;;  %v1371_v16 = vld [vmem:[%s3124_s17 + $0x9b] sm:$0xff]  ;;  %v1370_v19 = vld [vmem:[%s3124_s17 + $0x93] sm:$0xff] }
 0x149   : > { %v3574_v8 = vpop.permute.xlu1 %917  ;;  %v3576_v20 = vpop.permute.xlu0 %912 }
 0x14a   : > { %5590 = vst [vmem:[#allocation72_spill] sm:$0xff] %v3574_v8  ;;  %5591 = vst [vmem:[#allocation73_spill] sm:$0xff] %v3576_v20  ;;  %1459 = vperm.xlu1 %3080, %v1367_v3   ;;  %1454 = vperm.xlu0 %3079, %v1366_v4   ;;  %v1373_v3 = vld [vmem:[%s3124_s17 + $0xab] sm:$0xff]  ;;  %v1372_v4 = vld [vmem:[%s3124_s17 + $0xa3] sm:$0xff] }
 0x14d   : > { %v3580_v15 = vpop.permute.xlu1 %927  ;;  %v3582_v12 = vpop.permute.xlu0 %922 }
 0x14e   : > { %5592 = vst [vmem:[#allocation74_spill] sm:$0xff] %v3580_v15  ;;  %5593 = vst [vmem:[#allocation75_spill] sm:$0xff] %v3582_v12  ;;  %1469 = vperm.xlu1 %3080, %v1369_v54   ;;  %1464 = vperm.xlu0 %3079, %v1368_v62   ;;  %v1375_v54 = vld [vmem:[%s3124_s17 + $0xbb] sm:$0xff]  ;;  %v1374_v62 = vld [vmem:[%s3124_s17 + $0xb3] sm:$0xff] }
 0x151   : > { %v3586_v11 = vpop.permute.xlu1 %937  ;;  %v3588_v8 = vpop.permute.xlu0 %932 }
 0x152   : > { %5594 = vst [vmem:[#allocation76_spill] sm:$0xff] %v3586_v11  ;;  %5595 = vst [vmem:[#allocation77_spill] sm:$0xff] %v3588_v8  ;;  %1479 = vperm.xlu1 %3080, %v1371_v16   ;;  %1474 = vperm.xlu0 %3079, %v1370_v19   ;;  %v1377_v16 = vld [vmem:[%s3124_s17 + $0xcb] sm:$0xff]  ;;  %v1376_v19 = vld [vmem:[%s3124_s17 + $0xc3] sm:$0xff] }
 0x155   : > { %v3592_v20 = vpop.permute.xlu1 %947  ;;  %v3594_v15 = vpop.permute.xlu0 %942 }
 0x156   : > { %5596 = vst [vmem:[#allocation78_spill] sm:$0xff] %v3592_v20  ;;  %5597 = vst [vmem:[#allocation79_spill] sm:$0xff] %v3594_v15  ;;  %1489 = vperm.xlu1 %3080, %v1373_v3   ;;  %1484 = vperm.xlu0 %3079, %v1372_v4   ;;  %v1379_v3 = vld [vmem:[%s3124_s17 + $0xdb] sm:$0xff]  ;;  %v1378_v4 = vld [vmem:[%s3124_s17 + $0xd3] sm:$0xff] }
 0x159   : > { %v3598_v12 = vpop.permute.xlu1 %957  ;;  %v3600_v11 = vpop.permute.xlu0 %952 }
 0x15a   : > { %5598 = vst [vmem:[#allocation80_spill] sm:$0xff] %v3598_v12  ;;  %5599 = vst [vmem:[#allocation81_spill] sm:$0xff] %v3600_v11  ;;  %1499 = vperm.xlu1 %3080, %v1375_v54   ;;  %1494 = vperm.xlu0 %3079, %v1374_v62   ;;  %v1381_v54 = vld [vmem:[%s3124_s17 + $0xeb] sm:$0xff]  ;;  %v1380_v62 = vld [vmem:[%s3124_s17 + $0xe3] sm:$0xff] }
 0x15d   : > { %v3604_v8 = vpop.permute.xlu1 %967  ;;  %v3606_v20 = vpop.permute.xlu0 %962 }
 0x15e   : > { %5600 = vst [vmem:[#allocation82_spill] sm:$0xff] %v3604_v8  ;;  %5601 = vst [vmem:[#allocation83_spill] sm:$0xff] %v3606_v20  ;;  %1509 = vperm.xlu1 %3080, %v1377_v16   ;;  %1504 = vperm.xlu0 %3079, %v1376_v19   ;;  %v1383_v16 = vld [vmem:[%s3124_s17 + $0xfb] sm:$0xff]  ;;  %v1382_v19 = vld [vmem:[%s3124_s17 + $0xf3] sm:$0xff] }
 0x161   : > { %v3610_v15 = vpop.permute.xlu1 %977  ;;  %v3612_v12 = vpop.permute.xlu0 %972 }
 0x162   : > { %5602 = vst [vmem:[#allocation84_spill] sm:$0xff] %v3610_v15  ;;  %5603 = vst [vmem:[#allocation85_spill] sm:$0xff] %v3612_v12  ;;  %1519 = vperm.xlu1 %3080, %v1379_v3   ;;  %1514 = vperm.xlu0 %3079, %v1378_v4   ;;  %v1385_v3 = vld [vmem:[%s3124_s17 + $0x10b] sm:$0xff]  ;;  %v1384_v4 = vld [vmem:[%s3124_s17 + $0x103] sm:$0xff] }
 0x165   : > { %v3616_v11 = vpop.permute.xlu1 %1103  ;;  %v3618_v8 = vpop.permute.xlu0 %1098 }
 0x166   : > { %5604 = vst [vmem:[#allocation86_spill] sm:$0xff] %v3616_v11  ;;  %5605 = vst [vmem:[#allocation87_spill] sm:$0xff] %v3618_v8  ;;  %1529 = vperm.xlu1 %3080, %v1381_v54   ;;  %1524 = vperm.xlu0 %3079, %v1380_v62   ;;  %v1387_v54 = vld [vmem:[%s3124_s17 + $0x11b] sm:$0xff]  ;;  %v1386_v62 = vld [vmem:[%s3124_s17 + $0x113] sm:$0xff] }
 0x169   : > { %v3622_v20 = vpop.permute.xlu1 %1113  ;;  %v3624_v15 = vpop.permute.xlu0 %1108 }
 0x16a   : > { %5606 = vst [vmem:[#allocation88_spill] sm:$0xff] %v3622_v20  ;;  %5607 = vst [vmem:[#allocation89_spill] sm:$0xff] %v3624_v15  ;;  %1539 = vperm.xlu1 %3080, %v1383_v16   ;;  %1534 = vperm.xlu0 %3079, %v1382_v19   ;;  %v1389_v16 = vld [vmem:[%s3124_s17 + $0x12b] sm:$0xff]  ;;  %v1388_v19 = vld [vmem:[%s3124_s17 + $0x123] sm:$0xff] }
 0x16d   : > { %v3628_v12 = vpop.permute.xlu1 %1123  ;;  %v3630_v11 = vpop.permute.xlu0 %1118 }
 0x16e   : > { %5608 = vst [vmem:[#allocation90_spill] sm:$0xff] %v3628_v12  ;;  %5609 = vst [vmem:[#allocation91_spill] sm:$0xff] %v3630_v11  ;;  %1549 = vperm.xlu1 %3080, %v1385_v3   ;;  %1544 = vperm.xlu0 %3079, %v1384_v4   ;;  %v1651_v3 = vld [vmem:[%s3124_s17 + $0x1c] sm:$0xff]  ;;  %v1650_v4 = vld [vmem:[%s3124_s17 + $0x14] sm:$0xff] }
 0x171   : > { %v3634_v8 = vpop.permute.xlu1 %1133  ;;  %v3636_v20 = vpop.permute.xlu0 %1128 }
 0x172   : > { %5610 = vst [vmem:[#allocation92_spill] sm:$0xff] %v3634_v8  ;;  %5611 = vst [vmem:[#allocation93_spill] sm:$0xff] %v3636_v20  ;;  %1559 = vperm.xlu1 %3080, %v1387_v54   ;;  %1554 = vperm.xlu0 %3079, %v1386_v62   ;;  %v3651_v54 = vld [vmem:[%s3124_s17 + $0x2c] sm:$0xff]  ;;  %v3654_v62 = vld [vmem:[%s3124_s17 + $0x24] sm:$0xff] }
 0x175   : > { %v3640_v15 = vpop.permute.xlu1 %1143  ;;  %v3642_v12 = vpop.permute.xlu0 %1138 }
 0x176   : > { %5612 = vst [vmem:[#allocation94_spill] sm:$0xff] %v3640_v15  ;;  %5613 = vst [vmem:[#allocation95_spill] sm:$0xff] %v3642_v12  ;;  %1569 = vperm.xlu1 %3080, %v1389_v16   ;;  %1564 = vperm.xlu0 %3079, %v1388_v19   ;;  %v3663_v16 = vld [vmem:[%s3124_s17 + $0x3c] sm:$0xff]  ;;  %v3666_v19 = vld [vmem:[%s3124_s17 + $0x34] sm:$0xff] }
 0x179   : > { %v3646_v11 = vpop.permute.xlu1 %1153  ;;  %v3648_v8 = vpop.permute.xlu0 %1148 }
 0x17a   : > { %5614 = vst [vmem:[#allocation96_spill] sm:$0xff] %v3646_v11  ;;  %5615 = vst [vmem:[#allocation97_spill] sm:$0xff] %v3648_v8  ;;  %1695 = vperm.xlu1 %3080, %v1651_v3   ;;  %1690 = vperm.xlu0 %3079, %v1650_v4  }
 0x17d   : > { %v3656_v15 = vpop.permute.xlu1 %1163  ;;  %v3658_v12 = vpop.permute.xlu0 %1158 }
 0x17e   : > { %5616 = vst [vmem:[#allocation98_spill] sm:$0xff] %v3656_v15  ;;  %5617 = vst [vmem:[#allocation99_spill] sm:$0xff] %v3658_v12  ;;  %1705 = vperm.xlu1 %3080, %v3651_v54   ;;  %1700 = vperm.xlu0 %3079, %v3654_v62   ;;  %v3675_v12 = vld [vmem:[%s3124_s17 + $0x4c] sm:$0xff]  ;;  %v3678_v15 = vld [vmem:[%s3124_s17 + $0x44] sm:$0xff] }
 0x181   : > { %v3668_v3 = vpop.permute.xlu1 %1173  ;;  %v3670_v4 = vpop.permute.xlu0 %1168 }
 0x182   : > { %5618 = vst [vmem:[#allocation100_spill] sm:$0xff] %v3668_v3  ;;  %5619 = vst [vmem:[#allocation101_spill] sm:$0xff] %v3670_v4  ;;  %1715 = vperm.xlu1 %3080, %v3663_v16   ;;  %1710 = vperm.xlu0 %3079, %v3666_v19   ;;  %v3687_v4 = vld [vmem:[%s3124_s17 + $0x5c] sm:$0xff]  ;;  %v3690_v3 = vld [vmem:[%s3124_s17 + $0x54] sm:$0xff] }
 0x185   : > { %v3680_v8 = vpop.permute.xlu1 %1183  ;;  %v3682_v11 = vpop.permute.xlu0 %1178 }
 0x186   : > { %5620 = vst [vmem:[#allocation102_spill] sm:$0xff] %v3680_v8  ;;  %5621 = vst [vmem:[#allocation103_spill] sm:$0xff] %v3682_v11  ;;  %1725 = vperm.xlu1 %3080, %v3675_v12   ;;  %1720 = vperm.xlu0 %3079, %v3678_v15   ;;  %v3699_v11 = vld [vmem:[%s3124_s17 + $0x6c] sm:$0xff]  ;;  %v3702_v8 = vld [vmem:[%s3124_s17 + $0x64] sm:$0xff] }
 0x189   : > { %v3692_v20 = vpop.permute.xlu1 %1193  ;;  %v3694_v7 = vpop.permute.xlu0 %1188 }
 0x18a   : > { %5622 = vst [vmem:[#allocation104_spill] sm:$0xff] %v3692_v20  ;;  %5623 = vst [vmem:[#allocation105_spill] sm:$0xff] %v3694_v7  ;;  %1735 = vperm.xlu1 %3080, %v3687_v4   ;;  %1730 = vperm.xlu0 %3079, %v3690_v3   ;;  %v3711_v7 = vld [vmem:[%s3124_s17 + $0x7c] sm:$0xff]  ;;  %v3714_v20 = vld [vmem:[%s3124_s17 + $0x74] sm:$0xff] }
 0x18d   : > { %v3704_v0 = vpop.permute.xlu1 %1203  ;;  %v3706_v63 = vpop.permute.xlu0 %1198 }
 0x18e   : > { %5624 = vst [vmem:[#allocation106_spill] sm:$0xff] %v3704_v0  ;;  %5625 = vst [vmem:[#allocation107_spill] sm:$0xff] %v3706_v63  ;;  %1745 = vperm.xlu1 %3080, %v3699_v11   ;;  %1740 = vperm.xlu0 %3079, %v3702_v8   ;;  %v3723_v63 = vld [vmem:[%s3124_s17 + $0x8c] sm:$0xff]  ;;  %v3726_v0 = vld [vmem:[%s3124_s17 + $0x84] sm:$0xff] }
 0x191   : > { %v3716_v60 = vpop.permute.xlu1 %1213  ;;  %v3718_v59 = vpop.permute.xlu0 %1208 }
 0x192   : > { %5626 = vst [vmem:[#allocation108_spill] sm:$0xff] %v3716_v60  ;;  %5627 = vst [vmem:[#allocation109_spill] sm:$0xff] %v3718_v59  ;;  %1755 = vperm.xlu1 %3080, %v3711_v7   ;;  %1750 = vperm.xlu0 %3079, %v3714_v20   ;;  %v3735_v59 = vld [vmem:[%s3124_s17 + $0x9c] sm:$0xff]  ;;  %v3738_v60 = vld [vmem:[%s3124_s17 + $0x94] sm:$0xff] }
 0x195   : > { %v3728_v56 = vpop.permute.xlu1 %1223  ;;  %v3730_v55 = vpop.permute.xlu0 %1218 }
 0x196   : > { %5628 = vst [vmem:[#allocation110_spill] sm:$0xff] %v3728_v56  ;;  %5629 = vst [vmem:[#allocation111_spill] sm:$0xff] %v3730_v55  ;;  %1765 = vperm.xlu1 %3080, %v3723_v63   ;;  %1760 = vperm.xlu0 %3079, %v3726_v0   ;;  %v3747_v55 = vld [vmem:[%s3124_s17 + $0xac] sm:$0xff]  ;;  %v3750_v56 = vld [vmem:[%s3124_s17 + $0xa4] sm:$0xff] }
 0x199   : > { %v3740_v52 = vpop.permute.xlu1 %1233  ;;  %v3742_v51 = vpop.permute.xlu0 %1228 }
 0x19a   : > { %5630 = vst [vmem:[#allocation112_spill] sm:$0xff] %v3740_v52  ;;  %5631 = vst [vmem:[#allocation113_spill] sm:$0xff] %v3742_v51  ;;  %1775 = vperm.xlu1 %3080, %v3735_v59   ;;  %1770 = vperm.xlu0 %3079, %v3738_v60   ;;  %v3759_v51 = vld [vmem:[%s3124_s17 + $0xbc] sm:$0xff]  ;;  %v3762_v52 = vld [vmem:[%s3124_s17 + $0xb4] sm:$0xff] }
 0x19d   : > { %v3752_v48 = vpop.permute.xlu1 %1243  ;;  %v3754_v47 = vpop.permute.xlu0 %1238 }
 0x19e   : > { %5632 = vst [vmem:[#allocation114_spill] sm:$0xff] %v3752_v48  ;;  %5633 = vst [vmem:[#allocation115_spill] sm:$0xff] %v3754_v47  ;;  %1785 = vperm.xlu1 %3080, %v3747_v55   ;;  %1780 = vperm.xlu0 %3079, %v3750_v56   ;;  %v3771_v47 = vld [vmem:[%s3124_s17 + $0xcc] sm:$0xff]  ;;  %v3774_v48 = vld [vmem:[%s3124_s17 + $0xc4] sm:$0xff] }
 0x1a1   : > { %v3764_v44 = vpop.permute.xlu1 %1253  ;;  %v3766_v43 = vpop.permute.xlu0 %1248 }
 0x1a2   : > { %5634 = vst [vmem:[#allocation116_spill] sm:$0xff] %v3764_v44  ;;  %5635 = vst [vmem:[#allocation117_spill] sm:$0xff] %v3766_v43  ;;  %1795 = vperm.xlu1 %3080, %v3759_v51   ;;  %1790 = vperm.xlu0 %3079, %v3762_v52   ;;  %v3783_v43 = vld [vmem:[%s3124_s17 + $0xdc] sm:$0xff]  ;;  %v3786_v44 = vld [vmem:[%s3124_s17 + $0xd4] sm:$0xff] }
 0x1a5   : > { %v3776_v40 = vpop.permute.xlu1 %1263  ;;  %v3778_v39 = vpop.permute.xlu0 %1258 }
 0x1a6   : > { %5636 = vst [vmem:[#allocation118_spill] sm:$0xff] %v3776_v40  ;;  %5637 = vst [vmem:[#allocation119_spill] sm:$0xff] %v3778_v39  ;;  %1805 = vperm.xlu1 %3080, %v3771_v47   ;;  %1800 = vperm.xlu0 %3079, %v3774_v48   ;;  %v3795_v39 = vld [vmem:[%s3124_s17 + $0xec] sm:$0xff]  ;;  %v3798_v40 = vld [vmem:[%s3124_s17 + $0xe4] sm:$0xff] }
 0x1a9   : > { %v3788_v36 = vpop.permute.xlu1 %1273  ;;  %v3790_v35 = vpop.permute.xlu0 %1268 }
 0x1aa   : > { %5638 = vst [vmem:[#allocation120_spill] sm:$0xff] %v3788_v36  ;;  %5639 = vst [vmem:[#allocation121_spill] sm:$0xff] %v3790_v35  ;;  %1815 = vperm.xlu1 %3080, %v3783_v43   ;;  %1810 = vperm.xlu0 %3079, %v3786_v44   ;;  %v3807_v35 = vld [vmem:[%s3124_s17 + $0xfc] sm:$0xff]  ;;  %v3810_v36 = vld [vmem:[%s3124_s17 + $0xf4] sm:$0xff] }
 0x1ad   : > { %v3800_v32 = vpop.permute.xlu1 %1399  ;;  %v3802_v31 = vpop.permute.xlu0 %1394 }
 0x1ae   : > { %5640 = vst [vmem:[#allocation122_spill] sm:$0xff] %v3800_v32  ;;  %5641 = vst [vmem:[#allocation123_spill] sm:$0xff] %v3802_v31  ;;  %1825 = vperm.xlu1 %3080, %v3795_v39   ;;  %1820 = vperm.xlu0 %3079, %v3798_v40   ;;  %v3819_v31 = vld [vmem:[%s3124_s17 + $0x10c] sm:$0xff]  ;;  %v3822_v32 = vld [vmem:[%s3124_s17 + $0x104] sm:$0xff] }
 0x1b1   : > { %v3812_v28 = vpop.permute.xlu1 %1409  ;;  %v3814_v27 = vpop.permute.xlu0 %1404 }
 0x1b2   : > { %5642 = vst [vmem:[#allocation124_spill] sm:$0xff] %v3812_v28  ;;  %5643 = vst [vmem:[#allocation125_spill] sm:$0xff] %v3814_v27  ;;  %1835 = vperm.xlu1 %3080, %v3807_v35   ;;  %1830 = vperm.xlu0 %3079, %v3810_v36   ;;  %v3831_v28 = vld [vmem:[%s3124_s17 + $0x11c] sm:$0xff]  ;;  %v3834_v27 = vld [vmem:[%s3124_s17 + $0x114] sm:$0xff] }
 0x1b5   : > { %v3824_v24 = vpop.permute.xlu1 %1419  ;;  %v3826_v23 = vpop.permute.xlu0 %1414 }
 0x1b6   : > { %5644 = vst [vmem:[#allocation126_spill] sm:$0xff] %v3824_v24  ;;  %5645 = vst [vmem:[#allocation127_spill] sm:$0xff] %v3826_v23  ;;  %1845 = vperm.xlu1 %3080, %v3819_v31   ;;  %1840 = vperm.xlu0 %3079, %v3822_v32   ;;  %v3846_v24 = vld [vmem:[%s3124_s17 + $0x124] sm:$0xff] }
 0x1b9   : > { %v3836_v58 = vpop.permute.xlu1 %1429  ;;  %v3838_v61 = vpop.permute.xlu0 %1424 }
 0x1ba   : > { %5646 = vst [vmem:[#allocation128_spill] sm:$0xff] %v3836_v58  ;;  %5647 = vst [vmem:[#allocation129_spill] sm:$0xff] %v3838_v61  ;;  %1855 = vperm.xlu1 %3080, %v3831_v28   ;;  %1850 = vperm.xlu0 %3079, %v3834_v27  }
 0x1bd   : > { %v3848_v23 = vpop.permute.xlu1 %1439  ;;  %v3850_v49 = vpop.permute.xlu0 %1434 }
 0x1be   : > { %5648 = vst [vmem:[#allocation130_spill] sm:$0xff] %v3848_v23  ;;  %5649 = vst [vmem:[#allocation131_spill] sm:$0xff] %v3850_v49  ;;  %1865 = vperm.xlu1 %3080, %v3843_v53   ;;  %1860 = vperm.xlu0 %3079, %v3846_v24  }
 0x1c1   : > { %v3854_v57 = vpop.permute.xlu1 %1449  ;;  %v3856_v58 = vpop.permute.xlu0 %1444 }
 0x1c2   : > { %5650 = vst [vmem:[#allocation132_spill] sm:$0xff] %v3856_v58  ;;  %1991 = vperm.xlu1 %3080, %v3651_v54   ;;  %1986 = vperm.xlu0 %3079, %v3654_v62  }
 0x1c5   : > { %v3860_v61 = vpop.permute.xlu1 %1459  ;;  %v3862_v50 = vpop.permute.xlu0 %1454 }
 0x1c6   : > { %2001 = vperm.xlu1 %3080, %v3663_v16   ;;  %1996 = vperm.xlu0 %3079, %v3666_v19  }
 0x1c9   : > { %v3866_v49 = vpop.permute.xlu1 %1469  ;;  %v3868_v23 = vpop.permute.xlu0 %1464 }
 0x1ca   : > { %2011 = vperm.xlu1 %3080, %v3675_v12   ;;  %2006 = vperm.xlu0 %3079, %v3678_v15  }
 0x1cd   : > { %v3872_v58 = vpop.permute.xlu1 %1479  ;;  %v3874_v54 = vpop.permute.xlu0 %1474 }
 0x1ce   : > { %5651 = vst [vmem:[#allocation133_spill] sm:$0xff] %v3872_v58  ;;  %5652 = vst [vmem:[#allocation134_spill] sm:$0xff] %v3874_v54  ;;  %2021 = vperm.xlu1 %3080, %v3687_v4   ;;  %2016 = vperm.xlu0 %3079, %v3690_v3  }
 0x1d1   : > { %v3878_v62 = vpop.permute.xlu1 %1489  ;;  %v3880_v16 = vpop.permute.xlu0 %1484 }
 0x1d2   : > { %5653 = vst [vmem:[#allocation135_spill] sm:$0xff] %v3878_v62  ;;  %5654 = vst [vmem:[#allocation136_spill] sm:$0xff] %v3880_v16  ;;  %2031 = vperm.xlu1 %3080, %v3699_v11   ;;  %2026 = vperm.xlu0 %3079, %v3702_v8   ;;  %v5735_v16 = vld [vmem:[#allocation11_spill] sm:$0xff] }
 0x1d5   : > { %v3884_v19 = vpop.permute.xlu1 %1499  ;;  %v3886_v12 = vpop.permute.xlu0 %1494 }
 0x1d6   : > { %5655 = vst [vmem:[#allocation137_spill] sm:$0xff] %v3884_v19  ;;  %5656 = vst [vmem:[#allocation138_spill] sm:$0xff] %v3886_v12  ;;  %2041 = vperm.xlu1 %3080, %v3711_v7   ;;  %2036 = vperm.xlu0 %3079, %v3714_v20   ;;  %v5733_v12 = vld [vmem:[#allocation19_spill] sm:$0xff] }
 0x1d9   : > { %v3890_v15 = vpop.permute.xlu1 %1509  ;;  %v3892_v4 = vpop.permute.xlu0 %1504 }
 0x1da   : > { %5657 = vst [vmem:[#allocation139_spill] sm:$0xff] %v3890_v15  ;;  %5658 = vst [vmem:[#allocation140_spill] sm:$0xff] %v3892_v4  ;;  %2051 = vperm.xlu1 %3080, %v3723_v63   ;;  %2046 = vperm.xlu0 %3079, %v3726_v0  }
 0x1dd   : > { %v3896_v3 = vpop.permute.xlu1 %1519  ;;  %v3898_v11 = vpop.permute.xlu0 %1514 }
 0x1de   : > { %5659 = vst [vmem:[#allocation141_spill] sm:$0xff] %v3896_v3  ;;  %5660 = vst [vmem:[#allocation142_spill] sm:$0xff] %v3898_v11  ;;  %2061 = vperm.xlu1 %3080, %v3735_v59   ;;  %2056 = vperm.xlu0 %3079, %v3738_v60  }
 0x1e1   : > { %v3902_v8 = vpop.permute.xlu1 %1529  ;;  %v3904_v7 = vpop.permute.xlu0 %1524 }
 0x1e2   : > { %5661 = vst [vmem:[#allocation143_spill] sm:$0xff] %v3902_v8  ;;  %5662 = vst [vmem:[#allocation144_spill] sm:$0xff] %v3904_v7  ;;  %2071 = vperm.xlu1 %3080, %v3747_v55   ;;  %2066 = vperm.xlu0 %3079, %v3750_v56  }
 0x1e5   : > { %v3908_v20 = vpop.permute.xlu1 %1539  ;;  %v3910_v63 = vpop.permute.xlu0 %1534 }
 0x1e6   : > { %5663 = vst [vmem:[#allocation145_spill] sm:$0xff] %v3908_v20  ;;  %5664 = vst [vmem:[#allocation146_spill] sm:$0xff] %v3910_v63  ;;  %2081 = vperm.xlu1 %3080, %v3759_v51   ;;  %2076 = vperm.xlu0 %3079, %v3762_v52  }
 0x1e9   : > { %v3914_v0 = vpop.permute.xlu1 %1549  ;;  %v3916_v59 = vpop.permute.xlu0 %1544 }
 0x1ea   : > { %5665 = vst [vmem:[#allocation147_spill] sm:$0xff] %v3914_v0  ;;  %5666 = vst [vmem:[#allocation148_spill] sm:$0xff] %v3916_v59  ;;  %2091 = vperm.xlu1 %3080, %v3771_v47   ;;  %2086 = vperm.xlu0 %3079, %v3774_v48  }
 0x1ed   : > { %v3920_v60 = vpop.permute.xlu1 %1559  ;;  %v3922_v55 = vpop.permute.xlu0 %1554 }
 0x1ee   : > { %5667 = vst [vmem:[#allocation149_spill] sm:$0xff] %v3920_v60  ;;  %5668 = vst [vmem:[#allocation150_spill] sm:$0xff] %v3922_v55  ;;  %2101 = vperm.xlu1 %3080, %v3783_v43   ;;  %2096 = vperm.xlu0 %3079, %v3786_v44  }
 0x1f1   : > { %v3926_v56 = vpop.permute.xlu1 %1569  ;;  %v3928_v51 = vpop.permute.xlu0 %1564 }
 0x1f2   : > { %5669 = vst [vmem:[#allocation151_spill] sm:$0xff] %v3926_v56  ;;  %5670 = vst [vmem:[#allocation152_spill] sm:$0xff] %v3928_v51  ;;  %2111 = vperm.xlu1 %3080, %v3795_v39   ;;  %2106 = vperm.xlu0 %3079, %v3798_v40  }
 0x1f5   : > { %v3932_v52 = vpop.permute.xlu1 %1695  ;;  %v3934_v47 = vpop.permute.xlu0 %1690 }
 0x1f6   : > { %5671 = vst [vmem:[#allocation153_spill] sm:$0xff] %v3932_v52  ;;  %5672 = vst [vmem:[#allocation154_spill] sm:$0xff] %v3934_v47  ;;  %2121 = vperm.xlu1 %3080, %v3807_v35   ;;  %2116 = vperm.xlu0 %3079, %v3810_v36  }
 0x1f9   : > { %v3938_v43 = vpop.permute.xlu1 %1705  ;;  %v3940_v44 = vpop.permute.xlu0 %1700 }
 0x1fa   : > { %5673 = vst [vmem:[#allocation155_spill] sm:$0xff] %v3938_v43  ;;  %5674 = vst [vmem:[#allocation156_spill] sm:$0xff] %v3940_v44  ;;  %2131 = vperm.xlu1 %3080, %v3819_v31   ;;  %2126 = vperm.xlu0 %3079, %v3822_v32   ;;  %v1981_v31 = vld [vmem:[%s3124_s17 + $0x13c] sm:$0xff]  ;;  %v1980_v32 = vld [vmem:[%s3124_s17 + $0x134] sm:$0xff] }
 0x1fd   : > { %v3944_v39 = vpop.permute.xlu1 %1715  ;;  %v3946_v40 = vpop.permute.xlu0 %1710 }
 0x1fe   : > { %5675 = vst [vmem:[#allocation157_spill] sm:$0xff] %v3944_v39  ;;  %5676 = vst [vmem:[#allocation158_spill] sm:$0xff] %v3946_v40  ;;  %2141 = vperm.xlu1 %3080, %v3831_v28   ;;  %2136 = vperm.xlu0 %3079, %v3834_v27   ;;  %v2243_v27 = vld [vmem:[%s3124_s17 + $0x2d] sm:$0xff]  ;;  %v2242_v28 = vld [vmem:[%s3124_s17 + $0x25] sm:$0xff] }
 0x201   : > { %v3950_v35 = vpop.permute.xlu1 %1725  ;;  %v3952_v36 = vpop.permute.xlu0 %1720 }
 0x202   : > { %5677 = vst [vmem:[#allocation159_spill] sm:$0xff] %v3950_v35  ;;  %5678 = vst [vmem:[#allocation160_spill] sm:$0xff] %v3952_v36  ;;  %2151 = vperm.xlu1 %3080, %v3843_v53   ;;  %2146 = vperm.xlu0 %3079, %v3846_v24   ;;  %v2245_v53 = vld [vmem:[%s3124_s17 + $0x3d] sm:$0xff]  ;;  %v2244_v24 = vld [vmem:[%s3124_s17 + $0x35] sm:$0xff] }
 0x205   : > { %v3958_v48 = vpop.permute.xlu1 %1735  ;;  %v3960_v40 = vpop.permute.xlu0 %1730 }
 0x206   : > { %5679 = vst [vmem:[#allocation161_spill] sm:$0xff] %v3958_v48  ;;  %5680 = vst [vmem:[#allocation162_spill] sm:$0xff] %v3960_v40  ;;  %2161 = vperm.xlu1 %3080, %v1981_v31   ;;  %2156 = vperm.xlu0 %3079, %v1980_v32   ;;  %v2247_v31 = vld [vmem:[%s3124_s17 + $0x4d] sm:$0xff]  ;;  %v2246_v32 = vld [vmem:[%s3124_s17 + $0x45] sm:$0xff] }
 0x209   : > { %v3964_v35 = vpop.permute.xlu1 %1745  ;;  %v3966_v36 = vpop.permute.xlu0 %1740 }
 0x20a   : > { %5681 = vst [vmem:[#allocation163_spill] sm:$0xff] %v3964_v35  ;;  %5682 = vst [vmem:[#allocation164_spill] sm:$0xff] %v3966_v36  ;;  %2287 = vperm.xlu1 %3080, %v2243_v27   ;;  %2282 = vperm.xlu0 %3079, %v2242_v28   ;;  %v2249_v27 = vld [vmem:[%s3124_s17 + $0x5d] sm:$0xff]  ;;  %v2248_v28 = vld [vmem:[%s3124_s17 + $0x55] sm:$0xff] }
 0x20b   : > { %v5741_v36 = vld [vmem:[#allocation24_spill] sm:$0xff] }
 0x20d   : > { %v3970_v39 = vpop.permute.xlu1 %1755  ;;  %v3972_v48 = vpop.permute.xlu0 %1750 }
 0x20e   : > { %5683 = vst [vmem:[#allocation165_spill] sm:$0xff] %v3970_v39  ;;  %5684 = vst [vmem:[#allocation166_spill] sm:$0xff] %v3972_v48  ;;  %2297 = vperm.xlu1 %3080, %v2245_v53   ;;  %2292 = vperm.xlu0 %3079, %v2244_v24   ;;  %v2251_v53 = vld [vmem:[%s3124_s17 + $0x6d] sm:$0xff]  ;;  %v2250_v24 = vld [vmem:[%s3124_s17 + $0x65] sm:$0xff] }
 0x20f   : > { %v5734_v48 = vld [vmem:[#allocation20_spill] sm:$0xff]  ;;  %v2541_v39 = vld [vmem:[%s3124_s17 + $0x3e] sm:$0xff] }
 0x211   : > { %v3976_v40 = vpop.permute.xlu1 %1765  ;;  %v3978_v44 = vpop.permute.xlu0 %1760 }
 0x212   : > { %5685 = vst [vmem:[#allocation167_spill] sm:$0xff] %v3976_v40  ;;  %5686 = vst [vmem:[#allocation168_spill] sm:$0xff] %v3978_v44  ;;  %2307 = vperm.xlu1 %3080, %v2247_v31   ;;  %2302 = vperm.xlu0 %3079, %v2246_v32   ;;  %v2253_v31 = vld [vmem:[%s3124_s17 + $0x7d] sm:$0xff]  ;;  %v2252_v32 = vld [vmem:[%s3124_s17 + $0x75] sm:$0xff] }
 0x213   : > { %v5730_v44 = vld [vmem:[#allocation17_spill] sm:$0xff] }
 0x215   : > { %v3982_v43 = vpop.permute.xlu1 %1775  ;;  %v3984_v47 = vpop.permute.xlu0 %1770 }
 0x216   : > { %5687 = vst [vmem:[#allocation169_spill] sm:$0xff] %v3982_v43  ;;  %5688 = vst [vmem:[#allocation170_spill] sm:$0xff] %v3984_v47  ;;  %2317 = vperm.xlu1 %3080, %v2249_v27   ;;  %2312 = vperm.xlu0 %3079, %v2248_v28   ;;  %v2255_v27 = vld [vmem:[%s3124_s17 + $0x8d] sm:$0xff]  ;;  %v2254_v28 = vld [vmem:[%s3124_s17 + $0x85] sm:$0xff] }
 0x217   : > { %v5728_v47 = vld [vmem:[#allocation15_spill] sm:$0xff]  ;;  %v5729_v43 = vld [vmem:[#allocation16_spill] sm:$0xff] }
 0x219   : > { %v3988_v52 = vpop.permute.xlu1 %1785  ;;  %v3990_v51 = vpop.permute.xlu0 %1780 }
 0x21a   : > { %5689 = vst [vmem:[#allocation171_spill] sm:$0xff] %v3988_v52  ;;  %5690 = vst [vmem:[#allocation172_spill] sm:$0xff] %v3990_v51  ;;  %2327 = vperm.xlu1 %3080, %v2251_v53   ;;  %2322 = vperm.xlu0 %3079, %v2250_v24   ;;  %v2257_v53 = vld [vmem:[%s3124_s17 + $0x9d] sm:$0xff]  ;;  %v2256_v24 = vld [vmem:[%s3124_s17 + $0x95] sm:$0xff] }
 0x21b   : > { %v5723_v52 = vld [vmem:[#allocation8_spill] sm:$0xff] }
 0x21d   : > { %v3994_v56 = vpop.permute.xlu1 %1795  ;;  %v3996_v55 = vpop.permute.xlu0 %1790 }
 0x21e   : > { %5691 = vst [vmem:[#allocation173_spill] sm:$0xff] %v3994_v56  ;;  %5692 = vst [vmem:[#allocation174_spill] sm:$0xff] %v3996_v55  ;;  %2337 = vperm.xlu1 %3080, %v2253_v31   ;;  %2332 = vperm.xlu0 %3079, %v2252_v32   ;;  %v2259_v31 = vld [vmem:[%s3124_s17 + $0xad] sm:$0xff]  ;;  %v2258_v32 = vld [vmem:[%s3124_s17 + $0xa5] sm:$0xff] }
 0x221   : > { %v4000_v60 = vpop.permute.xlu1 %1805  ;;  %v4002_v59 = vpop.permute.xlu0 %1800 }
 0x222   : > { %5693 = vst [vmem:[#allocation175_spill] sm:$0xff] %v4000_v60  ;;  %5694 = vst [vmem:[#allocation176_spill] sm:$0xff] %v4002_v59  ;;  %2347 = vperm.xlu1 %3080, %v2255_v27   ;;  %2342 = vperm.xlu0 %3079, %v2254_v28   ;;  %v2261_v27 = vld [vmem:[%s3124_s17 + $0xbd] sm:$0xff]  ;;  %v2260_v28 = vld [vmem:[%s3124_s17 + $0xb5] sm:$0xff] }
 0x225   : > { %v4006_v0 = vpop.permute.xlu1 %1815  ;;  %v4008_v63 = vpop.permute.xlu0 %1810 }
 0x226   : > { %5695 = vst [vmem:[#allocation177_spill] sm:$0xff] %v4006_v0  ;;  %5696 = vst [vmem:[#allocation178_spill] sm:$0xff] %v4008_v63  ;;  %2357 = vperm.xlu1 %3080, %v2257_v53   ;;  %2352 = vperm.xlu0 %3079, %v2256_v24   ;;  %v2263_v53 = vld [vmem:[%s3124_s17 + $0xcd] sm:$0xff]  ;;  %v2262_v24 = vld [vmem:[%s3124_s17 + $0xc5] sm:$0xff] }
 0x229   : > { %v4012_v20 = vpop.permute.xlu1 %1825  ;;  %v4014_v60 = vpop.permute.xlu0 %1820 }
 0x22a   : > { %5697 = vst [vmem:[#allocation179_spill] sm:$0xff] %v4012_v20  ;;  %5698 = vst [vmem:[#allocation180_spill] sm:$0xff] %v4014_v60  ;;  %2367 = vperm.xlu1 %3080, %v2259_v31   ;;  %2362 = vperm.xlu0 %3079, %v2258_v32   ;;  %v2265_v31 = vld [vmem:[%s3124_s17 + $0xdd] sm:$0xff]  ;;  %v2264_v32 = vld [vmem:[%s3124_s17 + $0xd5] sm:$0xff] }
 0x22d   : > { %v4018_v59 = vpop.permute.xlu1 %1835  ;;  %v4020_v0 = vpop.permute.xlu0 %1830 }
 0x22e   : > { %5699 = vst [vmem:[#allocation181_spill] sm:$0xff] %v4018_v59  ;;  %5700 = vst [vmem:[#allocation182_spill] sm:$0xff] %v4020_v0  ;;  %2377 = vperm.xlu1 %3080, %v2261_v27   ;;  %2372 = vperm.xlu0 %3079, %v2260_v28   ;;  %v2267_v27 = vld [vmem:[%s3124_s17 + $0xed] sm:$0xff]  ;;  %v2266_v28 = vld [vmem:[%s3124_s17 + $0xe5] sm:$0xff] }
 0x231   : > { %v4024_v63 = vpop.permute.xlu1 %1845  ;;  %v4026_v20 = vpop.permute.xlu0 %1840 }
 0x232   : > { %5701 = vst [vmem:[#allocation183_spill] sm:$0xff] %v4024_v63  ;;  %5702 = vst [vmem:[#allocation184_spill] sm:$0xff] %v4026_v20  ;;  %2387 = vperm.xlu1 %3080, %v2263_v53   ;;  %2382 = vperm.xlu0 %3079, %v2262_v24   ;;  %v2269_v53 = vld [vmem:[%s3124_s17 + $0xfd] sm:$0xff]  ;;  %v2268_v24 = vld [vmem:[%s3124_s17 + $0xf5] sm:$0xff] }
 0x235   : > { %v4030_v60 = vpop.permute.xlu1 %1855  ;;  %v4032_v59 = vpop.permute.xlu0 %1850 }
 0x236   : > { %5703 = vst [vmem:[#allocation185_spill] sm:$0xff] %v4030_v60  ;;  %5704 = vst [vmem:[#allocation186_spill] sm:$0xff] %v4032_v59  ;;  %2397 = vperm.xlu1 %3080, %v2265_v31   ;;  %2392 = vperm.xlu0 %3079, %v2264_v32   ;;  %v2271_v31 = vld [vmem:[%s3124_s17 + $0x10d] sm:$0xff]  ;;  %v2270_v32 = vld [vmem:[%s3124_s17 + $0x105] sm:$0xff] }
 0x239   : > { %v4036_v0 = vpop.permute.xlu1 %1865  ;;  %v4038_v63 = vpop.permute.xlu0 %1860 }
 0x23a   : > { %5705 = vst [vmem:[#allocation187_spill] sm:$0xff] %v4036_v0  ;;  %5706 = vst [vmem:[#allocation188_spill] sm:$0xff] %v4038_v63  ;;  %2407 = vperm.xlu1 %3080, %v2267_v27   ;;  %2402 = vperm.xlu0 %3079, %v2266_v28   ;;  %v2273_v27 = vld [vmem:[%s3124_s17 + $0x11d] sm:$0xff]  ;;  %v2272_v28 = vld [vmem:[%s3124_s17 + $0x115] sm:$0xff] }
 0x23d   : > { %v4042_v20 = vpop.permute.xlu1 %1991  ;;  %v4044_v60 = vpop.permute.xlu0 %1986 }
 0x23e   : > { %5707 = vst [vmem:[#allocation189_spill] sm:$0xff] %v4042_v20  ;;  %5708 = vst [vmem:[#allocation190_spill] sm:$0xff] %v4044_v60  ;;  %2417 = vperm.xlu1 %3080, %v2269_v53   ;;  %2412 = vperm.xlu0 %3079, %v2268_v24   ;;  %v4061_v53 = vld [vmem:[%s5517_s1] ss:$0 sm:$0xff]  ;;  %v2275_v24 = vld [vmem:[%s3124_s17 + $0x12d] sm:$0xff] }
 0x23f   : > { %v2538_v60 = vld [vmem:[%s3124_s17 + $0x26] sm:$0xff] }
 0x241   : > { %v4048_v59 = vpop.permute.xlu1 %2001  ;;  %v4050_v0 = vpop.permute.xlu0 %1996 }
 0x242   : > { %5709 = vst [vmem:[#allocation191_spill] sm:$0xff] %v4048_v59  ;;  %5710 = vst [vmem:[#allocation192_spill] sm:$0xff] %v4050_v0  ;;  %2427 = vperm.xlu1 %3080, %v2271_v31   ;;  %2422 = vperm.xlu0 %3079, %v2270_v32   ;;  %v2274_v59 = vld [vmem:[%s3124_s17 + $0x125] sm:$0xff]  ;;  %v4067_v31 = vmul.f32 %v4061_v53, %v3190_v1  ;;  %v4071_v32 = vmul.f32 %v4061_v53, %v3192_v2 }
 0x243   : > { %v4085_v0 = vmul.f32 %v4061_v53, %v3202_v9  ;;  %v4089_v1 = vmul.f32 %v4061_v53, %v3204_v10  ;;  %v4093_v2 = vmul.f32 %v4061_v53, %v3208_v13  ;;  %v4105_v9 = vmul.f32 %v4061_v53, %v3216_v18  ;;  %v2277_v10 = vld [vmem:[%s3124_s17 + $0x13d] sm:$0xff] }
 0x244   : > { %v4115_v13 = vmul.f32 %v4061_v53, %v3222_v22  ;;  %v4127_v18 = vmul.f32 %v4061_v53, %v3242_v29  ;;  %v4135_v22 = vmul.f32 %v4061_v53, %v3254_v33  ;;  %v4147_v29 = vmul.f32 %v4061_v53, %v3266_v37 }
 0x245   : > { %v4054_v63 = vpop.permute.xlu1 %2011  ;;  %v4056_v55 = vpop.permute.xlu0 %2006  ;;  %v4155_v33 = vmul.f32 %v4061_v53, %v3278_v41  ;;  %v4168_v37 = vmul.f32 %v4061_v53, %v3290_v45  ;;  %v5717_v41 = vld [vmem:[#allocation2_spill] sm:$0xff]  ;;  %v5720_v45 = vld [vmem:[#allocation5_spill] sm:$0xff] }
 0x246   : > { %5711 = vst [vmem:[#allocation193_spill] sm:$0xff] %v4054_v63  ;;  %5712 = vst [vmem:[#allocation194_spill] sm:$0xff] %v4056_v55  ;;  %2437 = vperm.xlu1 %3080, %v2273_v27   ;;  %2432 = vperm.xlu0 %3079, %v2272_v28   ;;  %v4075_v55 = vmul.f32 %v4061_v53, %v3196_v5  ;;  %v395_v28 = vmul.f32 %v4061_v53, %v3198_v6 }
 0x247   : > { %v4097_v5 = vmul.f32 %v4061_v53, %v3210_v14  ;;  %v4101_v6 = vmul.f32 %v4061_v53, %v3214_v17  ;;  %v4119_v14 = vmul.f32 %v4061_v53, %v3230_v25  ;;  %v4123_v17 = vmul.f32 %v4061_v53, %v3232_v26 }
 0x248   : > { %v4139_v25 = vmul.f32 %v4061_v53, %v3256_v34  ;;  %v4160_v34 = vld [vmem:[%s5517_s1 + $0x1] ss:$0 sm:$0xff]  ;;  %v4190_v56 = vmul.f32 %v4061_v53, %v5720_v45 }
 0x249   : > { %v4077_v63 = vpop.permute.xlu1 %2021  ;;  %v4079_v27 = vpop.permute.xlu0 %2016  ;;  %v5725_v45 = vld [vmem:[#allocation14_spill] sm:$0xff]  ;;  %v693_v4 = vmul.f32 %v4160_v34, %v5729_v43  ;;  %v694_v19 = vmul.f32 %v4160_v34, %v5733_v12  ;;  %v2540_v43 = vld [vmem:[%s3124_s17 + $0x36] sm:$0xff] }
 0x24a   : > { %5713 = vst [vmem:[#allocation195_spill] sm:$0xff] %v4077_v63  ;;  %5714 = vst [vmem:[#allocation196_spill] sm:$0xff] %v4079_v27  ;;  %2447 = vperm.xlu1 %3080, %v2275_v24   ;;  %2442 = vperm.xlu0 %3079, %v2274_v59   ;;  %v2276_v27 = vld [vmem:[%s3124_s17 + $0x135] sm:$0xff]  ;;  %v4111_v59 = vmul.f32 %v4061_v53, %v3220_v21  ;;  %v4131_v21 = vmul.f32 %v4061_v53, %v3244_v30 }
 0x24b   : > { %v4151_v30 = vmul.f32 %v4061_v53, %v3268_v38  ;;  %v4172_v38 = vmul.f32 %v4061_v53, %v3292_v46  ;;  %v2539_v63 = vld [vmem:[%s3124_s17 + $0x2e] sm:$0xff]  ;;  %v5721_v46 = vld [vmem:[#allocation6_spill] sm:$0xff]  ;;  %v691_v11 = vmul.f32 %v4160_v34, %v5725_v45  ;;  %v5739_v12 = vld [vmem:[#allocation13_spill] sm:$0xff]  ;;  %v4262_v58 = vadd.f32 %v693_v4, %v4075_v55 }
 0x24c   : > { %v4194_v7 = vmul.f32 %v4061_v53, %v5721_v46  ;;  %v5732_v45 = vld [vmem:[#allocation18_spill] sm:$0xff] }
 0x24d   : > { %v4141_v26 = vpop.permute.xlu1 %2031  ;;  %v4143_v24 = vpop.permute.xlu0 %2026  ;;  %v695_v15 = vmul.f32 %v4160_v34, %v5732_v45  ;;  %v5738_v45 = vld [vmem:[#allocation22_spill] sm:$0xff]  ;;  %v4248_v62 = vadd.f32 %v691_v11, %v395_v28 }
 0x24e   : > { %5715 = vst [vmem:[#allocation197_spill] sm:$0xff] %v4141_v26  ;;  %5716 = vst [vmem:[#allocation198_spill] sm:$0xff] %v4143_v24  ;;  %2457 = vperm.xlu1 %3080, %v2277_v10   ;;  %2452 = vperm.xlu0 %3079, %v2276_v27   ;;  %v4164_v24 = vmul.f32 %v4061_v53, %v3280_v42  ;;  %v4176_v26 = vmul.f32 %v4061_v53, %v5717_v41  ;;  %v5718_v10 = vld [vmem:[#allocation3_spill] sm:$0xff]  ;;  %v5719_v42 = vld [vmem:[#allocation4_spill] sm:$0xff] }
 0x24f   : > { %v4182_v27 = vmul.f32 %v4061_v53, %v5718_v10  ;;  %v4186_v20 = vmul.f32 %v4061_v53, %v5719_v42  ;;  %v5722_v41 = vld [vmem:[#allocation7_spill] sm:$0xff]  ;;  %v4202_v10 = vmul.f32 %v4061_v53, %v5723_v52  ;;  %v5724_v42 = vld [vmem:[#allocation9_spill] sm:$0xff]  ;;  %v692_v52 = vmul.f32 %v4160_v34, %v5730_v44 }
 0x250   : > { %v4198_v51 = vmul.f32 %v4061_v53, %v5722_v41  ;;  %v4206_v8 = vmul.f32 %v4061_v53, %v5724_v42  ;;  %v690_v41 = vmul.f32 %v4160_v34, %v5728_v47  ;;  %v5731_v42 = vld [vmem:[#allocation10_spill] sm:$0xff]  ;;  %v697_v47 = vmul.f32 %v4160_v34, %v5734_v48 }
 0x251   : > { %v4210_v3 = vpop.permute.xlu1 %2041  ;;  %v4212_v46 = vpop.permute.xlu0 %2036  ;;  %v4222_v40 = vmul.f32 %v4061_v53, %v5731_v42  ;;  %v4234_v44 = vmul.f32 %v4061_v53, %v5735_v16  ;;  %v5737_v42 = vld [vmem:[#allocation21_spill] sm:$0xff]  ;;  %v4246_v48 = vmul.f32 %v4061_v53, %v5739_v12  ;;  %v5740_v16 = vld [vmem:[#allocation23_spill] sm:$0xff]  ;;  %v4268_v11 = vadd.f32 %v695_v15, %v4085_v0 }
 0x252   : > { %5726 = vst [vmem:[#allocation2_spill] sm:$0xff] %v4210_v3  ;;  %5727 = vst [vmem:[#allocation3_spill] sm:$0xff] %v4212_v46  ;;  %2583 = vperm.xlu1 %3080, %v2539_v63   ;;  %2578 = vperm.xlu0 %3079, %v2538_v60   ;;  %v5736_v63 = vld [vmem:[#allocation12_spill] sm:$0xff]  ;;  %v696_v46 = vmul.f32 %v4160_v34, %v5737_v42  ;;  %v699_v3 = vmul.f32 %v4160_v34, %v5738_v45  ;;  %v5744_v12 = vld [vmem:[#allocation25_spill] sm:$0xff] }
 0x253   : > { %v4238_v60 = vmul.f32 %v4061_v53, %v5736_v63  ;;  %v698_v54 = vmul.f32 %v4160_v34, %v5740_v16  ;;  %v701_v63 = vmul.f32 %v4160_v34, %v5741_v36  ;;  %v4259_v45 = vadd.f32 %v690_v41, %v4071_v32  ;;  %v2543_v41 = vld [vmem:[%s3124_s17 + $0x4e] sm:$0xff]  ;;  %v2542_v4 = vld [vmem:[%s3124_s17 + $0x46] sm:$0xff] }
 0x254   : > { %v4265_v53 = vadd.f32 %v692_v52, %v4067_v31  ;;  %v4271_v36 = vadd.f32 %v694_v19, %v4089_v1  ;;  %v4274_v28 = vadd.f32 %v697_v47, %v4093_v2  ;;  %v700_v32 = vmul.f32 %v4160_v34, %v5744_v12  ;;  %v5745_v31 = vld [vmem:[#allocation26_spill] sm:$0xff]  ;;  %v5746_v0 = vld [vmem:[#allocation27_spill] sm:$0xff]  ;;  %v5747_v52 = vld [vmem:[#allocation28_spill] sm:$0xff] }
 0x255   : > { %v4254_v35 = vpop.permute.xlu1 %2051  ;;  %v4256_v42 = vpop.permute.xlu0 %2046  ;;  %v4281_v55 = vadd.f32 %v696_v46, %v4097_v5  ;;  %v703_v15 = vmul.f32 %v4160_v34, %v5745_v31  ;;  %v702_v19 = vmul.f32 %v4160_v34, %v5746_v0  ;;  %v4291_v1 = vadd.f32 %v698_v54, %v4105_v9  ;;  %v5748_v46 = vld [vmem:[#allocation29_spill] sm:$0xff]  ;;  %v5752_v12 = vld [vmem:[#allocation31_spill] sm:$0xff]  ;;  %v5753_v9 = vld [vmem:[#allocation32_spill] sm:$0xff] }
 0x256   : > { %5742 = vst [vmem:[#allocation4_spill] sm:$0xff] %v4254_v35  ;;  %5743 = vst [vmem:[#allocation5_spill] sm:$0xff] %v4256_v42  ;;  %2593 = vperm.xlu1 %3080, %v2541_v39   ;;  %2588 = vperm.xlu0 %3079, %v2540_v43   ;;  %v4284_v39 = vadd.f32 %v699_v3, %v4101_v6  ;;  %v4294_v2 = vadd.f32 %v701_v63, %v4111_v59  ;;  %v5751_v43 = vld [vmem:[#allocation30_spill] sm:$0xff]  ;;  %v5754_v31 = vld [vmem:[#allocation33_spill] sm:$0xff] }
 0x257   : > { %v705_v5 = vmul.f32 %v4160_v34, %v5747_v52  ;;  %v704_v3 = vmul.f32 %v4160_v34, %v5748_v46  ;;  %v707_v16 = vmul.f32 %v4160_v34, %v5751_v43  ;;  %v706_v54 = vmul.f32 %v4160_v34, %v5752_v12  ;;  %v5755_v52 = vld [vmem:[#allocation34_spill] sm:$0xff]  ;;  %v2544_v42 = vld [vmem:[%s3124_s17 + $0x56] sm:$0xff] }
 0x258   : > { %v709_v59 = vmul.f32 %v4160_v34, %v5753_v9  ;;  %v4311_v63 = vadd.f32 %v700_v32, %v4115_v13  ;;  %v708_v0 = vmul.f32 %v4160_v34, %v5754_v31  ;;  %v711_v46 = vmul.f32 %v4160_v34, %v5755_v52  ;;  %v5758_v32 = vld [vmem:[#allocation37_spill] sm:$0xff]  ;;  %v5759_v52 = vld [vmem:[#allocation38_spill] sm:$0xff] }
 0x259   : > { %v4300_v6 = vpop.permute.xlu1 %2061  ;;  %v4302_v47 = vpop.permute.xlu0 %2056  ;;  %v4322_v12 = vadd.f32 %v703_v15, %v4119_v14  ;;  %v712_v9 = vmul.f32 %v4160_v34, %v5758_v32  ;;  %v4332_v31 = vadd.f32 %v705_v5, %v4127_v18  ;;  %v715_v14 = vmul.f32 %v4160_v34, %v5759_v52  ;;  %v5760_v15 = vld [vmem:[#allocation39_spill] sm:$0xff]  ;;  %v2548_v35 = vld [vmem:[%s3124_s17 + $0x76] sm:$0xff] }
 0x25a   : > { %5749 = vst [vmem:[#allocation6_spill] sm:$0xff] %v4300_v6  ;;  %5750 = vst [vmem:[#allocation7_spill] sm:$0xff] %v4302_v47  ;;  %2603 = vperm.xlu1 %3080, %v2543_v41   ;;  %2598 = vperm.xlu0 %3079, %v2542_v4   ;;  %v5756_v47 = vld [vmem:[#allocation35_spill] sm:$0xff]  ;;  %v2545_v6 = vld [vmem:[%s3124_s17 + $0x5e] sm:$0xff]  ;;  %v4325_v41 = vadd.f32 %v702_v19, %v4123_v17  ;;  %v714_v17 = vmul.f32 %v4160_v34, %v5760_v15 }
 0x25b   : > { %v710_v43 = vmul.f32 %v4160_v34, %v5756_v47  ;;  %v5757_v4 = vld [vmem:[#allocation36_spill] sm:$0xff]  ;;  %v4335_v47 = vadd.f32 %v704_v3, %v4131_v21  ;;  %v4346_v32 = vadd.f32 %v707_v16, %v4135_v22  ;;  %v4349_v18 = vadd.f32 %v706_v54, %v4139_v25  ;;  %v2546_v25 = vld [vmem:[%s3124_s17 + $0x66] sm:$0xff] }
 0x25c   : > { %v713_v13 = vmul.f32 %v4160_v34, %v5757_v4  ;;  %v4352_v5 = vadd.f32 %v709_v59, %v4147_v29  ;;  %v4355_v21 = vadd.f32 %v708_v0, %v4151_v30  ;;  %v4358_v3 = vadd.f32 %v711_v46, %v4155_v33  ;;  %v5763_v15 = vld [vmem:[#allocation40_spill] sm:$0xff] }
 0x25d   : > { %v4341_v19 = vpop.permute.xlu1 %2071  ;;  %v4343_v4 = vpop.permute.xlu0 %2066  ;;  %v4361_v52 = vadd.f32 %v710_v43, %v4164_v24  ;;  %v717_v22 = vmul.f32 %v4160_v34, %v5763_v15  ;;  %v2547_v16 = vld [vmem:[%s3124_s17 + $0x6e] sm:$0xff]  ;;  %v4371_v29 = vadd.f32 %v712_v9, %v4172_v38  ;;  %v4380_v24 = vld [vmem:[%s5517_s1 + $0x2] ss:$0 sm:$0xff]  ;;  %v4383_v59 = vadd.f32 %v715_v14, %v4176_v26  ;;  %v5770_v15 = vld [vmem:[#allocation45_spill] sm:$0xff] }
 0x25e   : > { %5761 = vst [vmem:[#allocation8_spill] sm:$0xff] %v4341_v19  ;;  %5762 = vst [vmem:[#allocation9_spill] sm:$0xff] %v4343_v4  ;;  %2613 = vperm.xlu1 %3080, %v2545_v6   ;;  %2608 = vperm.xlu0 %3079, %v2544_v42   ;;  %v4368_v54 = vadd.f32 %v713_v13, %v4168_v37  ;;  %v5764_v42 = vld [vmem:[#allocation41_spill] sm:$0xff]  ;;  %v5765_v6 = vld [vmem:[#allocation42_spill] sm:$0xff]  ;;  %v4386_v37 = vadd.f32 %v714_v17, %v4182_v27 }
 0x25f   : > { %v716_v30 = vmul.f32 %v4160_v34, %v5764_v42  ;;  %v719_v33 = vmul.f32 %v4160_v34, %v5765_v6  ;;  %v5766_v38 = vld [vmem:[#allocation43_spill] sm:$0xff]  ;;  %v5767_v46 = vld [vmem:[#allocation44_spill] sm:$0xff]  ;;  %v720_v42 = vmul.f32 %v4160_v34, %v5770_v15  ;;  %v5771_v6 = vld [vmem:[#allocation46_spill] sm:$0xff]  ;;  %v4403_v17 = vadd.f32 %v717_v22, %v4186_v20 }
 0x260   : > { %v718_v0 = vmul.f32 %v4160_v34, %v5766_v38  ;;  %v721_v43 = vmul.f32 %v4160_v34, %v5767_v46  ;;  %v723_v26 = vmul.f32 %v4160_v34, %v5771_v6  ;;  %v5772_v14 = vld [vmem:[#allocation47_spill] sm:$0xff]  ;;  %v5773_v38 = vld [vmem:[#allocation48_spill] sm:$0xff]  ;;  %v5775_v4 = vld [vmem:[#allocation50_spill] sm:$0xff] }
 0x261   : > { %v4392_v13 = vpop.permute.xlu1 %2081  ;;  %v4394_v9 = vpop.permute.xlu0 %2076  ;;  %v722_v27 = vmul.f32 %v4160_v34, %v5772_v14  ;;  %v725_v46 = vmul.f32 %v4160_v34, %v5773_v38  ;;  %v987_v15 = vmul.f32 %v4380_v24, %v5775_v4  ;;  %v2549_v19 = vld [vmem:[%s3124_s17 + $0x7e] sm:$0xff]  ;;  %v4414_v6 = vadd.f32 %v716_v30, %v4190_v56  ;;  %v5777_v22 = vld [vmem:[#allocation52_spill] sm:$0xff] }
 0x262   : > { %5768 = vst [vmem:[#allocation14_spill] sm:$0xff] %v4392_v13  ;;  %5769 = vst [vmem:[#allocation15_spill] sm:$0xff] %v4394_v9  ;;  %2623 = vperm.xlu1 %3080, %v2547_v16   ;;  %2618 = vperm.xlu0 %3079, %v2546_v25   ;;  %v5774_v13 = vld [vmem:[#allocation49_spill] sm:$0xff]  ;;  %v4417_v16 = vadd.f32 %v719_v33, %v4194_v7  ;;  %v5776_v25 = vld [vmem:[#allocation51_spill] sm:$0xff]  ;;  %v989_v14 = vmul.f32 %v4380_v24, %v5777_v22 }
 0x263   : > { %v724_v9 = vmul.f32 %v4160_v34, %v5774_v13  ;;  %v986_v20 = vmul.f32 %v4380_v24, %v5776_v25  ;;  %v4424_v34 = vadd.f32 %v718_v0, %v4198_v51  ;;  %v4427_v4 = vadd.f32 %v721_v43, %v4202_v10  ;;  %v5778_v13 = vld [vmem:[#allocation53_spill] sm:$0xff]  ;;  %v5779_v30 = vld [vmem:[#allocation54_spill] sm:$0xff] }
 0x264   : > { %v988_v56 = vmul.f32 %v4380_v24, %v5778_v13  ;;  %v991_v7 = vmul.f32 %v4380_v24, %v5779_v30  ;;  %v4438_v25 = vadd.f32 %v720_v42, %v4206_v8  ;;  %v4441_v51 = vadd.f32 %v723_v26, %v4222_v40  ;;  %v5781_v13 = vld [vmem:[#allocation55_spill] sm:$0xff] }
 0x265   : > { %v4433_v33 = vpop.permute.xlu1 %2091  ;;  %v4435_v38 = vpop.permute.xlu0 %2086  ;;  %v4444_v0 = vadd.f32 %v722_v27, %v4234_v44  ;;  %v4447_v10 = vadd.f32 %v725_v46, %v4238_v60  ;;  %v4450_v43 = vadd.f32 %v724_v9, %v4246_v48  ;;  %v4453_v22 = vadd.f32 %v987_v15, %v4248_v62  ;;  %v2551_v42 = vld [vmem:[%s3124_s17 + $0x8e] sm:$0xff]  ;;  %v2550_v40 = vld [vmem:[%s3124_s17 + $0x86] sm:$0xff] }
 0x266   : > { %5780 = vst [vmem:[#allocation16_spill] sm:$0xff] %v4435_v38  ;;  %2633 = vperm.xlu1 %3080, %v2549_v19   ;;  %2628 = vperm.xlu0 %3079, %v2548_v35   ;;  %v990_v8 = vmul.f32 %v4380_v24, %v5781_v13  ;;  %v4460_v26 = vadd.f32 %v986_v20, %v4259_v45  ;;  %v5782_v35 = vld [vmem:[#allocation56_spill] sm:$0xff]  ;;  %v5783_v19 = vld [vmem:[#allocation57_spill] sm:$0xff]  ;;  %v5784_v27 = vld [vmem:[#allocation58_spill] sm:$0xff] }
 0x267   : > { %v4463_v44 = vadd.f32 %v989_v14, %v4262_v58  ;;  %v993_v60 = vmul.f32 %v4380_v24, %v5782_v35  ;;  %v992_v48 = vmul.f32 %v4380_v24, %v5783_v19  ;;  %v4470_v62 = vadd.f32 %v988_v56, %v4265_v53  ;;  %v5785_v46 = vld [vmem:[#allocation59_spill] sm:$0xff]  ;;  %v5788_v14 = vld [vmem:[#allocation60_spill] sm:$0xff]  ;;  %v5789_v13 = vld [vmem:[#allocation61_spill] sm:$0xff] }
 0x268   : > { %v4473_v9 = vadd.f32 %v991_v7, %v4268_v11  ;;  %v995_v45 = vmul.f32 %v4380_v24, %v5784_v27  ;;  %v994_v58 = vmul.f32 %v4380_v24, %v5785_v46  ;;  %v997_v30 = vmul.f32 %v4380_v24, %v5788_v14  ;;  %v5790_v56 = vld [vmem:[#allocation62_spill] sm:$0xff]  ;;  %v5791_v35 = vld [vmem:[#allocation63_spill] sm:$0xff]  ;;  %v5792_v27 = vld [vmem:[#allocation64_spill] sm:$0xff] }
 0x269   : > { %v4479_v15 = vpop.permute.xlu1 %2101  ;;  %v4481_v20 = vpop.permute.xlu0 %2096  ;;  %v996_v53 = vmul.f32 %v4380_v24, %v5789_v13  ;;  %v999_v11 = vmul.f32 %v4380_v24, %v5790_v56  ;;  %v4490_v7 = vadd.f32 %v990_v8, %v4271_v36  ;;  %v998_v19 = vmul.f32 %v4380_v24, %v5791_v35  ;;  %v2552_v38 = vld [vmem:[%s3124_s17 + $0x96] sm:$0xff]  ;;  %v5795_v8 = vld [vmem:[#allocation67_spill] sm:$0xff] }
 0x26a   : > { %5786 = vst [vmem:[#allocation17_spill] sm:$0xff] %v4479_v15  ;;  %5787 = vst [vmem:[#allocation10_spill] sm:$0xff] %v4481_v20  ;;  %2643 = vperm.xlu1 %3080, %v2551_v42   ;;  %2638 = vperm.xlu0 %3079, %v2550_v40   ;;  %v1001_v46 = vmul.f32 %v4380_v24, %v5792_v27  ;;  %v5793_v20 = vld [vmem:[#allocation65_spill] sm:$0xff]  ;;  %v4501_v13 = vadd.f32 %v993_v60, %v4274_v28  ;;  %v5794_v40 = vld [vmem:[#allocation66_spill] sm:$0xff] }
 0x26b   : > { %v1000_v14 = vmul.f32 %v4380_v24, %v5793_v20  ;;  %v2553_v15 = vld [vmem:[%s3124_s17 + $0x9e] sm:$0xff]  ;;  %v4504_v42 = vadd.f32 %v992_v48, %v4281_v55  ;;  %v1003_v36 = vmul.f32 %v4380_v24, %v5794_v40  ;;  %v1002_v56 = vmul.f32 %v4380_v24, %v5795_v8  ;;  %v5796_v27 = vld [vmem:[#allocation68_spill] sm:$0xff] }
 0x26c   : > { %v4511_v35 = vadd.f32 %v995_v45, %v4284_v39  ;;  %v4514_v20 = vadd.f32 %v994_v58, %v4291_v1  ;;  %v1005_v28 = vmul.f32 %v4380_v24, %v5796_v27  ;;  %v5797_v60 = vld [vmem:[#allocation69_spill] sm:$0xff]  ;;  %v4525_v8 = vadd.f32 %v997_v30, %v4294_v2  ;;  %v2555_v30 = vld [vmem:[%s3124_s17 + $0xae] sm:$0xff] }
 0x26d   : > { %v1004_v55 = vmul.f32 %v4380_v24, %v5797_v60  ;;  %v4520_v48 = vpop.permute.xlu1 %2111  ;;  %v4522_v40 = vpop.permute.xlu0 %2106  ;;  %v4528_v39 = vadd.f32 %v996_v53, %v4311_v63  ;;  %v4531_v45 = vadd.f32 %v999_v11, %v4322_v12  ;;  %v4534_v1 = vadd.f32 %v998_v19, %v4325_v41  ;;  %v5800_v60 = vld [vmem:[#allocation70_spill] sm:$0xff]  ;;  %v5803_v19 = vld [vmem:[#allocation73_spill] sm:$0xff] }
 0x26e   : > { %5798 = vst [vmem:[#allocation18_spill] sm:$0xff] %v4520_v48  ;;  %5799 = vst [vmem:[#allocation19_spill] sm:$0xff] %v4522_v40  ;;  %2653 = vperm.xlu1 %3080, %v2553_v15   ;;  %2648 = vperm.xlu0 %3079, %v2552_v38   ;;  %v4537_v58 = vadd.f32 %v1001_v46, %v4332_v31  ;;  %v4540_v27 = vadd.f32 %v1000_v14, %v4335_v47  ;;  %v2554_v63 = vld [vmem:[%s3124_s17 + $0xa6] sm:$0xff]  ;;  %v5802_v15 = vld [vmem:[#allocation72_spill] sm:$0xff] }
 0x26f   : > { %v1007_v2 = vmul.f32 %v4380_v24, %v5800_v60  ;;  %v4547_v53 = vadd.f32 %v1003_v36, %v4346_v32  ;;  %v4550_v12 = vadd.f32 %v1002_v56, %v4349_v18  ;;  %v5801_v38 = vld [vmem:[#allocation71_spill] sm:$0xff]  ;;  %v1009_v31 = vmul.f32 %v4380_v24, %v5802_v15  ;;  %v5804_v46 = vld [vmem:[#allocation74_spill] sm:$0xff]  ;;  %v2556_v48 = vld [vmem:[%s3124_s17 + $0xb6] sm:$0xff] }
 0x270   : > { %v1006_v41 = vmul.f32 %v4380_v24, %v5801_v38  ;;  %v4557_v47 = vadd.f32 %v1005_v28, %v4352_v5  ;;  %v4560_v11 = vadd.f32 %v1004_v55, %v4355_v21  ;;  %v1008_v32 = vmul.f32 %v4380_v24, %v5803_v19  ;;  %v5807_v56 = vld [vmem:[#allocation75_spill] sm:$0xff]  ;;  %v5808_v38 = vld [vmem:[#allocation76_spill] sm:$0xff]  ;;  %v5809_v28 = vld [vmem:[#allocation77_spill] sm:$0xff] }
 0x271   : > { %v1011_v18 = vmul.f32 %v4380_v24, %v5804_v46  ;;  %v4566_v14 = vpop.permute.xlu1 %2121  ;;  %v4568_v36 = vpop.permute.xlu0 %2116  ;;  %v1010_v60 = vmul.f32 %v4380_v24, %v5807_v56  ;;  %v1013_v5 = vmul.f32 %v4380_v24, %v5808_v38  ;;  %v1012_v21 = vmul.f32 %v4380_v24, %v5809_v28  ;;  %v5810_v15 = vld [vmem:[#allocation78_spill] sm:$0xff]  ;;  %v5811_v46 = vld [vmem:[#allocation79_spill] sm:$0xff] }
 0x272   : > { %5805 = vst [vmem:[#allocation20_spill] sm:$0xff] %v4566_v14  ;;  %5806 = vst [vmem:[#allocation11_spill] sm:$0xff] %v4568_v36  ;;  %2663 = vperm.xlu1 %3080, %v2555_v30   ;;  %2658 = vperm.xlu0 %3079, %v2554_v63   ;;  %v4577_v55 = vadd.f32 %v1007_v2, %v4358_v3  ;;  %v1015_v19 = vmul.f32 %v4380_v24, %v5810_v15  ;;  %v5812_v14 = vld [vmem:[#allocation80_spill] sm:$0xff]  ;;  %v2557_v40 = vld [vmem:[%s3124_s17 + $0xbe] sm:$0xff] }
 0x273   : > { %v1014_v36 = vmul.f32 %v4380_v24, %v5811_v46  ;;  %v1017_v56 = vmul.f32 %v4380_v24, %v5812_v14  ;;  %v4588_v38 = vadd.f32 %v1006_v41, %v4361_v52  ;;  %v4591_v30 = vadd.f32 %v1009_v31, %v4368_v54  ;;  %v5813_v63 = vld [vmem:[#allocation81_spill] sm:$0xff]  ;;  %v5814_v2 = vld [vmem:[#allocation82_spill] sm:$0xff]  ;;  %v5815_v46 = vld [vmem:[#allocation83_spill] sm:$0xff] }
 0x274   : > { %v1016_v3 = vmul.f32 %v4380_v24, %v5813_v63  ;;  %v1019_v28 = vmul.f32 %v4380_v24, %v5814_v2  ;;  %v4598_v15 = vadd.f32 %v1008_v32, %v4371_v29  ;;  %v4601_v14 = vadd.f32 %v1011_v18, %v4383_v59  ;;  %v5816_v41 = vld [vmem:[#allocation84_spill] sm:$0xff]  ;;  %v4610_v31 = vld [vmem:[%s5517_s1 + $0x3] ss:$0 sm:$0xff] }
 0x275   : > { %v1018_v52 = vmul.f32 %v4380_v24, %v5815_v46  ;;  %v1021_v54 = vmul.f32 %v4380_v24, %v5816_v41  ;;  %v4612_v63 = vpop.permute.xlu1 %2131  ;;  %v4614_v29 = vpop.permute.xlu0 %2126  ;;  %v4617_v32 = vadd.f32 %v1010_v60, %v4386_v37  ;;  %v4620_v59 = vadd.f32 %v1013_v5, %v4403_v17  ;;  %v2559_v60 = vld [vmem:[%s3124_s17 + $0xce] sm:$0xff]  ;;  %v2558_v17 = vld [vmem:[%s3124_s17 + $0xc6] sm:$0xff] }
 0x276   : > { %5817 = vst [vmem:[#allocation12_spill] sm:$0xff] %v4612_v63  ;;  %5818 = vst [vmem:[#allocation21_spill] sm:$0xff] %v4614_v29  ;;  %v4623_v18 = vadd.f32 %v1012_v21, %v4414_v6  ;;  %2673 = vperm.xlu1 %3080, %v2557_v40   ;;  %2668 = vperm.xlu0 %3079, %v2556_v48   ;;  %v4626_v2 = vadd.f32 %v1015_v19, %v4417_v16  ;;  %v5819_v29 = vld [vmem:[#allocation85_spill] sm:$0xff]  ;;  %v5820_v48 = vld [vmem:[#allocation86_spill] sm:$0xff] }
 0x277   : > { %v4629_v46 = vadd.f32 %v1014_v36, %v4424_v34  ;;  %v4632_v41 = vadd.f32 %v1017_v56, %v4427_v4  ;;  %v1020_v37 = vmul.f32 %v4380_v24, %v5819_v29  ;;  %v4639_v5 = vadd.f32 %v1016_v3, %v4438_v25  ;;  %v5821_v40 = vld [vmem:[#allocation87_spill] sm:$0xff]  ;;  %v5822_v36 = vld [vmem:[#allocation88_spill] sm:$0xff]  ;;  %v5823_v21 = vld [vmem:[#allocation89_spill] sm:$0xff] }
 0x278   : > { %v4642_v6 = vadd.f32 %v1019_v28, %v4441_v51  ;;  %v1283_v16 = vmul.f32 %v4610_v31, %v5820_v48  ;;  %v1282_v34 = vmul.f32 %v4610_v31, %v5821_v40  ;;  %v4649_v4 = vadd.f32 %v1018_v52, %v4444_v0  ;;  %v5826_v3 = vld [vmem:[#allocation90_spill] sm:$0xff]  ;;  %v5827_v29 = vld [vmem:[#allocation91_spill] sm:$0xff]  ;;  %v5828_v52 = vld [vmem:[#allocation92_spill] sm:$0xff] }
 0x279   : > { %v4652_v24 = vadd.f32 %v1021_v54, %v4447_v10  ;;  %v1285_v25 = vmul.f32 %v4610_v31, %v5822_v36  ;;  %v1284_v51 = vmul.f32 %v4610_v31, %v5823_v21  ;;  %v4658_v19 = vpop.permute.xlu1 %2141  ;;  %v4660_v56 = vpop.permute.xlu0 %2136  ;;  %v1287_v28 = vmul.f32 %v4610_v31, %v5826_v3  ;;  %v5829_v48 = vld [vmem:[#allocation93_spill] sm:$0xff]  ;;  %v5830_v36 = vld [vmem:[#allocation94_spill] sm:$0xff] }
 0x27a   : > { %5824 = vst [vmem:[#allocation22_spill] sm:$0xff] %v4658_v19  ;;  %5825 = vst [vmem:[#allocation13_spill] sm:$0xff] %v4660_v56  ;;  %v1286_v0 = vmul.f32 %v4610_v31, %v5827_v29  ;;  %v1289_v10 = vmul.f32 %v4610_v31, %v5828_v52  ;;  %2683 = vperm.xlu1 %3080, %v2559_v60   ;;  %2678 = vperm.xlu0 %3079, %v2558_v17   ;;  %v5831_v56 = vld [vmem:[#allocation95_spill] sm:$0xff]  ;;  %v2561_v19 = vld [vmem:[%s3124_s17 + $0xde] sm:$0xff] }
 0x27b   : > { %v4669_v54 = vadd.f32 %v1020_v37, %v4450_v43  ;;  %v1288_v40 = vmul.f32 %v4610_v31, %v5829_v48  ;;  %v1291_v21 = vmul.f32 %v4610_v31, %v5830_v36  ;;  %v1290_v3 = vmul.f32 %v4610_v31, %v5831_v56  ;;  %v2560_v63 = vld [vmem:[%s3124_s17 + $0xd6] sm:$0xff]  ;;  %v5834_v36 = vld [vmem:[#allocation98_spill] sm:$0xff] }
 0x27c   : > { %v4680_v29 = vadd.f32 %v1283_v16, %v4453_v22  ;;  %v4683_v60 = vadd.f32 %v1282_v34, %v4460_v26  ;;  %v5832_v17 = vld [vmem:[#allocation96_spill] sm:$0xff]  ;;  %v5833_v37 = vld [vmem:[#allocation97_spill] sm:$0xff]  ;;  %v4690_v48 = vadd.f32 %v1285_v25, %v4463_v44  ;;  %v4693_v56 = vadd.f32 %v1284_v51, %v4470_v62  ;;  %v5835_v16 = vld [vmem:[#allocation99_spill] sm:$0xff] }
 0x27d   : > { %v1293_v43 = vmul.f32 %v4610_v31, %v5832_v17  ;;  %v1292_v52 = vmul.f32 %v4610_v31, %v5833_v37  ;;  %v1295_v22 = vmul.f32 %v4610_v31, %v5834_v36  ;;  %v1294_v26 = vmul.f32 %v4610_v31, %v5835_v16  ;;  %v4699_v34 = vpop.permute.xlu1 %2151  ;;  %v4701_v17 = vpop.permute.xlu0 %2146  ;;  %v5838_v16 = vld [vmem:[#allocation100_spill] sm:$0xff] }
 0x27e   : > { %5836 = vst [vmem:[#allocation23_spill] sm:$0xff] %v4699_v34  ;;  %5837 = vst [vmem:[#allocation24_spill] sm:$0xff] %v4701_v17  ;;  %v4704_v37 = vadd.f32 %v1287_v28, %v4473_v9  ;;  %v4707_v44 = vadd.f32 %v1286_v0, %v4490_v7  ;;  %v4710_v25 = vadd.f32 %v1289_v10, %v4501_v13  ;;  %2693 = vperm.xlu1 %3080, %v2561_v19   ;;  %v2563_v28 = vld [vmem:[%s3124_s17 + $0xee] sm:$0xff]  ;;  %v2562_v7 = vld [vmem:[%s3124_s17 + $0xe6] sm:$0xff] }
 0x27f   : > { %2688 = vperm.xlu0 %3079, %v2560_v63   ;;  %v4713_v62 = vadd.f32 %v1288_v40, %v4504_v42  ;;  %v4716_v51 = vadd.f32 %v1291_v21, %v4511_v35  ;;  %v4719_v36 = vadd.f32 %v1290_v3, %v4514_v20  ;;  %v1297_v9 = vmul.f32 %v4610_v31, %v5838_v16  ;;  %v5839_v63 = vld [vmem:[#allocation101_spill] sm:$0xff]  ;;  %v5840_v19 = vld [vmem:[#allocation102_spill] sm:$0xff]  ;;  %v5841_v40 = vld [vmem:[#allocation103_spill] sm:$0xff] }
 0x280   : > { %v4726_v0 = vadd.f32 %v1293_v43, %v4525_v8  ;;  %v4729_v13 = vadd.f32 %v1292_v52, %v4528_v39  ;;  %v1296_v42 = vmul.f32 %v4610_v31, %v5839_v63  ;;  %v1299_v35 = vmul.f32 %v4610_v31, %v5840_v19  ;;  %v5842_v21 = vld [vmem:[#allocation104_spill] sm:$0xff]  ;;  %v5845_v52 = vld [vmem:[#allocation105_spill] sm:$0xff]  ;;  %v5846_v63 = vld [vmem:[#allocation106_spill] sm:$0xff] }
 0x281   : > { %v4736_v20 = vadd.f32 %v1295_v22, %v4531_v45  ;;  %v4739_v10 = vadd.f32 %v1294_v26, %v4534_v1  ;;  %v1298_v8 = vmul.f32 %v4610_v31, %v5841_v40  ;;  %v1301_v39 = vmul.f32 %v4610_v31, %v5842_v21  ;;  %v4745_v3 = vpop.permute.xlu1 %2161  ;;  %v4747_v43 = vpop.permute.xlu0 %2156  ;;  %v5847_v22 = vld [vmem:[#allocation107_spill] sm:$0xff]  ;;  %v5848_v19 = vld [vmem:[#allocation108_spill] sm:$0xff]  ;;  %v5849_v21 = vld [vmem:[#allocation109_spill] sm:$0xff] }
 0x282   : > { %5843 = vst [vmem:[#allocation25_spill] sm:$0xff] %v4745_v3  ;;  %5844 = vst [vmem:[#allocation26_spill] sm:$0xff] %v4747_v43  ;;  %v1300_v16 = vmul.f32 %v4610_v31, %v5845_v52  ;;  %v1303_v45 = vmul.f32 %v4610_v31, %v5846_v63  ;;  %v1302_v1 = vmul.f32 %v4610_v31, %v5847_v22  ;;  %2703 = vperm.xlu1 %3080, %v2563_v28   ;;  %v5850_v3 = vld [vmem:[#allocation110_spill] sm:$0xff]  ;;  %v2564_v34 = vld [vmem:[%s3124_s17 + $0xf6] sm:$0xff] }
 0x283   : > { %2698 = vperm.xlu0 %3079, %v2562_v7   ;;  %v4756_v26 = vadd.f32 %v1297_v9, %v4537_v58  ;;  %v1305_v40 = vmul.f32 %v4610_v31, %v5848_v19  ;;  %v1304_v43 = vmul.f32 %v4610_v31, %v5849_v21  ;;  %v1307_v52 = vmul.f32 %v4610_v31, %v5850_v3  ;;  %v2565_v17 = vld [vmem:[%s3124_s17 + $0xfe] sm:$0xff]  ;;  %v5851_v7 = vld [vmem:[#allocation111_spill] sm:$0xff]  ;;  %v5852_v9 = vld [vmem:[#allocation112_spill] sm:$0xff] }
 0x284   : > { %v4767_v63 = vadd.f32 %v1296_v42, %v4540_v27  ;;  %v4770_v28 = vadd.f32 %v1299_v35, %v4547_v53  ;;  %v1306_v58 = vmul.f32 %v4610_v31, %v5851_v7  ;;  %v1309_v22 = vmul.f32 %v4610_v31, %v5852_v9  ;;  %v5853_v21 = vld [vmem:[#allocation113_spill] sm:$0xff]  ;;  %v5854_v42 = vld [vmem:[#allocation114_spill] sm:$0xff] }
 0x285   : > { %v4777_v19 = vadd.f32 %v1298_v8, %v4550_v12  ;;  %v4780_v3 = vadd.f32 %v1301_v39, %v4557_v47  ;;  %v1308_v27 = vmul.f32 %v4610_v31, %v5853_v21  ;;  %v1311_v53 = vmul.f32 %v4610_v31, %v5854_v42  ;;  %v4786_v35 = vpop.permute.xlu1 %2287  ;;  %v4788_v7 = vpop.permute.xlu0 %2282  ;;  %v5857_v42 = vld [vmem:[#allocation115_spill] sm:$0xff] }
 0x286   : > { %5855 = vst [vmem:[#allocation27_spill] sm:$0xff] %v4786_v35  ;;  %5856 = vst [vmem:[#allocation28_spill] sm:$0xff] %v4788_v7  ;;  %v4791_v9 = vadd.f32 %v1300_v16, %v4560_v11  ;;  %v4794_v12 = vadd.f32 %v1303_v45, %v4577_v55  ;;  %v4797_v47 = vadd.f32 %v1302_v1, %v4588_v38  ;;  %2713 = vperm.xlu1 %3080, %v2565_v17   ;;  %v4813_v55 = vld [vmem:[%s5517_s1 + $0x4] ss:$0 sm:$0xff]  ;;  %v2567_v38 = vld [vmem:[%s3124_s17 + $0x10e] sm:$0xff] }
 0x287   : > { %2708 = vperm.xlu0 %3079, %v2564_v34   ;;  %v4800_v8 = vadd.f32 %v1305_v40, %v4591_v30  ;;  %v4803_v39 = vadd.f32 %v1304_v43, %v4598_v15  ;;  %v4806_v21 = vadd.f32 %v1307_v52, %v4601_v14  ;;  %v1310_v11 = vmul.f32 %v4610_v31, %v5857_v42  ;;  %v2566_v17 = vld [vmem:[%s3124_s17 + $0x106] sm:$0xff]  ;;  %v5858_v15 = vld [vmem:[#allocation116_spill] sm:$0xff]  ;;  %v5859_v43 = vld [vmem:[#allocation117_spill] sm:$0xff] }
 0x288   : > { %v4818_v34 = vadd.f32 %v1306_v58, %v4617_v32  ;;  %v4821_v30 = vadd.f32 %v1309_v22, %v4620_v59  ;;  %v1313_v14 = vmul.f32 %v4610_v31, %v5858_v15  ;;  %v1312_v16 = vmul.f32 %v4610_v31, %v5859_v43  ;;  %v5861_v40 = vld [vmem:[#allocation118_spill] sm:$0xff]  ;;  %v5862_v52 = vld [vmem:[#allocation119_spill] sm:$0xff]  ;;  %v5865_v42 = vld [vmem:[#allocation120_spill] sm:$0xff] }
 0x289   : > { %v4828_v45 = vadd.f32 %v1308_v27, %v4623_v18  ;;  %v4831_v1 = vadd.f32 %v1311_v53, %v4626_v2  ;;  %v1315_v32 = vmul.f32 %v4610_v31, %v5861_v40  ;;  %v1314_v59 = vmul.f32 %v4610_v31, %v5862_v52  ;;  %v4837_v58 = vpop.permute.xlu1 %2297  ;;  %v4839_v22 = vpop.permute.xlu0 %2292  ;;  %v5866_v43 = vld [vmem:[#allocation121_spill] sm:$0xff]  ;;  %v5867_v27 = vld [vmem:[#allocation122_spill] sm:$0xff]  ;;  %v5868_v40 = vld [vmem:[#allocation123_spill] sm:$0xff] }
 0x28a   : > { %5863 = vst [vmem:[#allocation30_spill] sm:$0xff] %v4837_v58  ;;  %5864 = vst [vmem:[#allocation31_spill] sm:$0xff] %v4839_v22  ;;  %v1317_v15 = vmul.f32 %v4610_v31, %v5865_v42  ;;  %v1316_v18 = vmul.f32 %v4610_v31, %v5866_v43  ;;  %v1579_v2 = vmul.f32 %v4813_v55, %v5867_v27  ;;  %2723 = vperm.xlu1 %3080, %v2567_v38   ;;  %v5869_v58 = vld [vmem:[#allocation124_spill] sm:$0xff]  ;;  %v5870_v7 = vld [vmem:[#allocation125_spill] sm:$0xff] }
 0x28b   : > { %5860 = vst [vmem:[#allocation29_spill] sm:$0xff] %v4831_v1  ;;  %2718 = vperm.xlu0 %3079, %v2566_v17   ;;  %v4848_v53 = vadd.f32 %v1310_v11, %v4629_v46  ;;  %v1578_v52 = vmul.f32 %v4813_v55, %v5868_v40  ;;  %v1581_v22 = vmul.f32 %v4813_v55, %v5869_v58  ;;  %v2569_v35 = vld [vmem:[%s3124_s17 + $0x11e] sm:$0xff]  ;;  %v2568_v1 = vld [vmem:[%s3124_s17 + $0x116] sm:$0xff]  ;;  %v5872_v11 = vld [vmem:[#allocation127_spill] sm:$0xff] }
 0x28c   : > { %v1580_v42 = vmul.f32 %v4813_v55, %v5870_v7  ;;  %v4859_v31 = vadd.f32 %v1313_v14, %v4632_v41  ;;  %v4862_v38 = vadd.f32 %v1312_v16, %v4639_v5  ;;  %v5871_v17 = vld [vmem:[#allocation126_spill] sm:$0xff]  ;;  %v1582_v43 = vmul.f32 %v4813_v55, %v5872_v11  ;;  %v5873_v27 = vld [vmem:[#allocation128_spill] sm:$0xff]  ;;  %v5874_v14 = vld [vmem:[#allocation129_spill] sm:$0xff] }
 0x28d   : > { %v1583_v46 = vmul.f32 %v4813_v55, %v5871_v17  ;;  %v4869_v58 = vadd.f32 %v1315_v32, %v4642_v6  ;;  %v4872_v7 = vadd.f32 %v1314_v59, %v4649_v4  ;;  %v1585_v41 = vmul.f32 %v4813_v55, %v5873_v27  ;;  %v4878_v16 = vpop.permute.xlu1 %2307  ;;  %v4880_v40 = vpop.permute.xlu0 %2302  ;;  %v5876_v27 = vld [vmem:[#allocation130_spill] sm:$0xff] }
 0x28e   : > { %v1584_v5 = vmul.f32 %v4813_v55, %v5874_v14  ;;  %5875 = vst [vmem:[#allocation32_spill] sm:$0xff] %v4880_v40  ;;  %v4883_v17 = vadd.f32 %v1317_v15, %v4652_v24  ;;  %v4886_v6 = vadd.f32 %v1316_v18, %v4669_v54  ;;  %v4889_v32 = vadd.f32 %v1579_v2, %v4680_v29  ;;  %v2571_v15 = vld [vmem:[%s3124_s17 + $0x12e] sm:$0xff]  ;;  %v2570_v54 = vld [vmem:[%s3124_s17 + $0x126] sm:$0xff] }
 0x28f   : > { %2733 = vperm.xlu1 %3080, %v2569_v35   ;;  %2728 = vperm.xlu0 %3079, %v2568_v1   ;;  %v4892_v4 = vadd.f32 %v1578_v52, %v4683_v60  ;;  %v4895_v59 = vadd.f32 %v1581_v22, %v4690_v48  ;;  %v4898_v11 = vadd.f32 %v1580_v42, %v4693_v56  ;;  %v5877_v35 = vld [vmem:[#allocation131_spill] sm:$0xff]  ;;  %v5878_v22 = vld [vmem:[#allocation132_spill] sm:$0xff]  ;;  %v4937_v42 = vld [vmem:[%s5517_s1 + $0x5] ss:$0 sm:$0xff] }
 0x290   : > { %v1587_v24 = vmul.f32 %v4813_v55, %v5876_v27  ;;  %v4905_v18 = vadd.f32 %v1583_v46, %v4704_v37  ;;  %v4908_v29 = vadd.f32 %v1582_v43, %v4707_v44  ;;  %v1586_v60 = vmul.f32 %v4813_v55, %v5877_v35  ;;  %v5881_v46 = vld [vmem:[#allocation133_spill] sm:$0xff] }
 0x291   : > { %v1589_v48 = vmul.f32 %v4813_v55, %v3854_v57  ;;  %v4915_v56 = vadd.f32 %v1585_v41, %v4710_v25  ;;  %v4918_v1 = vadd.f32 %v1584_v5, %v4713_v62  ;;  %v1588_v37 = vmul.f32 %v4813_v55, %v5878_v22  ;;  %v4924_v2 = vpop.permute.xlu1 %2317  ;;  %v4926_v52 = vpop.permute.xlu0 %2312  ;;  %v2572_v5 = vld [vmem:[%s3124_s17 + $0x136] sm:$0xff]  ;;  %v4961_v22 = vld [vmem:[%s5517_s1 + $0x6] ss:$0 sm:$0xff] }
 0x292   : > { %v1591_v44 = vmul.f32 %v4813_v55, %v3860_v61  ;;  %5879 = vst [vmem:[#allocation33_spill] sm:$0xff] %v4924_v2  ;;  %5880 = vst [vmem:[#allocation34_spill] sm:$0xff] %v4926_v52  ;;  %v1590_v57 = vmul.f32 %v4813_v55, %v3862_v50  ;;  %v1593_v25 = vmul.f32 %v4813_v55, %v3866_v49  ;;  %v5882_v50 = vld [vmem:[#allocation163_spill] sm:$0xff]  ;;  %v5883_v49 = vld [vmem:[#allocation164_spill] sm:$0xff] }
 0x293   : > { %v1592_v62 = vmul.f32 %v4813_v55, %v3868_v23  ;;  %2743 = vperm.xlu1 %3080, %v2571_v15   ;;  %2738 = vperm.xlu0 %3079, %v2570_v54   ;;  %v4940_v61 = vadd.f32 %v1587_v24, %v4716_v51  ;;  %v1595_v43 = vmul.f32 %v4813_v55, %v5881_v46  ;;  %v2573_v23 = vld [vmem:[%s3124_s17 + $0x13e] sm:$0xff]  ;;  %v5885_v24 = vld [vmem:[#allocation135_spill] sm:$0xff] }
 0x294   : > { %v1885_v41 = vmul.f32 %v4937_v42, %v5882_v50  ;;  %v1884_v14 = vmul.f32 %v4937_v42, %v5883_v49  ;;  %v4951_v27 = vadd.f32 %v1586_v60, %v4719_v36  ;;  %v1625_v15 = vadd.f32 %v1589_v48, %v4726_v0  ;;  %v5884_v54 = vld [vmem:[#allocation134_spill] sm:$0xff]  ;;  %v5887_v60 = vld [vmem:[#allocation3_spill] sm:$0xff] }
 0x295   : > { %v1594_v51 = vmul.f32 %v4813_v55, %v5884_v54  ;;  %v1597_v35 = vmul.f32 %v4813_v55, %v5885_v24  ;;  %v1624_v46 = vadd.f32 %v1588_v37, %v4729_v13  ;;  %v1627_v50 = vadd.f32 %v1591_v44, %v4736_v20  ;;  %v5886_v49 = vld [vmem:[#allocation2_spill] sm:$0xff]  ;;  %v4969_v48 = vpop.permute.xlu1 %2327  ;;  %v4971_v54 = vpop.permute.xlu0 %2322  ;;  %v5890_v20 = vld [vmem:[#allocation136_spill] sm:$0xff] }
 0x296   : > { %v2181_v36 = vmul.f32 %v4961_v22, %v5886_v49  ;;  %v2180_v0 = vmul.f32 %v4961_v22, %v5887_v60  ;;  %5888 = vst [vmem:[#allocation35_spill] sm:$0xff] %v4969_v48  ;;  %5889 = vst [vmem:[#allocation36_spill] sm:$0xff] %v4971_v54  ;;  %v1626_v24 = vadd.f32 %v1590_v57, %v4739_v10  ;;  %v5891_v54 = vld [vmem:[#allocation165_spill] sm:$0xff] }
 0x297   : > { %v1629_v52 = vadd.f32 %v1593_v25, %v4756_v26  ;;  %v1628_v2 = vadd.f32 %v1592_v62, %v4767_v63  ;;  %2753 = vperm.xlu1 %3080, %v2573_v23   ;;  %2748 = vperm.xlu0 %3079, %v2572_v5   ;;  %v1631_v13 = vadd.f32 %v1595_v43, %v4770_v28  ;;  %v5892_v26 = vld [vmem:[#allocation166_spill] sm:$0xff]  ;;  %v5893_v57 = vld [vmem:[#allocation137_spill] sm:$0xff]  ;;  %v5895_v23 = vld [vmem:[#allocation4_spill] sm:$0xff] }
 0x298   : > { %v1596_v37 = vmul.f32 %v4813_v55, %v5890_v20  ;;  %v1921_v44 = vadd.f32 %v1885_v41, %v1625_v15  ;;  %v1920_v49 = vadd.f32 %v1884_v14, %v1624_v46  ;;  %v1630_v60 = vadd.f32 %v1594_v51, %v4777_v19  ;;  %v5894_v28 = vld [vmem:[#allocation138_spill] sm:$0xff]  ;;  %v5896_v15 = vld [vmem:[#allocation5_spill] sm:$0xff]  ;;  %v5898_v20 = vld [vmem:[#allocation167_spill] sm:$0xff] }
 0x299   : > { %v4981_v48 = vadd.f32 %v1597_v35, %v4780_v3  ;;  %v1887_v10 = vmul.f32 %v4937_v42, %v5891_v54  ;;  %v1886_v63 = vmul.f32 %v4937_v42, %v5892_v26  ;;  %v1599_v25 = vmul.f32 %v4813_v55, %v5893_v57  ;;  %v4994_v19 = vld [vmem:[%s5517_s1 + $0x7] ss:$0 sm:$0xff]  ;;  %v2338_v3 = vpop.permute.xlu1 %2337  ;;  %v2333_v14 = vpop.permute.xlu0 %2332 }
 0x29a   : > { %v1598_v62 = vmul.f32 %v4813_v55, %v5894_v28  ;;  %v2217_v43 = vadd.f32 %v2181_v36, %v1921_v44  ;;  %v2216_v41 = vadd.f32 %v2180_v0, %v1920_v49  ;;  %v2183_v5 = vmul.f32 %v4961_v22, %v5895_v23  ;;  %v5897_v0 = vld [vmem:[#allocation139_spill] sm:$0xff]  ;;  %v5899_v49 = vld [vmem:[#allocation168_spill] sm:$0xff] }
 0x29b   : > { %v2182_v51 = vmul.f32 %v4961_v22, %v5896_v15  ;;  %v2477_v35 = vmul.f32 %v4994_v19, %v2338_v3  ;;  %v2476_v46 = vmul.f32 %v4994_v19, %v2333_v14  ;;  %v1632_v36 = vadd.f32 %v1596_v37, %v4791_v9  ;;  %v5900_v37 = vld [vmem:[#allocation6_spill] sm:$0xff] }
 0x29c   : > { %v1601_v54 = vmul.f32 %v4813_v55, %v5897_v0  ;;  %v1889_v44 = vmul.f32 %v4937_v42, %v5898_v20  ;;  %v1888_v26 = vmul.f32 %v4937_v42, %v5899_v49  ;;  %v1923_v57 = vadd.f32 %v1887_v10, %v1627_v50  ;;  %v5901_v0 = vld [vmem:[#allocation7_spill] sm:$0xff] }
 0x29d   : > { %v1922_v28 = vadd.f32 %v1886_v63, %v1626_v24  ;;  %v5009_v23 = vadd.f32 %v2477_v35, %v2217_v43  ;;  %v5011_v15 = vadd.f32 %v2476_v46, %v2216_v41  ;;  %v5014_v3 = vadd.f32 %v1599_v25, %v4794_v12  ;;  %v2348_v40 = vpop.permute.xlu1 %2347  ;;  %v2343_v49 = vpop.permute.xlu0 %2342  ;;  %v5902_v25 = vld [vmem:[#allocation140_spill] sm:$0xff]  ;;  %v5903_v41 = vld [vmem:[#allocation169_spill] sm:$0xff]  ;;  %v5904_v46 = vld [vmem:[#allocation170_spill] sm:$0xff] }
 0x29e   : > { %v5017_v9 = vadd.f32 %v1598_v62, %v4797_v47  ;;  %v2185_v14 = vmul.f32 %v4961_v22, %v5900_v37  ;;  %v2184_v20 = vmul.f32 %v4961_v22, %v5901_v0  ;;  %v2219_v50 = vadd.f32 %v2183_v5, %v1923_v57 }
 0x29f   : > { %v2218_v24 = vadd.f32 %v2182_v51, %v1922_v28  ;;  %v2479_v10 = vmul.f32 %v4994_v19, %v2348_v40  ;;  %v2478_v63 = vmul.f32 %v4994_v19, %v2343_v49  ;;  %v5026_v12 = vadd.f32 %v1601_v54, %v4800_v8  ;;  %v5905_v40 = vld [vmem:[#allocation141_spill] sm:$0xff]  ;;  %v5906_v8 = vld [vmem:[#allocation142_spill] sm:$0xff] }
 0x2a0   : > { %v1600_v47 = vmul.f32 %v4813_v55, %v5902_v25  ;;  %v1925_v62 = vadd.f32 %v1889_v44, %v1629_v52  ;;  %v1924_v43 = vadd.f32 %v1888_v26, %v1628_v2  ;;  %v1891_v35 = vmul.f32 %v4937_v42, %v5903_v41  ;;  %v5907_v44 = vld [vmem:[#allocation8_spill] sm:$0xff]  ;;  %v5908_v49 = vld [vmem:[#allocation9_spill] sm:$0xff] }
 0x2a1   : > { %v1890_v37 = vmul.f32 %v4937_v42, %v5904_v46  ;;  %v5034_v5 = vadd.f32 %v2479_v10, %v2219_v50  ;;  %v5036_v51 = vadd.f32 %v2478_v63, %v2218_v24  ;;  %v1603_v57 = vmul.f32 %v4813_v55, %v5905_v40  ;;  %v2358_v52 = vpop.permute.xlu1 %2357  ;;  %v2353_v2 = vpop.permute.xlu0 %2352  ;;  %v5909_v63 = vld [vmem:[#allocation143_spill] sm:$0xff] }
 0x2a2   : > { %v1602_v54 = vmul.f32 %v4813_v55, %v5906_v8  ;;  %v2221_v28 = vadd.f32 %v2185_v14, %v1925_v62  ;;  %v2220_v0 = vadd.f32 %v2184_v20, %v1924_v43  ;;  %v2187_v26 = vmul.f32 %v4961_v22, %v5907_v44  ;;  %v5910_v46 = vld [vmem:[#allocation171_spill] sm:$0xff]  ;;  %v5911_v20 = vld [vmem:[#allocation172_spill] sm:$0xff] }
 0x2a3   : > { %v2186_v25 = vmul.f32 %v4961_v22, %v5908_v49  ;;  %v2481_v50 = vmul.f32 %v4994_v19, %v2358_v52  ;;  %v2480_v24 = vmul.f32 %v4994_v19, %v2353_v2  ;;  %v1636_v10 = vadd.f32 %v1600_v47, %v4803_v39  ;;  %v5912_v47 = vld [vmem:[#allocation14_spill] sm:$0xff]  ;;  %v5913_v49 = vld [vmem:[#allocation15_spill] sm:$0xff] }
 0x2a4   : > { %v1605_v41 = vmul.f32 %v4813_v55, %v5909_v63  ;;  %v1893_v14 = vmul.f32 %v4937_v42, %v5910_v46  ;;  %v1892_v62 = vmul.f32 %v4937_v42, %v5911_v20  ;;  %v1927_v43 = vadd.f32 %v1891_v35, %v1631_v13 }
 0x2a5   : > { %v1926_v40 = vadd.f32 %v1890_v37, %v1630_v60  ;;  %v5055_v8 = vadd.f32 %v2481_v50, %v2221_v28  ;;  %v5057_v44 = vadd.f32 %v2480_v24, %v2220_v0  ;;  %v5060_v52 = vadd.f32 %v1603_v57, %v4806_v21  ;;  %v2368_v46 = vpop.permute.xlu1 %2367  ;;  %v2363_v20 = vpop.permute.xlu0 %2362  ;;  %v5914_v57 = vld [vmem:[#allocation144_spill] sm:$0xff]  ;;  %v5915_v0 = vld [vmem:[#allocation173_spill] sm:$0xff]  ;;  %v5916_v24 = vld [vmem:[#allocation174_spill] sm:$0xff] }
 0x2a6   : > { %v5063_v39 = vadd.f32 %v1602_v54, %v4818_v34  ;;  %v2189_v2 = vmul.f32 %v4961_v22, %v5912_v47  ;;  %v2188_v63 = vmul.f32 %v4961_v22, %v5913_v49  ;;  %v2223_v13 = vadd.f32 %v2187_v26, %v1927_v43 }
 0x2a7   : > { %v2222_v60 = vadd.f32 %v2186_v25, %v1926_v40  ;;  %v2483_v35 = vmul.f32 %v4994_v19, %v2368_v46  ;;  %v2482_v37 = vmul.f32 %v4994_v19, %v2363_v20  ;;  %v5072_v21 = vadd.f32 %v1605_v41, %v4821_v30  ;;  %v5917_v40 = vld [vmem:[#allocation145_spill] sm:$0xff]  ;;  %v5918_v41 = vld [vmem:[#allocation146_spill] sm:$0xff] }
 0x2a8   : > { %v1604_v34 = vmul.f32 %v4813_v55, %v5914_v57  ;;  %v1929_v54 = vadd.f32 %v1893_v14, %v4981_v48  ;;  %v1928_v28 = vadd.f32 %v1892_v62, %v1632_v36  ;;  %v1895_v50 = vmul.f32 %v4937_v42, %v5915_v0  ;;  %v5919_v62 = vld [vmem:[#allocation16_spill] sm:$0xff]  ;;  %v5921_v0 = vld [vmem:[#allocation175_spill] sm:$0xff] }
 0x2a9   : > { %v1894_v26 = vmul.f32 %v4937_v42, %v5916_v24  ;;  %v5081_v25 = vadd.f32 %v2483_v35, %v2223_v13  ;;  %v5083_v43 = vadd.f32 %v2482_v37, %v2222_v60  ;;  %v1607_v30 = vmul.f32 %v4813_v55, %v5917_v40  ;;  %v2378_v48 = vpop.permute.xlu1 %2377  ;;  %v2373_v36 = vpop.permute.xlu0 %2372  ;;  %v5920_v37 = vld [vmem:[#allocation147_spill] sm:$0xff] }
 0x2aa   : > { %v1606_v47 = vmul.f32 %v4813_v55, %v5918_v41  ;;  %v2225_v49 = vadd.f32 %v2189_v2, %v1929_v54  ;;  %v2224_v46 = vadd.f32 %v2188_v63, %v1928_v28  ;;  %v2191_v14 = vmul.f32 %v4961_v22, %v4433_v33  ;;  %v5922_v63 = vld [vmem:[#allocation176_spill] sm:$0xff]  ;;  %v5923_v41 = vld [vmem:[#allocation29_spill] sm:$0xff] }
 0x2ab   : > { %v2190_v20 = vmul.f32 %v4961_v22, %v5919_v62  ;;  %v2485_v13 = vmul.f32 %v4994_v19, %v2378_v48  ;;  %v2484_v60 = vmul.f32 %v4994_v19, %v2373_v36  ;;  %v1640_v35 = vadd.f32 %v1604_v34, %v4828_v45  ;;  %v5924_v34 = vld [vmem:[#allocation17_spill] sm:$0xff]  ;;  %v5925_v62 = vld [vmem:[#allocation10_spill] sm:$0xff] }
 0x2ac   : > { %v1609_v57 = vmul.f32 %v4813_v55, %v5920_v37  ;;  %v1897_v2 = vmul.f32 %v4937_v42, %v5921_v0  ;;  %v1896_v54 = vmul.f32 %v4937_v42, %v5922_v63  ;;  %v1931_v33 = vadd.f32 %v1895_v50, %v5014_v3 }
 0x2ad   : > { %v1930_v28 = vadd.f32 %v1894_v26, %v5017_v9  ;;  %v5104_v24 = vadd.f32 %v2485_v13, %v2225_v49  ;;  %v5106_v40 = vadd.f32 %v2484_v60, %v2224_v46  ;;  %v5109_v48 = vadd.f32 %v1607_v30, %v5923_v41  ;;  %v2388_v0 = vpop.permute.xlu1 %2387  ;;  %v2383_v3 = vpop.permute.xlu0 %2382  ;;  %v5926_v46 = vld [vmem:[#allocation148_spill] sm:$0xff]  ;;  %v5927_v60 = vld [vmem:[#allocation177_spill] sm:$0xff]  ;;  %v5928_v41 = vld [vmem:[#allocation178_spill] sm:$0xff] }
 0x2ae   : > { %v5112_v45 = vadd.f32 %v1606_v47, %v4848_v53  ;;  %v2193_v36 = vmul.f32 %v4961_v22, %v5924_v34  ;;  %v2192_v37 = vmul.f32 %v4961_v22, %v5925_v62  ;;  %v2227_v50 = vadd.f32 %v2191_v14, %v1931_v33 }
 0x2af   : > { %v2226_v9 = vadd.f32 %v2190_v20, %v1930_v28  ;;  %v2487_v26 = vmul.f32 %v4994_v19, %v2388_v0  ;;  %v2486_v49 = vmul.f32 %v4994_v19, %v2383_v3  ;;  %v5121_v30 = vadd.f32 %v1609_v57, %v4859_v31  ;;  %v5929_v28 = vld [vmem:[#allocation149_spill] sm:$0xff]  ;;  %v5930_v57 = vld [vmem:[#allocation150_spill] sm:$0xff]  ;;  %v5932_v3 = vld [vmem:[#allocation19_spill] sm:$0xff] }
 0x2b0   : > { %v1608_v53 = vmul.f32 %v4813_v55, %v5926_v46  ;;  %v1933_v47 = vadd.f32 %v1897_v2, %v5026_v12  ;;  %v1932_v13 = vadd.f32 %v1896_v54, %v1636_v10  ;;  %v1899_v63 = vmul.f32 %v4937_v42, %v5927_v60  ;;  %v5931_v2 = vld [vmem:[#allocation18_spill] sm:$0xff] }
 0x2b1   : > { %v1898_v14 = vmul.f32 %v4937_v42, %v5928_v41  ;;  %v5130_v20 = vadd.f32 %v2487_v26, %v2227_v50  ;;  %v5132_v33 = vadd.f32 %v2486_v49, %v2226_v9  ;;  %v1611_v31 = vmul.f32 %v4813_v55, %v5929_v28  ;;  %v2398_v12 = vpop.permute.xlu1 %2397  ;;  %v2393_v10 = vpop.permute.xlu0 %2392  ;;  %v5933_v49 = vld [vmem:[#allocation151_spill] sm:$0xff] }
 0x2b2   : > { %v1610_v34 = vmul.f32 %v4813_v55, %v5930_v57  ;;  %v2229_v62 = vadd.f32 %v2193_v36, %v1933_v47  ;;  %v2228_v0 = vadd.f32 %v2192_v37, %v1932_v13  ;;  %v2195_v54 = vmul.f32 %v4961_v22, %v5931_v2  ;;  %v5934_v41 = vld [vmem:[#allocation179_spill] sm:$0xff]  ;;  %v5935_v37 = vld [vmem:[#allocation180_spill] sm:$0xff] }
 0x2b3   : > { %v2194_v46 = vmul.f32 %v4961_v22, %v5932_v3  ;;  %v2489_v50 = vmul.f32 %v4994_v19, %v2398_v12  ;;  %v2488_v9 = vmul.f32 %v4994_v19, %v2393_v10  ;;  %v1644_v26 = vadd.f32 %v1608_v53, %v4862_v38  ;;  %v5936_v53 = vld [vmem:[#allocation20_spill] sm:$0xff]  ;;  %v5937_v3 = vld [vmem:[#allocation11_spill] sm:$0xff] }
 0x2b4   : > { %v1613_v60 = vmul.f32 %v4813_v55, %v5933_v49  ;;  %v1901_v36 = vmul.f32 %v4937_v42, %v5934_v41  ;;  %v1900_v47 = vmul.f32 %v4937_v42, %v5935_v37  ;;  %v1935_v13 = vadd.f32 %v1899_v63, %v5060_v52  ;;  %v5940_v37 = vld [vmem:[#allocation182_spill] sm:$0xff] }
 0x2b5   : > { %v1934_v28 = vadd.f32 %v1898_v14, %v5063_v39  ;;  %v5153_v57 = vadd.f32 %v2489_v50, %v2229_v62  ;;  %v5155_v12 = vadd.f32 %v2488_v9, %v2228_v0  ;;  %v5158_v10 = vadd.f32 %v1611_v31, %v4869_v58  ;;  %v2408_v41 = vpop.permute.xlu1 %2407  ;;  %v2403_v52 = vpop.permute.xlu0 %2402  ;;  %v5938_v31 = vld [vmem:[#allocation152_spill] sm:$0xff]  ;;  %v5939_v50 = vld [vmem:[#allocation181_spill] sm:$0xff] }
 0x2b6   : > { %v5161_v38 = vadd.f32 %v1610_v34, %v4872_v7  ;;  %v2197_v2 = vmul.f32 %v4961_v22, %v5936_v53  ;;  %v2196_v49 = vmul.f32 %v4961_v22, %v5937_v3  ;;  %v2231_v63 = vadd.f32 %v2195_v54, %v1935_v13 }
 0x2b7   : > { %v2230_v39 = vadd.f32 %v2194_v46, %v1934_v28  ;;  %v2491_v14 = vmul.f32 %v4994_v19, %v2408_v41  ;;  %v2490_v62 = vmul.f32 %v4994_v19, %v2403_v52  ;;  %v5170_v58 = vadd.f32 %v1613_v60, %v4883_v17  ;;  %v5941_v28 = vld [vmem:[#allocation153_spill] sm:$0xff]  ;;  %v5942_v60 = vld [vmem:[#allocation154_spill] sm:$0xff] }
 0x2b8   : > { %v1612_v7 = vmul.f32 %v4813_v55, %v5938_v31  ;;  %v1937_v34 = vadd.f32 %v1901_v36, %v5072_v21  ;;  %v1936_v0 = vadd.f32 %v1900_v47, %v1640_v35  ;;  %v1903_v9 = vmul.f32 %v4937_v42, %v5939_v50  ;;  %v5943_v36 = vld [vmem:[#allocation12_spill] sm:$0xff]  ;;  %v5944_v41 = vld [vmem:[#allocation21_spill] sm:$0xff]  ;;  %v5946_v50 = vld [vmem:[#allocation183_spill] sm:$0xff] }
 0x2b9   : > { %v1902_v54 = vmul.f32 %v4937_v42, %v5940_v37  ;;  %v5179_v46 = vadd.f32 %v2491_v14, %v2231_v63  ;;  %v5181_v13 = vadd.f32 %v2490_v62, %v2230_v39  ;;  %v1875_v17 = vmul.f32 %v4937_v42, %v5941_v28  ;;  %v2418_v21 = vpop.permute.xlu1 %2417  ;;  %v2413_v35 = vpop.permute.xlu0 %2412  ;;  %v5945_v62 = vld [vmem:[#allocation155_spill] sm:$0xff] }
 0x2ba   : > { %v1874_v53 = vmul.f32 %v4937_v42, %v5942_v60  ;;  %v2233_v55 = vadd.f32 %v2197_v2, %v1937_v34  ;;  %v2232_v3 = vadd.f32 %v2196_v49, %v1936_v0  ;;  %v2199_v47 = vmul.f32 %v4961_v22, %v5943_v36  ;;  %v5947_v49 = vld [vmem:[#allocation184_spill] sm:$0xff]  ;;  %v5949_v36 = vld [vmem:[#allocation13_spill] sm:$0xff] }
 0x2bb   : > { %v2198_v52 = vmul.f32 %v4961_v22, %v5944_v41  ;;  %v2493_v63 = vmul.f32 %v4994_v19, %v2418_v21  ;;  %v2492_v39 = vmul.f32 %v4994_v19, %v2413_v35  ;;  %v1648_v14 = vadd.f32 %v1612_v7, %v4886_v6  ;;  %v5948_v7 = vld [vmem:[#allocation22_spill] sm:$0xff] }
 0x2bc   : > { %v1877_v31 = vmul.f32 %v4937_v42, %v5945_v62  ;;  %v1905_v2 = vmul.f32 %v4937_v42, %v5946_v50  ;;  %v1904_v34 = vmul.f32 %v4937_v42, %v5947_v49  ;;  %v1939_v0 = vadd.f32 %v1903_v9, %v5109_v48  ;;  %v5952_v50 = vld [vmem:[#allocation186_spill] sm:$0xff] }
 0x2bd   : > { %v1938_v37 = vadd.f32 %v1902_v54, %v5112_v45  ;;  %v5202_v28 = vadd.f32 %v2493_v63, %v2233_v55  ;;  %v5204_v60 = vadd.f32 %v2492_v39, %v2232_v3  ;;  %v5207_v21 = vadd.f32 %v1875_v17, %v4889_v32  ;;  %v2428_v62 = vpop.permute.xlu1 %2427  ;;  %v2423_v48 = vpop.permute.xlu0 %2422  ;;  %v5950_v17 = vld [vmem:[#allocation156_spill] sm:$0xff]  ;;  %v5951_v63 = vld [vmem:[#allocation185_spill] sm:$0xff] }
 0x2be   : > { %v5210_v6 = vadd.f32 %v1874_v53, %v4892_v4  ;;  %v2201_v35 = vmul.f32 %v4961_v22, %v5948_v7  ;;  %v2200_v41 = vmul.f32 %v4961_v22, %v5949_v36  ;;  %v2235_v9 = vadd.f32 %v2199_v47, %v1939_v0  ;;  %v5953_v0 = vld [vmem:[#allocation157_spill] sm:$0xff] }
 0x2bf   : > { %v2234_v45 = vadd.f32 %v2198_v52, %v1938_v37  ;;  %v2495_v54 = vmul.f32 %v4994_v19, %v2428_v62  ;;  %v2494_v55 = vmul.f32 %v4994_v19, %v2423_v48  ;;  %v5219_v32 = vadd.f32 %v1877_v31, %v4895_v59  ;;  %v5954_v31 = vld [vmem:[#allocation158_spill] sm:$0xff]  ;;  %v5956_v62 = vld [vmem:[#allocation24_spill] sm:$0xff] }
 0x2c0   : > { %v1876_v4 = vmul.f32 %v4937_v42, %v5950_v17  ;;  %v1941_v53 = vadd.f32 %v1905_v2, %v5121_v30  ;;  %v1940_v3 = vadd.f32 %v1904_v34, %v1644_v26  ;;  %v1907_v39 = vmul.f32 %v4937_v42, %v5951_v63  ;;  %v5955_v2 = vld [vmem:[#allocation23_spill] sm:$0xff] }
 0x2c1   : > { %v1906_v47 = vmul.f32 %v4937_v42, %v5952_v50  ;;  %v5228_v52 = vadd.f32 %v2495_v54, %v2235_v9  ;;  %v5230_v49 = vadd.f32 %v2494_v55, %v2234_v45  ;;  %v1879_v59 = vmul.f32 %v4937_v42, %v5953_v0  ;;  %v2438_v30 = vpop.permute.xlu1 %2437  ;;  %v2433_v26 = vpop.permute.xlu0 %2432  ;;  %v5957_v55 = vld [vmem:[#allocation159_spill] sm:$0xff] }
 0x2c2   : > { %v1878_v37 = vmul.f32 %v4937_v42, %v5954_v31  ;;  %v2237_v7 = vadd.f32 %v2201_v35, %v1941_v53  ;;  %v2236_v36 = vadd.f32 %v2200_v41, %v1940_v3  ;;  %v2203_v34 = vmul.f32 %v4961_v22, %v5955_v2  ;;  %v5958_v63 = vld [vmem:[#allocation187_spill] sm:$0xff]  ;;  %v5959_v41 = vld [vmem:[#allocation188_spill] sm:$0xff]  ;;  %v5961_v2 = vld [vmem:[#allocation26_spill] sm:$0xff] }
 0x2c3   : > { %v2202_v48 = vmul.f32 %v4961_v22, %v5956_v62  ;;  %v2497_v9 = vmul.f32 %v4994_v19, %v2438_v30  ;;  %v2496_v45 = vmul.f32 %v4994_v19, %v2433_v26  ;;  %v1912_v54 = vadd.f32 %v1876_v4, %v4898_v11  ;;  %v5960_v4 = vld [vmem:[#allocation25_spill] sm:$0xff] }
 0x2c4   : > { %v1881_v17 = vmul.f32 %v4937_v42, %v5957_v55  ;;  %v1909_v35 = vmul.f32 %v4937_v42, %v5958_v63  ;;  %v1908_v53 = vmul.f32 %v4937_v42, %v5959_v41  ;;  %v1943_v3 = vadd.f32 %v1907_v39, %v5158_v10 }
 0x2c5   : > { %v1942_v50 = vadd.f32 %v1906_v47, %v5161_v38  ;;  %v5251_v0 = vadd.f32 %v2497_v9, %v2237_v7  ;;  %v5253_v31 = vadd.f32 %v2496_v45, %v2236_v36  ;;  %v1915_v30 = vadd.f32 %v1879_v59, %v4905_v18  ;;  %v2448_v55 = vpop.permute.xlu1 %2447  ;;  %v2443_v63 = vpop.permute.xlu0 %2442  ;;  %v5962_v18 = vld [vmem:[#allocation189_spill] sm:$0xff]  ;;  %v5963_v59 = vld [vmem:[#allocation190_spill] sm:$0xff]  ;;  %v5964_v9 = vld [vmem:[#allocation160_spill] sm:$0xff] }
 0x2c6   : > { %v1914_v11 = vadd.f32 %v1878_v37, %v4908_v29  ;;  %v2205_v26 = vmul.f32 %v4961_v22, %v5960_v4  ;;  %v2204_v62 = vmul.f32 %v4961_v22, %v5961_v2  ;;  %v2239_v41 = vadd.f32 %v2203_v34, %v1943_v3  ;;  %v5966_v3 = vld [vmem:[#allocation161_spill] sm:$0xff] }
 0x2c7   : > { %v2238_v10 = vadd.f32 %v2202_v48, %v1942_v50  ;;  %v2499_v38 = vmul.f32 %v4994_v19, %v2448_v55  ;;  %v2498_v39 = vmul.f32 %v4994_v19, %v2443_v63  ;;  %v1945_v47 = vadd.f32 %v1909_v35, %v5170_v58  ;;  %v5967_v58 = vld [vmem:[#allocation162_spill] sm:$0xff]  ;;  %v5968_v55 = vld [vmem:[#allocation27_spill] sm:$0xff] }
 0x2c8   : > { %v1944_v7 = vadd.f32 %v1908_v53, %v1648_v14  ;;  %v2171_v29 = vmul.f32 %v4961_v22, %v5962_v18  ;;  %v2170_v37 = vmul.f32 %v4961_v22, %v5963_v59  ;;  %v1917_v36 = vadd.f32 %v1881_v17, %v4915_v56  ;;  %v5969_v17 = vld [vmem:[#allocation28_spill] sm:$0xff]  ;;  %v5970_v18 = vld [vmem:[#allocation191_spill] sm:$0xff] }
 0x2c9   : > { %v1880_v45 = vmul.f32 %v4937_v42, %v5964_v9  ;;  %v5271_v34 = vadd.f32 %v2499_v38, %v2239_v41  ;;  %v5273_v48 = vadd.f32 %v2498_v39, %v2238_v10  ;;  %v1883_v50 = vmul.f32 %v4937_v42, %v5966_v3  ;;  %v2458_v4 = vpop.permute.xlu1 %2457  ;;  %v2453_v2 = vpop.permute.xlu0 %2452  ;;  %v5973_v9 = vld [vmem:[#allocation194_spill] sm:$0xff] }
 0x2ca   : > { %v1882_v14 = vmul.f32 %v4937_v42, %v5967_v58  ;;  %v2241_v35 = vadd.f32 %v2205_v26, %v1945_v47  ;;  %v2240_v53 = vadd.f32 %v2204_v62, %v1944_v7  ;;  %v2467_v56 = vmul.f32 %v4994_v19, %v5968_v55  ;;  %v5971_v26 = vld [vmem:[#allocation192_spill] sm:$0xff]  ;;  %v5294_v47 = vld [vmem:[%s5517_s1 + $0x8] ss:$0 sm:$0xff]  ;;  %v5972_v7 = vld [vmem:[#allocation193_spill] sm:$0xff] }
 0x2cb   : > { %5965 = vst [vmem:[#allocation37_spill] sm:$0xff] %v5273_v48  ;;  %v2466_v63 = vmul.f32 %v4994_v19, %v5969_v17  ;;  %v2501_v41 = vmul.f32 %v4994_v19, %v2458_v4  ;;  %v2500_v10 = vmul.f32 %v4994_v19, %v2453_v2  ;;  %v2207_v38 = vadd.f32 %v2171_v29, %v5207_v21  ;;  %v5975_v4 = vld [vmem:[#allocation30_spill] sm:$0xff]  ;;  %v5976_v55 = vld [vmem:[#allocation31_spill] sm:$0xff] }
 0x2cc   : > { %v2206_v39 = vadd.f32 %v2170_v37, %v5210_v6  ;;  %v2173_v42 = vmul.f32 %v4961_v22, %v5970_v18  ;;  %v2172_v62 = vmul.f32 %v4961_v22, %v5971_v26  ;;  %v2175_v59 = vmul.f32 %v4961_v22, %v5972_v7  ;;  %v5974_v37 = vld [vmem:[#allocation195_spill] sm:$0xff] }
 0x2cd   : > { %v2174_v3 = vmul.f32 %v4961_v22, %v5973_v9  ;;  %v5300_v21 = vadd.f32 %v2501_v41, %v2241_v35  ;;  %v5302_v6 = vadd.f32 %v2500_v10, %v2240_v53  ;;  %v1916_v29 = vadd.f32 %v1880_v45, %v4918_v1  ;;  %v2584_v18 = vpop.permute.xlu1 %2583  ;;  %v2579_v26 = vpop.permute.xlu0 %2578  ;;  %v5319_v9 = vld [vmem:[%s5518_s2] ss:$0 sm:$0xff] }
 0x2ce   : > { %v2177_v58 = vmul.f32 %v4961_v22, %v5974_v37  ;;  %v2469_v2 = vmul.f32 %v4994_v19, %v5975_v4  ;;  %v2468_v17 = vmul.f32 %v4994_v19, %v5976_v55  ;;  %v2503_v7 = vadd.f32 %v2467_v56, %v2207_v38  ;;  %v5977_v4 = vld [vmem:[#allocation196_spill] sm:$0xff] }
 0x2cf   : > { %v2502_v48 = vadd.f32 %v2466_v63, %v2206_v39  ;;  %v2763_v35 = vmul.f32 %v5294_v47, %v2584_v18  ;;  %v2762_v53 = vmul.f32 %v5294_v47, %v2579_v26  ;;  %v1919_v1 = vadd.f32 %v1883_v50, %v4940_v61 }
 0x2d0   : > { %v1918_v45 = vadd.f32 %v1882_v14, %v4951_v27  ;;  %v2209_v41 = vadd.f32 %v2173_v42, %v5219_v32  ;;  %v2208_v10 = vadd.f32 %v2172_v62, %v1912_v54  ;;  %v2211_v37 = vadd.f32 %v2175_v59, %v1915_v30  ;;  %v5979_v42 = vld [vmem:[#allocation33_spill] sm:$0xff]  ;;  %v5980_v59 = vld [vmem:[#allocation34_spill] sm:$0xff] }
 0x2d1   : > { %v2210_v56 = vadd.f32 %v2174_v3, %v1914_v11  ;;  %v2799_v63 = vadd.f32 %v2763_v35, %v2503_v7  ;;  %v2798_v38 = vadd.f32 %v2762_v53, %v2502_v48  ;;  %v2213_v39 = vadd.f32 %v2177_v58, %v1917_v36  ;;  %v2594_v27 = vpop.permute.xlu1 %2593  ;;  %v2589_v50 = vpop.permute.xlu0 %2588  ;;  %v5978_v36 = vld [vmem:[#allocation32_spill] sm:$0xff]  ;;  %v5981_v35 = vld [vmem:[#allocation197_spill] sm:$0xff] }
 0x2d2   : > { %v2176_v55 = vmul.f32 %v4961_v22, %v5977_v4  ;;  %v2505_v18 = vadd.f32 %v2469_v2, %v2209_v41  ;;  %v2504_v61 = vadd.f32 %v2468_v17, %v2208_v10  ;;  %v2765_v14 = vmul.f32 %v5294_v47, %v2594_v27  ;;  %v5982_v41 = vld [vmem:[#allocation198_spill] sm:$0xff] }
 0x2d3   : > { %v2842_v32 = vadd.f32 %v5319_v9, %v2799_v63  ;;  %v2841_v54 = vadd.f32 %v5319_v9, %v2798_v38  ;;  %v2764_v30 = vmul.f32 %v5294_v47, %v2589_v50  ;;  %v2471_v11 = vmul.f32 %v4994_v19, %v4878_v16 }
 0x2d4   : > { %v2470_v48 = vmul.f32 %v4994_v19, %v5978_v36  ;;  %v2473_v62 = vmul.f32 %v4994_v19, %v5979_v42  ;;  %v2472_v3 = vmul.f32 %v4994_v19, %v5980_v59  ;;  %v2801_v17 = vadd.f32 %v2765_v14, %v2505_v18  ;;  %v5984_v42 = vld [vmem:[#allocation36_spill] sm:$0xff] }
 0x2d5   : > { %v2878_v58 = vmul.f32 0.01, %v2842_v32  ;;  %v2877_v2 = vmul.f32 0.01, %v2841_v54  ;;  %v2800_v26 = vadd.f32 %v2764_v30, %v2504_v61  ;;  %v2212_v7 = vadd.f32 %v2176_v55, %v1916_v29  ;;  %v2604_v10 = vpop.permute.xlu1 %2603  ;;  %v2599_v63 = vpop.permute.xlu0 %2598 }
 0x2d6   : > { %v2179_v53 = vmul.f32 %v4961_v22, %v5981_v35  ;;  %v2178_v16 = vmul.f32 %v4961_v22, %v5982_v41  ;;  %v2844_v29 = vadd.f32 %v5319_v9, %v2801_v17  ;;  %v2507_v18 = vadd.f32 %v2471_v11, %v2211_v37 }
 0x2d7   : > { %v2914_v38 = vmax.f32 %v2842_v32, %v2878_v58  ;;  %v2913_v4 = vmax.f32 %v2841_v54, %v2877_v2  ;;  %v2843_v55 = vadd.f32 %v5319_v9, %v2800_v26  ;;  %v2506_v61 = vadd.f32 %v2470_v48, %v2210_v56  ;;  %v5983_v54 = vld [vmem:[#allocation35_spill] sm:$0xff] }
 0x2d8   : > { %v2767_v22 = vmul.f32 %v5294_v47, %v2604_v10  ;;  %v2766_v27 = vmul.f32 %v5294_v47, %v2599_v63  ;;  %v2509_v50 = vadd.f32 %v2473_v62, %v2213_v39  ;;  %v2508_v14 = vadd.f32 %v2472_v3, %v2212_v7 }
 0x2d9   : > { %2951 = vst.msk [vmem:[%s5343_s15 + $0x8] sm:$0xff] %vm2949_vm0, %v2914_v38  ;;  %2950 = vst.msk [vmem:[%s5343_s15] sm:$0xff] %vm2949_vm0, %v2913_v4  ;;  %v2880_v30 = vmul.f32 0.01, %v2844_v29  ;;  %v2879_v32 = vmul.f32 0.01, %v2843_v55  ;;  %v2475_v36 = vmul.f32 %v4994_v19, %v5983_v54  ;;  %v2474_v37 = vmul.f32 %v4994_v19, %v5984_v42  ;;  %v2614_v48 = vpop.permute.xlu1 %2613  ;;  %v2609_v59 = vpop.permute.xlu0 %2608 }
 0x2da   : > { %v2803_v56 = vadd.f32 %v2767_v22, %v2507_v18  ;;  %v2802_v11 = vadd.f32 %v2766_v27, %v2506_v61  ;;  %v2769_v3 = vmul.f32 %v5294_v47, %v2614_v48  ;;  %v2768_v58 = vmul.f32 %v5294_v47, %v2609_v59 }
 0x2db   : > { %v2916_v39 = vmax.f32 %v2844_v29, %v2880_v30  ;;  %v2915_v62 = vmax.f32 %v2843_v55, %v2879_v32  ;;  %v2215_v2 = vadd.f32 %v2179_v53, %v1919_v1  ;;  %v2214_v17 = vadd.f32 %v2178_v16, %v1918_v45 }
 0x2dc   : > { %v2846_v26 = vadd.f32 %v5319_v9, %v2803_v56  ;;  %v2845_v7 = vadd.f32 %v5319_v9, %v2802_v11  ;;  %v2805_v19 = vadd.f32 %v2769_v3, %v2509_v50  ;;  %v2804_v35 = vadd.f32 %v2768_v58, %v2508_v14 }
 0x2dd   : > { %2953 = vst.msk [vmem:[%s5343_s15 + $0x18] sm:$0xff] %vm2949_vm0, %v2916_v39  ;;  %2952 = vst.msk [vmem:[%s5343_s15 + $0x10] sm:$0xff] %vm2949_vm0, %v2915_v62  ;;  %v2511_v41 = vadd.f32 %v2475_v36, %v2215_v2  ;;  %v2510_v10 = vadd.f32 %v2474_v37, %v2214_v17  ;;  %v2624_v4 = vpop.permute.xlu1 %2623  ;;  %v2619_v29 = vpop.permute.xlu0 %2618 }
 0x2de   : > { %v2882_v63 = vmul.f32 0.01, %v2846_v26  ;;  %v2881_v38 = vmul.f32 0.01, %v2845_v7  ;;  %v2848_v1 = vadd.f32 %v5319_v9, %v2805_v19  ;;  %v2847_v45 = vadd.f32 %v5319_v9, %v2804_v35 }
 0x2df   : > { %v2771_v53 = vmul.f32 %v5294_v47, %v2624_v4  ;;  %v2770_v16 = vmul.f32 %v5294_v47, %v2619_v29 }
 0x2e0   : > { %v2918_v55 = vmax.f32 %v2846_v26, %v2882_v63  ;;  %v2917_v18 = vmax.f32 %v2845_v7, %v2881_v38  ;;  %v2884_v61 = vmul.f32 0.01, %v2848_v1  ;;  %v2883_v22 = vmul.f32 0.01, %v2847_v45 }
 0x2e1   : > { %v2807_v27 = vadd.f32 %v2771_v53, %v2511_v41  ;;  %v2806_v50 = vadd.f32 %v2770_v16, %v2510_v10  ;;  %v2634_v14 = vpop.permute.xlu1 %2633  ;;  %v2629_v30 = vpop.permute.xlu0 %2628 }
 0x2e2   : > { %2955 = vst.msk [vmem:[%s5343_s15 + $0x28] sm:$0xff] %vm2949_vm0, %v2918_v55  ;;  %2954 = vst.msk [vmem:[%s5343_s15 + $0x20] sm:$0xff] %vm2949_vm0, %v2917_v18  ;;  %v2920_v32 = vmax.f32 %v2848_v1, %v2884_v61  ;;  %v2919_v54 = vmax.f32 %v2847_v45, %v2883_v22  ;;  %v2773_v37 = vmul.f32 %v5294_v47, %v2634_v14 }
 0x2e3   : > { %v2850_v36 = vadd.f32 %v5319_v9, %v2807_v27  ;;  %v2849_v42 = vadd.f32 %v5319_v9, %v2806_v50  ;;  %v2772_v56 = vmul.f32 %v5294_v47, %v2629_v30 }
 0x2e4   : > { %2957 = vst.msk [vmem:[%s5343_s15 + $0x38] sm:$0xff] %vm2949_vm0, %v2920_v32  ;;  %2956 = vst.msk [vmem:[%s5343_s15 + $0x30] sm:$0xff] %vm2949_vm0, %v2919_v54  ;;  %v2809_v59 = vadd.f32 %v2773_v37, %v5009_v23 }
 0x2e5   : > { %v2886_v11 = vmul.f32 0.01, %v2850_v36  ;;  %v2885_v48 = vmul.f32 0.01, %v2849_v42  ;;  %v2808_v39 = vadd.f32 %v2772_v56, %v5011_v15  ;;  %v2644_v62 = vpop.permute.xlu1 %2643  ;;  %v2639_v3 = vpop.permute.xlu0 %2638 }
 0x2e6   : > { %v2775_v17 = vmul.f32 %v5294_v47, %v2644_v62  ;;  %v2774_v26 = vmul.f32 %v5294_v47, %v2639_v3  ;;  %v2852_v7 = vadd.f32 %v5319_v9, %v2809_v59 }
 0x2e7   : > { %v2922_v58 = vmax.f32 %v2850_v36, %v2886_v11  ;;  %v2921_v2 = vmax.f32 %v2849_v42, %v2885_v48  ;;  %v2851_v19 = vadd.f32 %v5319_v9, %v2808_v39 }
 0x2e8   : > { %v2811_v23 = vadd.f32 %v2775_v17, %v5034_v5  ;;  %v2810_v15 = vadd.f32 %v2774_v26, %v5036_v51  ;;  %v2888_v35 = vmul.f32 0.01, %v2852_v7 }
 0x2e9   : > { %2959 = vst.msk [vmem:[%s5343_s15 + $0x48] sm:$0xff] %vm2949_vm0, %v2922_v58  ;;  %2958 = vst.msk [vmem:[%s5343_s15 + $0x40] sm:$0xff] %vm2949_vm0, %v2921_v2  ;;  %v2887_v41 = vmul.f32 0.01, %v2851_v19  ;;  %v2654_v10 = vpop.permute.xlu1 %2653  ;;  %v2649_v63 = vpop.permute.xlu0 %2648 }
 0x2ea   : > { %v2854_v38 = vadd.f32 %v5319_v9, %v2811_v23  ;;  %v2853_v4 = vadd.f32 %v5319_v9, %v2810_v15  ;;  %v2777_v29 = vmul.f32 %v5294_v47, %v2654_v10  ;;  %v2776_v1 = vmul.f32 %v5294_v47, %v2649_v63 }
 0x2eb   : > { %v2924_v45 = vmax.f32 %v2852_v7, %v2888_v35  ;;  %v2923_v53 = vmax.f32 %v2851_v19, %v2887_v41 }
 0x2ec   : > { %v2890_v5 = vmul.f32 0.01, %v2854_v38  ;;  %v2889_v16 = vmul.f32 0.01, %v2853_v4  ;;  %v2813_v51 = vadd.f32 %v2777_v29, %v5055_v8  ;;  %v2812_v55 = vadd.f32 %v2776_v1, %v5057_v44 }
 0x2ed   : > { %2961 = vst.msk [vmem:[%s5343_s15 + $0x58] sm:$0xff] %vm2949_vm0, %v2924_v45  ;;  %2960 = vst.msk [vmem:[%s5343_s15 + $0x50] sm:$0xff] %vm2949_vm0, %v2923_v53  ;;  %v2664_v18 = vpop.permute.xlu1 %2663  ;;  %v2659_v61 = vpop.permute.xlu0 %2658 }
 0x2ee   : > { %v2926_v22 = vmax.f32 %v2854_v38, %v2890_v5  ;;  %v2925_v27 = vmax.f32 %v2853_v4, %v2889_v16  ;;  %v2856_v50 = vadd.f32 %v5319_v9, %v2813_v51  ;;  %v2855_v14 = vadd.f32 %v5319_v9, %v2812_v55 }
 0x2ef   : > { %v2779_v30 = vmul.f32 %v5294_v47, %v2664_v18  ;;  %v2778_v32 = vmul.f32 %v5294_v47, %v2659_v61 }
 0x2f0   : > { %2963 = vst.msk [vmem:[%s5343_s15 + $0x68] sm:$0xff] %vm2949_vm0, %v2926_v22  ;;  %2962 = vst.msk [vmem:[%s5343_s15 + $0x60] sm:$0xff] %vm2949_vm0, %v2925_v27  ;;  %v2892_v8 = vmul.f32 0.01, %v2856_v50  ;;  %v2891_v44 = vmul.f32 0.01, %v2855_v14 }
 0x2f1   : > { %v2815_v54 = vadd.f32 %v2779_v30, %v5081_v25  ;;  %v2814_v36 = vadd.f32 %v2778_v32, %v5083_v43  ;;  %v2674_v42 = vpop.permute.xlu1 %2673  ;;  %v2669_v37 = vpop.permute.xlu0 %2668 }
 0x2f2   : > { %v2928_v56 = vmax.f32 %v2856_v50, %v2892_v8  ;;  %v2927_v11 = vmax.f32 %v2855_v14, %v2891_v44  ;;  %v2781_v48 = vmul.f32 %v5294_v47, %v2674_v42  ;;  %v2780_v59 = vmul.f32 %v5294_v47, %v2669_v37 }
 0x2f3   : > { %v2858_v39 = vadd.f32 %v5319_v9, %v2815_v54  ;;  %v2857_v62 = vadd.f32 %v5319_v9, %v2814_v36 }
 0x2f4   : > { %2965 = vst.msk [vmem:[%s5343_s15 + $0x78] sm:$0xff] %vm2949_vm0, %v2928_v56  ;;  %2964 = vst.msk [vmem:[%s5343_s15 + $0x70] sm:$0xff] %vm2949_vm0, %v2927_v11  ;;  %v2817_v25 = vadd.f32 %v2781_v48, %v5104_v24  ;;  %v2816_v43 = vadd.f32 %v2780_v59, %v5106_v40 }
 0x2f5   : > { %v2894_v3 = vmul.f32 0.01, %v2858_v39  ;;  %v2893_v58 = vmul.f32 0.01, %v2857_v62  ;;  %v2684_v2 = vpop.permute.xlu1 %2683  ;;  %v2679_v17 = vpop.permute.xlu0 %2678 }
 0x2f6   : > { %v2860_v26 = vadd.f32 %v5319_v9, %v2817_v25  ;;  %v2859_v7 = vadd.f32 %v5319_v9, %v2816_v43  ;;  %v2783_v19 = vmul.f32 %v5294_v47, %v2684_v2  ;;  %v2782_v23 = vmul.f32 %v5294_v47, %v2679_v17 }
 0x2f7   : > { %v2930_v15 = vmax.f32 %v2858_v39, %v2894_v3  ;;  %v2929_v35 = vmax.f32 %v2857_v62, %v2893_v58 }
 0x2f8   : > { %v2896_v24 = vmul.f32 0.01, %v2860_v26  ;;  %v2895_v41 = vmul.f32 0.01, %v2859_v7  ;;  %v2819_v40 = vadd.f32 %v2783_v19, %v5130_v20  ;;  %v2818_v10 = vadd.f32 %v2782_v23, %v5132_v33 }
 0x2f9   : > { %2967 = vst.msk [vmem:[%s5343_s15 + $0x88] sm:$0xff] %vm2949_vm0, %v2930_v15  ;;  %2966 = vst.msk [vmem:[%s5343_s15 + $0x80] sm:$0xff] %vm2949_vm0, %v2929_v35  ;;  %v2694_v63 = vpop.permute.xlu1 %2693 }
 0x2fa   : > { %v2689_v38 = vpop.permute.xlu0 %2688  ;;  %v2932_v4 = vmax.f32 %v2860_v26, %v2896_v24  ;;  %v2931_v29 = vmax.f32 %v2859_v7, %v2895_v41  ;;  %v2862_v1 = vadd.f32 %v5319_v9, %v2819_v40  ;;  %v2861_v45 = vadd.f32 %v5319_v9, %v2818_v10 }
 0x2fb   : > { %v2785_v53 = vmul.f32 %v5294_v47, %v2694_v63  ;;  %v2784_v5 = vmul.f32 %v5294_v47, %v2689_v38 }
 0x2fc   : > { %2969 = vst.msk [vmem:[%s5343_s15 + $0x98] sm:$0xff] %vm2949_vm0, %v2932_v4  ;;  %2968 = vst.msk [vmem:[%s5343_s15 + $0x90] sm:$0xff] %vm2949_vm0, %v2931_v29  ;;  %v2898_v20 = vmul.f32 0.01, %v2862_v1  ;;  %v2897_v33 = vmul.f32 0.01, %v2861_v45 }
 0x2fd   : > { %v2821_v16 = vadd.f32 %v2785_v53, %v5153_v57  ;;  %v2820_v51 = vadd.f32 %v2784_v5, %v5155_v12  ;;  %v2704_v55 = vpop.permute.xlu1 %2703 }
 0x2fe   : > { %v2699_v18 = vpop.permute.xlu0 %2698  ;;  %v2934_v61 = vmax.f32 %v2862_v1, %v2898_v20  ;;  %v2933_v22 = vmax.f32 %v2861_v45, %v2897_v33  ;;  %v2787_v27 = vmul.f32 %v5294_v47, %v2704_v55  ;;  %v5985_v55 = vld [vmem:[#allocation37_spill] sm:$0xff] }
 0x2ff   : > { %v2786_v50 = vmul.f32 %v5294_v47, %v2699_v18  ;;  %v2864_v14 = vadd.f32 %v5319_v9, %v2821_v16  ;;  %v2863_v30 = vadd.f32 %v5319_v9, %v2820_v51 }
 0x300   : > { %2971 = vst.msk [vmem:[%s5343_s15 + $0xa8] sm:$0xff] %vm2949_vm0, %v2934_v61  ;;  %2970 = vst.msk [vmem:[%s5343_s15 + $0xa0] sm:$0xff] %vm2949_vm0, %v2933_v22  ;;  %v2823_v57 = vadd.f32 %v2787_v27, %v5179_v46 }
 0x301   : > { %v2822_v12 = vadd.f32 %v2786_v50, %v5181_v13  ;;  %v2900_v32 = vmul.f32 0.01, %v2864_v14  ;;  %v2899_v8 = vmul.f32 0.01, %v2863_v30  ;;  %v2714_v44 = vpop.permute.xlu1 %2713 }
 0x302   : > { %v2709_v54 = vpop.permute.xlu0 %2708  ;;  %v2866_v36 = vadd.f32 %v5319_v9, %v2823_v57  ;;  %v2789_v37 = vmul.f32 %v5294_v47, %v2714_v44 }
 0x303   : > { %v2865_v42 = vadd.f32 %v5319_v9, %v2822_v12  ;;  %v2788_v56 = vmul.f32 %v5294_v47, %v2709_v54  ;;  %v2936_v11 = vmax.f32 %v2864_v14, %v2900_v32  ;;  %v2935_v48 = vmax.f32 %v2863_v30, %v2899_v8 }
 0x304   : > { %v2902_v46 = vmul.f32 0.01, %v2866_v36  ;;  %v2825_v13 = vadd.f32 %v2789_v37, %v5202_v28 }
 0x305   : > { %v2901_v59 = vmul.f32 0.01, %v2865_v42  ;;  %v2824_v39 = vadd.f32 %v2788_v56, %v5204_v60  ;;  %2973 = vst.msk [vmem:[%s5343_s15 + $0xb8] sm:$0xff] %vm2949_vm0, %v2936_v11  ;;  %2972 = vst.msk [vmem:[%s5343_s15 + $0xb0] sm:$0xff] %vm2949_vm0, %v2935_v48  ;;  %v2724_v62 = vpop.permute.xlu1 %2723 }
 0x306   : > { %v2719_v25 = vpop.permute.xlu0 %2718  ;;  %v2938_v43 = vmax.f32 %v2866_v36, %v2902_v46  ;;  %v2868_v58 = vadd.f32 %v5319_v9, %v2825_v13  ;;  %v2791_v17 = vmul.f32 %v5294_v47, %v2724_v62 }
 0x307   : > { %v2937_v3 = vmax.f32 %v2865_v42, %v2901_v59  ;;  %v2867_v2 = vadd.f32 %v5319_v9, %v2824_v39  ;;  %v2790_v26 = vmul.f32 %v5294_v47, %v2719_v25 }
 0x308   : > { %2975 = vst.msk [vmem:[%s5343_s15 + $0xc8] sm:$0xff] %vm2949_vm0, %v2938_v43  ;;  %v2904_v28 = vmul.f32 0.01, %v2868_v58  ;;  %v2827_v7 = vadd.f32 %v2791_v17, %v5228_v52 }
 0x309   : > { %2974 = vst.msk [vmem:[%s5343_s15 + $0xc0] sm:$0xff] %vm2949_vm0, %v2937_v3  ;;  %v2903_v60 = vmul.f32 0.01, %v2867_v2  ;;  %v2826_v19 = vadd.f32 %v2790_v26, %v5230_v49 }
 0x30a   : > { %v2734_v23 = vpop.permute.xlu1 %2733  ;;  %v2729_v15 = vpop.permute.xlu0 %2728  ;;  %v2940_v35 = vmax.f32 %v2868_v58, %v2904_v28  ;;  %v2870_v10 = vadd.f32 %v5319_v9, %v2827_v7 }
 0x30b   : > { %v2939_v24 = vmax.f32 %v2867_v2, %v2903_v60  ;;  %v2793_v41 = vmul.f32 %v5294_v47, %v2734_v23  ;;  %v2792_v40 = vmul.f32 %v5294_v47, %v2729_v15  ;;  %v2869_v63 = vadd.f32 %v5319_v9, %v2826_v19 }
 0x30c   : > { %2977 = vst.msk [vmem:[%s5343_s15 + $0xd8] sm:$0xff] %vm2949_vm0, %v2940_v35  ;;  %v2906_v38 = vmul.f32 0.01, %v2870_v10 }
 0x30d   : > { %2976 = vst.msk [vmem:[%s5343_s15 + $0xd0] sm:$0xff] %vm2949_vm0, %v2939_v24  ;;  %v2829_v52 = vadd.f32 %v2793_v41, %v5251_v0  ;;  %v2828_v49 = vadd.f32 %v2792_v40, %v5253_v31  ;;  %v2905_v4 = vmul.f32 0.01, %v2869_v63 }
 0x30e   : > { %v2744_v29 = vpop.permute.xlu1 %2743  ;;  %v2739_v1 = vpop.permute.xlu0 %2738  ;;  %v2942_v33 = vmax.f32 %v2870_v10, %v2906_v38 }
 0x30f   : > { %v2872_v45 = vadd.f32 %v5319_v9, %v2829_v52  ;;  %v2871_v53 = vadd.f32 %v5319_v9, %v2828_v49  ;;  %v2795_v5 = vmul.f32 %v5294_v47, %v2744_v29  ;;  %v2794_v20 = vmul.f32 %v5294_v47, %v2739_v1 }
 0x310   : > { %v2941_v16 = vmax.f32 %v2869_v63, %v2905_v4  ;;  %2979 = vst.msk [vmem:[%s5343_s15 + $0xe8] sm:$0xff] %vm2949_vm0, %v2942_v33 }
 0x311   : > { %v2908_v0 = vmul.f32 0.01, %v2872_v45  ;;  %v2907_v51 = vmul.f32 0.01, %v2871_v53  ;;  %v2831_v31 = vadd.f32 %v2795_v5, %v5271_v34  ;;  %v2830_v18 = vadd.f32 %v2794_v20, %v5985_v55 }
 0x312   : > { %2978 = vst.msk [vmem:[%s5343_s15 + $0xe0] sm:$0xff] %vm2949_vm0, %v2941_v16  ;;  %v2754_v61 = vpop.permute.xlu1 %2753  ;;  %v2749_v22 = vpop.permute.xlu0 %2748 }
 0x313   : > { %v2944_v27 = vmax.f32 %v2872_v45, %v2908_v0  ;;  %v2943_v50 = vmax.f32 %v2871_v53, %v2907_v51  ;;  %v2874_v14 = vadd.f32 %v5319_v9, %v2831_v31  ;;  %v2873_v30 = vadd.f32 %v5319_v9, %v2830_v18 }
 0x314   : > { %v2797_v57 = vmul.f32 %v5294_v47, %v2754_v61  ;;  %v2796_v34 = vmul.f32 %v5294_v47, %v2749_v22 }
 0x315   : > { %2981 = vst.msk [vmem:[%s5343_s15 + $0xf8] sm:$0xff] %vm2949_vm0, %v2944_v27  ;;  %2980 = vst.msk [vmem:[%s5343_s15 + $0xf0] sm:$0xff] %vm2949_vm0, %v2943_v50  ;;  %v2910_v12 = vmul.f32 0.01, %v2874_v14  ;;  %v2909_v32 = vmul.f32 0.01, %v2873_v30 }
 0x316   : > { %v2833_v8 = vadd.f32 %v2797_v57, %v5300_v21  ;;  %v2832_v44 = vadd.f32 %v2796_v34, %v5302_v6 }
 0x317   : > { %v2946_v54 = vmax.f32 %v2874_v14, %v2910_v12  ;;  %v2945_v36 = vmax.f32 %v2873_v30, %v2909_v32 }
 0x318   : > { %v2876_v42 = vadd.f32 %v5319_v9, %v2833_v8  ;;  %v2875_v37 = vadd.f32 %v5319_v9, %v2832_v44 }
 0x319   : > { %2983 = vst.msk [vmem:[%s5343_s15 + $0x108] sm:$0xff] %vm2949_vm0, %v2946_v54  ;;  %2982 = vst.msk [vmem:[%s5343_s15 + $0x100] sm:$0xff] %vm2949_vm0, %v2945_v36 }
 0x31a   : > { %v2912_v47 = vmul.f32 0.01, %v2876_v42  ;;  %v2911_v56 = vmul.f32 0.01, %v2875_v37 }
 0x31c   : > { %v2948_v11 = vmax.f32 %v2876_v42, %v2912_v47  ;;  %v2947_v48 = vmax.f32 %v2875_v37, %v2911_v56 }
 0x31e   : > { %2985 = vst.msk [vmem:[%s5343_s15 + $0x118] sm:$0xff] %vm2949_vm0, %v2948_v11  ;;  %2984 = vst.msk [vmem:[%s5343_s15 + $0x110] sm:$0xff] %vm2949_vm0, %v2947_v48 }
 0x31f PF: > { %s13_s12 = sadd.s32 1, %s3087_s12  }
 0x320   : > { %p10_p4 = scmp.ge.s32.totalorder %s13_s12, 4  }
 0x322   :  { %12 = sbr.rel (!%p10_p4) target bundleno = 1 (0x1), region = 70 }

// kernel: sliding_projection_net_forward.4
= control target key start
LH: loop header
LB: loop body
LE: loop exit
PB: predicated region body
PF: predicated region fallthrough
CT: control target
= control target key end

     0   :  { %s2203_s12 = smov 0   ;;  %s2617_s0 = inlined_call_operand.vmem [shape: f32[2,110,16], index: 0, kind: input, shape index: {}]   ;;  %s2618_s1 = inlined_call_operand.vmem [shape: f32[9,16,32], index: 1, kind: input, shape index: {}]   ;;  %s2619_s2 = inlined_call_operand.vmem [shape: f32[1,32], index: 2, kind: input, shape index: {}]   ;;  %s2620_s3 = inlined_call_operand.vmem [shape: f32[2,80,32], index: 3, kind: output, shape index: {}]  }
   0x1 LB: > { %s1766_s13 = sadd.s32 4294967295, %s2181_s12   ;;  %p1770_p0 = scmp.ge.s32.totalorder %s2181_s12, 1  ;;  %s2181_s12 = sphi %s2203_s12, %s13_s12  }
   0x2   : > { %p137_p1 = scmp.lt.s32.totalorder %s2181_s12, 3 }
   0x4   : > { %p138_p2 = pnand %p1770_p0, %p137_p1 }
   0x6   : > { %141 = sbr.rel (%p138_p2) target bundleno = 311 (0x137), region = 32 }
   0xb   : > { %v1774_v0 = vld [vmem:[%s2618_s1 + $0x18] sm:$0xff]  ;;  %v1773_v1 = vld [vmem:[%s2618_s1 + $0x10] sm:$0xff]  ;;  %p161_p3 = scmp.lt.s32.totalorder %s1766_s13, 1  ;;  %v1796_v2 = vld [vmem:[%s2618_s1 + $0x28] sm:$0xff]  ;;  %vm196_vm0 = vcmask 130048   ;;  %vm1700_vm1 = vcmask 261120  }
   0xc   : > { %1990 = vmatprep.subr.mxu0 %v1774_v0  ;;  %2161 = vmatprep.subr.mxu1 %v1774_v0  ;;  %v182_v3 = vld [vmem:[%s2618_s1 + $0x8] sm:$0xff]  ;;  %v181_v10 = vld [vmem:[%s2618_s1] sm:$0xff]  ;;  %v1808_v16 = vld [vmem:[%s2618_s1 + $0x38] sm:$0xff] }
   0xd   : > { %1991 = vmatpush3.msra.mxu0 %v1774_v0  ;;  %2163 = vmatpush3.msra.mxu1 %v1774_v0  ;;  %s2642_s13 = smov (!%p161_p3, %s1766_s13), 1  ;;  %v1795_v11 = vld [vmem:[%s2618_s1 + $0x20] sm:$0xff]  ;;  %v1820_v17 = vld [vmem:[%s2618_s1 + $0x48] sm:$0xff]  ;;  %v1807_v22 = vld [vmem:[%s2618_s1 + $0x30] sm:$0xff] }
   0xe   : > { %1992 = vmatprep.subr.mxu0 %v1773_v1  ;;  %2162 = vmatprep.subr.mxu1 %v1773_v1  ;;  %s2165_s22 = smul.u32 112, %s2642_s13  ;;  %v1819_v27 = vld [vmem:[%s2618_s1 + $0x40] sm:$0xff]  ;;  %v1832_v28 = vld [vmem:[%s2618_s1 + $0x58] sm:$0xff]  ;;  %v1844_v33 = vld [vmem:[%s2618_s1 + $0x68] sm:$0xff] }
   0xf   : > { %1993 = vmatpush3.msra.mxu0 %v1773_v1  ;;  %2164 = vmatpush3.msra.mxu1 %v1773_v1  ;;  %v1831_v43 = vld [vmem:[%s2618_s1 + $0x50] sm:$0xff]  ;;  %v1843_v46 = vld [vmem:[%s2618_s1 + $0x60] sm:$0xff]  ;;  %v1856_v47 = vld [vmem:[%s2618_s1 + $0x78] sm:$0xff]  ;;  %s2166_s4 = smul.u32 80, %s2642_s13 }
  0x10   : > { %2028 = vmatprep.subr.mxu0 %v1796_v2  ;;  %2009 = vmatprep.subr.mxu1 %v182_v3  ;;  %s2229_s25 = scalar_lea.vmem %s2617_s0, %s2165_s22  ;;  %v1868_v50 = vld [vmem:[%s2618_s1 + $0x88] sm:$0xff]  ;;  %v1855_v60 = vld [vmem:[%s2618_s1 + $0x70] sm:$0xff]  ;;  %v1867_v63 = vld [vmem:[%s2618_s1 + $0x80] sm:$0xff] }
  0x11   : > { %v183_v4 = vld [vmem:[%s2229_s25 + $0x1] sm:$0xff]  ;;  %v189_v5 = vld [vmem:[%s2229_s25 + $0x31] sm:$0xff]  ;;  %v184_v6 = vld [vmem:[%s2229_s25 + $0x9] sm:$0xff]  ;;  %s2574_s6 = scalar_lea.vmem %s2620_s3, %s2166_s4 }
  0x12   : > { %1994 = vmatprep.mubr.msk.f32.mxu0 %vm196_vm0, %v183_v4  ;;  %2003 = vmatprep.mubr.msk.f32.mxu1 %vm196_vm0, %v189_v5  ;;  %v190_v7 = vld [vmem:[%s2229_s25 + $0x39] sm:$0xff]  ;;  %v185_v8 = vld [vmem:[%s2229_s25 + $0x11] sm:$0xff]  ;;  %v191_v9 = vld [vmem:[%s2229_s25 + $0x41] sm:$0xff] }
  0x13   : > { %1995 = vmatmul.mubr.msk.f32.vlgmr.msra.gmra.mxu0 %vm196_vm0, %v184_v6  ;;  %2004 = vmatmul.mubr.msk.f32.vlgmr.msra.gmra.mxu1 %vm196_vm0, %v190_v7  ;;  %v186_v12 = vld [vmem:[%s2229_s25 + $0x19] sm:$0xff]  ;;  %v192_v13 = vld [vmem:[%s2229_s25 + $0x49] sm:$0xff]  ;;  %v187_v14 = vld [vmem:[%s2229_s25 + $0x21] sm:$0xff] }
  0x14   : > { %2029 = vmatpush3.msra.mxu0 %v1796_v2  ;;  %2010 = vmatpush3.msra.mxu1 %v182_v3  ;;  %v171_v15 = vld [vmem:[%s2229_s25] sm:$0xff]  ;;  %v188_v18 = vld [vmem:[%s2229_s25 + $0x29] sm:$0xff]  ;;  %v174_v23 = vld [vmem:[%s2229_s25 + $0x18] sm:$0xff] }
  0x15   : > { %1997 = vmatprep.mubr.msk.f32.mxu0 %vm196_vm0, %v185_v8  ;;  %2006 = vmatprep.mubr.msk.f32.mxu1 %vm196_vm0, %v191_v9  ;;  %v172_v19 = vld [vmem:[%s2229_s25 + $0x8] sm:$0xff]  ;;  %v173_v20 = vld [vmem:[%s2229_s25 + $0x10] sm:$0xff]  ;;  %v175_v25 = vld [vmem:[%s2229_s25 + $0x20] sm:$0xff] }
  0x16   : > { %2011 = vmatprep.subr.mxu1 %v181_v10  ;;  %2030 = vmatprep.subr.mxu0 %v1795_v11  ;;  %v487_v21 = vld [vmem:[%s2229_s25 + $0x2] sm:$0xff]  ;;  %v488_v24 = vld [vmem:[%s2229_s25 + $0xa] sm:$0xff]  ;;  %v489_v26 = vld [vmem:[%s2229_s25 + $0x12] sm:$0xff] }
  0x17   : > { %1998 = vmatmul.mubr.msk.f32.gmra.mxu0 %vm196_vm0, %v186_v12  ;;  %2007 = vmatmul.mubr.msk.f32.gmra.mxu1 %vm196_vm0, %v192_v13  ;;  %v176_v29 = vld [vmem:[%s2229_s25 + $0x28] sm:$0xff]  ;;  %v490_v30 = vld [vmem:[%s2229_s25 + $0x1a] sm:$0xff]  ;;  %v177_v31 = vld [vmem:[%s2229_s25 + $0x30] sm:$0xff] }
  0x18   : > { %2012 = vmatpush3.msra.mxu1 %v181_v10  ;;  %2031 = vmatpush3.msra.mxu0 %v1795_v11  ;;  %v491_v32 = vld [vmem:[%s2229_s25 + $0x22] sm:$0xff]  ;;  %v178_v34 = vld [vmem:[%s2229_s25 + $0x38] sm:$0xff]  ;;  %v492_v35 = vld [vmem:[%s2229_s25 + $0x2a] sm:$0xff] }
  0x19   : > { %2000 = vmatprep.mubr.msk.f32.mxu0 %vm196_vm0, %v187_v14  ;;  %2013 = vmatprep.mubr.msk.f32.mxu1 %vm196_vm0, %v171_v15  ;;  %v179_v36 = vld [vmem:[%s2229_s25 + $0x40] sm:$0xff]  ;;  %v493_v37 = vld [vmem:[%s2229_s25 + $0x32] sm:$0xff]  ;;  %v180_v38 = vld [vmem:[%s2229_s25 + $0x48] sm:$0xff] }
  0x1a   : > { %2047 = vmatprep.subr.mxu1 %v1808_v16  ;;  %2066 = vmatprep.subr.mxu0 %v1820_v17  ;;  %v494_v39 = vld [vmem:[%s2229_s25 + $0x3a] sm:$0xff]  ;;  %v495_v40 = vld [vmem:[%s2229_s25 + $0x42] sm:$0xff]  ;;  %v496_v41 = vld [vmem:[%s2229_s25 + $0x4a] sm:$0xff] }
  0x1b   : > { %2001 = vmatmul.mubr.msk.f32.gmra.mxu0 %vm196_vm0, %v188_v18  ;;  %2014 = vmatmul.mubr.msk.f32.vlgmr.msra.gmra.mxu1 %vm196_vm0, %v172_v19  ;;  %v823_v42 = vld [vmem:[%s2229_s25 + $0xb] sm:$0xff]  ;;  %v824_v44 = vld [vmem:[%s2229_s25 + $0x13] sm:$0xff]  ;;  %v825_v45 = vld [vmem:[%s2229_s25 + $0x1b] sm:$0xff] }
  0x1c   : > { %2048 = vmatpush3.msra.mxu1 %v1808_v16  ;;  %2016 = vmatprep.mubr.msk.f32.mxu1 %vm196_vm0, %v173_v20  ;;  %v826_v48 = vld [vmem:[%s2229_s25 + $0x23] sm:$0xff]  ;;  %v827_v49 = vld [vmem:[%s2229_s25 + $0x2b] sm:$0xff]  ;;  %v828_v51 = vld [vmem:[%s2229_s25 + $0x33] sm:$0xff] }
  0x1d   : > { %2032 = vmatprep.mubr.msk.f32.mxu0 %vm196_vm0, %v487_v21  ;;  %2049 = vmatprep.subr.mxu1 %v1807_v22  ;;  %v829_v52 = vld [vmem:[%s2229_s25 + $0x3b] sm:$0xff]  ;;  %v664_v53 = vld [vmem:[%s2229_s25 + $0x52] sm:$0xff]  ;;  %v830_v54 = vld [vmem:[%s2229_s25 + $0x43] sm:$0xff] }
  0x1e   : > { %2050 = vmatpush3.msra.mxu1 %v1807_v22  ;;  %v831_v55 = vld [vmem:[%s2229_s25 + $0x4b] sm:$0xff]  ;;  %v832_v57 = vld [vmem:[%s2229_s25 + $0x53] sm:$0xff]  ;;  %v993_v59 = vld [vmem:[%s2229_s25 + $0x1c] sm:$0xff] }
  0x1f   : > { %2017 = vmatmul.mubr.msk.f32.gmra.mxu1 %vm196_vm0, %v174_v23  ;;  %2033 = vmatmul.mubr.msk.f32.vlgmr.msra.gmra.mxu0 %vm196_vm0, %v488_v24  ;;  %v991_v56 = vld [vmem:[%s2229_s25 + $0xc] sm:$0xff]  ;;  %v992_v58 = vld [vmem:[%s2229_s25 + $0x14] sm:$0xff]  ;;  %v994_v61 = vld [vmem:[%s2229_s25 + $0x24] sm:$0xff] }
  0x20   : > { %2067 = vmatpush3.msra.mxu0 %v1820_v17  ;;  %2019 = vmatprep.mubr.msk.f32.mxu1 %vm196_vm0, %v175_v25  ;;  %v995_v62 = vld [vmem:[%s2229_s25 + $0x2c] sm:$0xff]  ;;  %v996_v0 = vld [vmem:[%s2229_s25 + $0x34] sm:$0xff]  ;;  %v997_v1 = vld [vmem:[%s2229_s25 + $0x3c] sm:$0xff] }
  0x21   : > { %2035 = vmatprep.mubr.msk.f32.mxu0 %vm196_vm0, %v489_v26  ;;  %2068 = vmatprep.subr.mxu0 %v1819_v27  ;;  %v998_v2 = vld [vmem:[%s2229_s25 + $0x44] sm:$0xff]  ;;  %v999_v3 = vld [vmem:[%s2229_s25 + $0x4c] sm:$0xff]  ;;  %v1000_v4 = vld [vmem:[%s2229_s25 + $0x54] sm:$0xff] }
  0x22   : > { %2069 = vmatpush3.msra.mxu0 %v1819_v27  ;;  %2085 = vmatprep.subr.mxu1 %v1832_v28  ;;  %v1327_v5 = vld [vmem:[%s2229_s25 + $0x15] sm:$0xff]  ;;  %v1328_v7 = vld [vmem:[%s2229_s25 + $0x1d] sm:$0xff]  ;;  %v1329_v8 = vld [vmem:[%s2229_s25 + $0x25] sm:$0xff] }
  0x23   : > { %2020 = vmatmul.mubr.msk.f32.gmra.mxu1 %vm196_vm0, %v176_v29  ;;  %2036 = vmatmul.mubr.msk.f32.gmra.mxu0 %vm196_vm0, %v490_v30  ;;  %v1168_v6 = vld [vmem:[%s2229_s25 + $0x5c] sm:$0xff]  ;;  %v1330_v10 = vld [vmem:[%s2229_s25 + $0x2d] sm:$0xff]  ;;  %v1333_v16 = vld [vmem:[%s2229_s25 + $0x45] sm:$0xff] }
  0x24   : > { %2022 = vmatprep.mubr.msk.f32.mxu1 %vm196_vm0, %v177_v31  ;;  %2038 = vmatprep.mubr.msk.f32.mxu0 %vm196_vm0, %v491_v32  ;;  %v1495_v9 = vld [vmem:[%s2229_s25 + $0x16] sm:$0xff]  ;;  %v1496_v11 = vld [vmem:[%s2229_s25 + $0x1e] sm:$0xff]  ;;  %v1497_v13 = vld [vmem:[%s2229_s25 + $0x26] sm:$0xff] }
  0x25   : > { %2104 = vmatprep.subr.mxu0 %v1844_v33  ;;  %v1331_v12 = vld [vmem:[%s2229_s25 + $0x35] sm:$0xff]  ;;  %v1332_v14 = vld [vmem:[%s2229_s25 + $0x3d] sm:$0xff]  ;;  %v1334_v18 = vld [vmem:[%s2229_s25 + $0x4d] sm:$0xff] }
  0x26   : > { %v1498_v15 = vld [vmem:[%s2229_s25 + $0x2e] sm:$0xff]  ;;  %v1499_v17 = vld [vmem:[%s2229_s25 + $0x36] sm:$0xff]  ;;  %v1500_v19 = vld [vmem:[%s2229_s25 + $0x3e] sm:$0xff] }
  0x27   : > { %2023 = vmatmul.mubr.msk.f32.gmra.mxu1 %vm196_vm0, %v178_v34  ;;  %2039 = vmatmul.mubr.msk.f32.gmra.mxu0 %vm196_vm0, %v492_v35  ;;  %v1335_v20 = vld [vmem:[%s2229_s25 + $0x55] sm:$0xff]  ;;  %v1501_v21 = vld [vmem:[%s2229_s25 + $0x46] sm:$0xff]  ;;  %v1336_v22 = vld [vmem:[%s2229_s25 + $0x5d] sm:$0xff] }
  0x28   : > { %2025 = vmatprep.mubr.msk.f32.mxu1 %vm196_vm0, %v179_v36  ;;  %2041 = vmatprep.mubr.msk.f32.mxu0 %vm196_vm0, %v493_v37  ;;  %v1502_v23 = vld [vmem:[%s2229_s25 + $0x4e] sm:$0xff]  ;;  %v1504_v25 = vld [vmem:[%s2229_s25 + $0x5e] sm:$0xff] }
  0x2b   : > { %2026 = vmatmul.mubr.msk.f32.gmra.mxu1 %vm196_vm0, %v180_v38  ;;  %2042 = vmatmul.mubr.msk.f32.gmra.mxu0 %vm196_vm0, %v494_v39 }
  0x2c   : > { %2044 = vmatprep.mubr.msk.f32.mxu0 %vm196_vm0, %v495_v40  ;;  %2051 = vmatprep.mubr.msk.f32.mxu1 %vm196_vm0, %v488_v24  ;;  %v1503_v24 = vld [vmem:[%s2229_s25 + $0x56] sm:$0xff] }
  0x2f   : > { %2045 = vmatmul.mubr.msk.f32.gmra.mxu0 %vm196_vm0, %v496_v41  ;;  %2052 = vmatmul.mubr.msk.f32.vlgmr.msra.gmra.mxu1 %vm196_vm0, %v489_v26 }
  0x30   : > { %2086 = vmatpush3.msra.mxu1 %v1832_v28  ;;  %2054 = vmatprep.mubr.msk.f32.mxu1 %vm196_vm0, %v490_v30 }
  0x31   : > { %2070 = vmatprep.mubr.msk.f32.mxu0 %vm196_vm0, %v823_v42  ;;  %2087 = vmatprep.subr.mxu1 %v1831_v43 }
  0x32   : > { %2088 = vmatpush3.msra.mxu1 %v1831_v43 }
  0x33   : > { %2055 = vmatmul.mubr.msk.f32.gmra.mxu1 %vm196_vm0, %v491_v32  ;;  %2071 = vmatmul.mubr.msk.f32.vlgmr.msra.gmra.mxu0 %vm196_vm0, %v824_v44 }
  0x34   : > { %2105 = vmatpush3.msra.mxu0 %v1844_v33  ;;  %2057 = vmatprep.mubr.msk.f32.mxu1 %vm196_vm0, %v492_v35 }
  0x35   : > { %2073 = vmatprep.mubr.msk.f32.mxu0 %vm196_vm0, %v825_v45  ;;  %2106 = vmatprep.subr.mxu0 %v1843_v46 }
  0x36   : > { %2107 = vmatpush3.msra.mxu0 %v1843_v46  ;;  %2123 = vmatprep.subr.mxu1 %v1856_v47 }
  0x37   : > { %2058 = vmatmul.mubr.msk.f32.gmra.mxu1 %vm196_vm0, %v493_v37  ;;  %2074 = vmatmul.mubr.msk.f32.gmra.mxu0 %vm196_vm0, %v826_v48 }
  0x38   : > { %2060 = vmatprep.mubr.msk.f32.mxu1 %vm196_vm0, %v494_v39  ;;  %2076 = vmatprep.mubr.msk.f32.mxu0 %vm196_vm0, %v827_v49 }
  0x39   : > { %2142 = vmatprep.subr.mxu0 %v1868_v50 }
  0x3b   : > { %2061 = vmatmul.mubr.msk.f32.gmra.mxu1 %vm196_vm0, %v495_v40  ;;  %2077 = vmatmul.mubr.msk.f32.gmra.mxu0 %vm196_vm0, %v828_v51 }
  0x3c   : > { %2063 = vmatprep.mubr.msk.f32.mxu1 %vm196_vm0, %v496_v41  ;;  %2079 = vmatprep.mubr.msk.f32.mxu0 %vm196_vm0, %v829_v52 }
  0x3f   : > { %2064 = vmatmul.mubr.msk.f32.gmra.mxu1 %vm196_vm0, %v664_v53  ;;  %2080 = vmatmul.mubr.msk.f32.gmra.mxu0 %vm196_vm0, %v830_v54 }
  0x40   : > { %2082 = vmatprep.mubr.msk.f32.mxu0 %vm196_vm0, %v831_v55  ;;  %2089 = vmatprep.mubr.msk.f32.mxu1 %vm196_vm0, %v991_v56 }
  0x43   : > { %2083 = vmatmul.mubr.msk.f32.gmra.mxu0 %vm196_vm0, %v832_v57  ;;  %2090 = vmatmul.mubr.msk.f32.vlgmr.msra.gmra.mxu1 %vm196_vm0, %v992_v58 }
  0x44   : > { %2124 = vmatpush3.msra.mxu1 %v1856_v47  ;;  %2092 = vmatprep.mubr.msk.f32.mxu1 %vm196_vm0, %v993_v59 }
  0x45   : > { %2108 = vmatprep.mubr.msk.f32.mxu0 %vm196_vm0, %v992_v58  ;;  %2125 = vmatprep.subr.mxu1 %v1855_v60 }
  0x46   : > { %2126 = vmatpush3.msra.mxu1 %v1855_v60 }
  0x47   : > { %2093 = vmatmul.mubr.msk.f32.gmra.mxu1 %vm196_vm0, %v994_v61  ;;  %2109 = vmatmul.mubr.msk.f32.vlgmr.msra.gmra.mxu0 %vm196_vm0, %v993_v59 }
  0x48   : > { %2143 = vmatpush3.msra.mxu0 %v1868_v50  ;;  %2095 = vmatprep.mubr.msk.f32.mxu1 %vm196_vm0, %v995_v62 }
  0x49   : > { %2111 = vmatprep.mubr.msk.f32.mxu0 %vm196_vm0, %v994_v61  ;;  %2144 = vmatprep.subr.mxu0 %v1867_v63 }
  0x4a   : > { %2145 = vmatpush3.msra.mxu0 %v1867_v63 }
  0x4b   : > { %2096 = vmatmul.mubr.msk.f32.gmra.mxu1 %vm196_vm0, %v996_v0  ;;  %2112 = vmatmul.mubr.msk.f32.gmra.mxu0 %vm196_vm0, %v995_v62 }
  0x4c   : > { %2098 = vmatprep.mubr.msk.f32.mxu1 %vm196_vm0, %v997_v1  ;;  %2114 = vmatprep.mubr.msk.f32.mxu0 %vm196_vm0, %v996_v0 }
  0x4f   : > { %2099 = vmatmul.mubr.msk.f32.gmra.mxu1 %vm196_vm0, %v998_v2  ;;  %2115 = vmatmul.mubr.msk.f32.gmra.mxu0 %vm196_vm0, %v997_v1 }
  0x50   : > { %2101 = vmatprep.mubr.msk.f32.mxu1 %vm196_vm0, %v999_v3  ;;  %2117 = vmatprep.mubr.msk.f32.mxu0 %vm196_vm0, %v998_v2 }
  0x53   : > { %2102 = vmatmul.mubr.msk.f32.gmra.mxu1 %vm196_vm0, %v1000_v4  ;;  %2118 = vmatmul.mubr.msk.f32.gmra.mxu0 %vm196_vm0, %v999_v3 }
  0x54   : > { %2120 = vmatprep.mubr.msk.f32.mxu0 %vm196_vm0, %v1000_v4  ;;  %2127 = vmatprep.mubr.msk.f32.mxu1 %vm196_vm0, %v1327_v5 }
  0x57   : > { %2121 = vmatmul.mubr.msk.f32.gmra.mxu0 %vm196_vm0, %v1168_v6  ;;  %2128 = vmatmul.mubr.msk.f32.vlgmr.msra.gmra.mxu1 %vm196_vm0, %v1328_v7 }
  0x58   : > { %2130 = vmatprep.mubr.msk.f32.mxu1 %vm196_vm0, %v1329_v8  ;;  %2146 = vmatprep.mubr.msk.f32.mxu0 %vm196_vm0, %v1495_v9 }
  0x5b   : > { %2131 = vmatmul.mubr.msk.f32.gmra.mxu1 %vm196_vm0, %v1330_v10  ;;  %2147 = vmatmul.mubr.msk.f32.vlgmr.msra.gmra.mxu0 %vm196_vm0, %v1496_v11 }
  0x5c   : > { %2133 = vmatprep.mubr.msk.f32.mxu1 %vm196_vm0, %v1331_v12  ;;  %2149 = vmatprep.mubr.msk.f32.mxu0 %vm196_vm0, %v1497_v13 }
  0x5f   : > { %2134 = vmatmul.mubr.msk.f32.gmra.mxu1 %vm196_vm0, %v1332_v14  ;;  %2150 = vmatmul.mubr.msk.f32.gmra.mxu0 %vm196_vm0, %v1498_v15 }
  0x60   : > { %2136 = vmatprep.mubr.msk.f32.mxu1 %vm196_vm0, %v1333_v16  ;;  %2152 = vmatprep.mubr.msk.f32.mxu0 %vm196_vm0, %v1499_v17 }
  0x63   : > { %2137 = vmatmul.mubr.msk.f32.gmra.mxu1 %vm196_vm0, %v1334_v18  ;;  %2153 = vmatmul.mubr.msk.f32.gmra.mxu0 %vm196_vm0, %v1500_v19 }
  0x64   : > { %2139 = vmatprep.mubr.msk.f32.mxu1 %vm196_vm0, %v1335_v20  ;;  %2155 = vmatprep.mubr.msk.f32.mxu0 %vm196_vm0, %v1501_v21 }
  0x67   : > { %2140 = vmatmul.mubr.msk.f32.gmra.mxu1 %vm196_vm0, %v1336_v22  ;;  %2156 = vmatmul.mubr.msk.f32.gmra.mxu0 %vm196_vm0, %v1502_v23 }
  0x68   : > { %2158 = vmatprep.mubr.msk.f32.mxu0 %vm196_vm0, %v1503_v24 }
  0x6b   : > { %2159 = vmatmul.mubr.msk.f32.gmra.mxu0 %vm196_vm0, %v1504_v25 }
  0xd3   : > { %v1996_v26 = vpop.f32.mrf.mxu0  ;;  %v2435_v27 = vpop.f32.mrf.mxu1 }
  0xd5   : > { %v293_v28 = vpop.f32.mrf.mxu0  ;;  %v2437_v29 = vpop.f32.mrf.mxu1 }
  0xd7   : > { %v2439_v30 = vpop.f32.mrf.mxu0  ;;  %v2441_v31 = vpop.f32.mrf.mxu1 }
  0xd9   : > { %v2443_v32 = vpop.f32.mrf.mxu0  ;;  %v2445_v33 = vpop.f32.mrf.mxu1 }
  0xdb   : > { %v2447_v34 = vpop.f32.mrf.mxu0  ;;  %v2015_v35 = vpop.f32.mrf.mxu1 }
  0xdc   : > { %v444_v22 = vadd.f32 %v2015_v35, %v1996_v26 }
  0xdd   : > { %v2449_v36 = vpop.f32.mrf.mxu0  ;;  %v438_v37 = vpop.f32.mrf.mxu1 }
  0xde   : > { %v439_v25 = vadd.f32 %v438_v37, %v293_v28 }
  0xdf   : > { %v2018_v38 = vpop.f32.mrf.mxu1  ;;  %v2034_v39 = vpop.f32.mrf.mxu0 }
  0xe1   : > { %v448_v40 = vpop.f32.mrf.mxu1  ;;  %v596_v41 = vpop.f32.mrf.mxu0 }
  0xe2   : > { %v449_v26 = vadd.f32 %v448_v40, %v2443_v32 }
  0xe3   : > { %v2021_v42 = vpop.f32.mrf.mxu1  ;;  %v2037_v43 = vpop.f32.mrf.mxu0 }
  0xe4   : > { %v464_v28 = vadd.f32 %v2021_v42, %v2447_v34 }
  0xe5   : > { %v458_v44 = vpop.f32.mrf.mxu1  ;;  %v606_v45 = vpop.f32.mrf.mxu0 }
  0xe6   : > { %v459_v37 = vadd.f32 %v458_v44, %v2449_v36 }
  0xe7   : > { %v2451_v46 = vpop.f32.mrf.mxu1  ;;  %v2453_v47 = vpop.f32.mrf.mxu0 }
  0xe8   : > { %v650_v32 = vadd.f32 %v2453_v47, %v464_v28 }
  0xe9   : > { %v2455_v48 = vpop.f32.mrf.mxu1  ;;  %v2457_v49 = vpop.f32.mrf.mxu0 }
  0xea   : > { %v469_v40 = vadd.f32 %v2455_v48, %v2437_v29  ;;  %v649_v34 = vadd.f32 %v2457_v49, %v459_v37 }
  0xeb   : > { %v2459_v50 = vpop.f32.mrf.mxu1  ;;  %v2461_v51 = vpop.f32.mrf.mxu0 }
  0xed   : > { %v2463_v52 = vpop.f32.mrf.mxu1  ;;  %v2465_v53 = vpop.f32.mrf.mxu0 }
  0xef   : > { %v2467_v54 = vpop.f32.mrf.mxu0  ;;  %v2053_v55 = vpop.f32.mrf.mxu1 }
  0xf1   : > { %v2469_v56 = vpop.f32.mrf.mxu0  ;;  %v764_v57 = vpop.f32.mrf.mxu1 }
  0xf3   : > { %v2056_v58 = vpop.f32.mrf.mxu1  ;;  %v2072_v59 = vpop.f32.mrf.mxu0 }
  0xf5   : > { %v2471_v60 = vpop.f32.mrf.mxu1  ;;  %v932_v61 = vpop.f32.mrf.mxu0 }
  0xf7   : > { %v2473_v62 = vpop.f32.mrf.mxu1  ;;  %v2075_v63 = vpop.f32.mrf.mxu0 }
  0xf8   : > { %v818_v49 = vadd.f32 %v2473_v62, %v650_v32 }
  0xf9   : > { %v2475_v0 = vpop.f32.mrf.mxu1  ;;  %v2477_v1 = vpop.f32.mrf.mxu0 }
  0xfb   : > { %v2479_v2 = vpop.f32.mrf.mxu1  ;;  %v2481_v3 = vpop.f32.mrf.mxu0 }
  0xfc   : > { %v986_v62 = vadd.f32 %v2481_v3, %v818_v49 }
  0xfd   : > { %v2483_v4 = vpop.f32.mrf.mxu1  ;;  %v2485_v5 = vpop.f32.mrf.mxu0 }
  0xff   : > { %v2487_v6 = vpop.f32.mrf.mxu1  ;;  %v2489_v7 = vpop.f32.mrf.mxu0 }
 0x100   : > { %2621 = vst [vmem:[#allocation2_spill] sm:$0xff] %v2487_v6  ;;  %2622 = vst [vmem:[#allocation3_spill] sm:$0xff] %v2489_v7  ;;  %v645_v7 = vadd.f32 %v596_v41, %v439_v25 }
 0x101   : > { %v2491_v8 = vpop.f32.mrf.mxu1  ;;  %v2493_v9 = vpop.f32.mrf.mxu0 }
 0x102   : > { %2623 = vst [vmem:[#allocation4_spill] sm:$0xff] %v2491_v8  ;;  %2624 = vst [vmem:[#allocation5_spill] sm:$0xff] %v2493_v9  ;;  %v454_v8 = vadd.f32 %v2018_v38, %v2439_v30  ;;  %v647_v30 = vadd.f32 %v606_v45, %v449_v26 }
 0x103   : > { %v2495_v10 = vpop.f32.mrf.mxu0  ;;  %v2091_v11 = vpop.f32.mrf.mxu1 }
 0x104   : > { %2625 = vst [vmem:[#allocation6_spill] sm:$0xff] %v2495_v10  ;;  %v648_v35 = vadd.f32 %v2037_v43, %v454_v8  ;;  %v484_v43 = vadd.f32 %v2459_v50, %v2441_v31  ;;  %v815_v29 = vadd.f32 %v2471_v60, %v647_v30 }
 0x105   : > { %v2497_v12 = vpop.f32.mrf.mxu0  ;;  %v1100_v13 = vpop.f32.mrf.mxu1 }
 0x106   : > { %2626 = vst [vmem:[#allocation7_spill] sm:$0xff] %v2497_v12  ;;  %v646_v12 = vadd.f32 %v2034_v39, %v444_v22  ;;  %v816_v38 = vadd.f32 %v2056_v58, %v648_v35 }
 0x107   : > { %v2094_v14 = vpop.f32.mrf.mxu1  ;;  %v2110_v15 = vpop.f32.mrf.mxu0  ;;  %v2633_v25 = vld [vmem:[#allocation3_spill] sm:$0xff] }
 0x108   : > { %v814_v6 = vadd.f32 %v2053_v55, %v646_v12  ;;  %v474_v12 = vadd.f32 %v2451_v46, %v2435_v27  ;;  %v984_v44 = vadd.f32 %v2075_v63, %v816_v38  ;;  %v479_v27 = vadd.f32 %v2463_v52, %v2445_v33  ;;  %v2552_v63 = vld [vmem:[%s2619_s2] ss:$0 sm:$0xff] }
 0x109   : > { %v2499_v16 = vpop.f32.mrf.mxu1  ;;  %v1268_v17 = vpop.f32.mrf.mxu0  ;;  %v651_v46 = vadd.f32 %v2465_v53, %v469_v40  ;;  %v817_v33 = vadd.f32 %v2475_v0, %v649_v34  ;;  %v983_v52 = vadd.f32 %v2477_v1, %v815_v29 }
 0x10a   : > { %v652_v58 = vadd.f32 %v2461_v51, %v474_v12  ;;  %v653_v51 = vadd.f32 %v2469_v56, %v479_v27  ;;  %v2638_v27 = vld [vmem:[#allocation5_spill] sm:$0xff] }
 0x10b   : > { %v2501_v18 = vpop.f32.mrf.mxu1  ;;  %v2113_v19 = vpop.f32.mrf.mxu0  ;;  %v819_v56 = vadd.f32 %v2483_v4, %v651_v46  ;;  %v985_v0 = vadd.f32 %v2485_v5, %v817_v33  ;;  %v1151_v1 = vadd.f32 %v2499_v16, %v983_v52  ;;  %v2639_v29 = vld [vmem:[#allocation6_spill] sm:$0xff] }
 0x10c   : > { %2627 = vst [vmem:[#allocation8_spill] sm:$0xff] %v2501_v18 }
 0x10d   : > { %v2503_v20 = vpop.f32.mrf.mxu1  ;;  %v2505_v21 = vpop.f32.mrf.mxu0  ;;  %v987_v46 = vadd.f32 %v2638_v27, %v819_v56  ;;  %v2640_v52 = vld [vmem:[#allocation7_spill] sm:$0xff] }
 0x10e   : > { %2628 = vst [vmem:[#allocation9_spill] sm:$0xff] %v2503_v20  ;;  %2629 = vst [vmem:[#allocation10_spill] sm:$0xff] %v2505_v21  ;;  %v982_v21 = vadd.f32 %v2072_v59, %v814_v6  ;;  %v1152_v59 = vadd.f32 %v2094_v14, %v984_v44 }
 0x10f   : > { %v2507_v23 = vpop.f32.mrf.mxu1  ;;  %v2509_v24 = vpop.f32.mrf.mxu0 }
 0x110   : > { %2630 = vst [vmem:[#allocation11_spill] sm:$0xff] %v2507_v23  ;;  %v813_v23 = vadd.f32 %v764_v57, %v645_v7  ;;  %v1150_v55 = vadd.f32 %v2091_v11, %v982_v21  ;;  %v1320_v6 = vadd.f32 %v2113_v19, %v1152_v59  ;;  %v2632_v19 = vld [vmem:[#allocation2_spill] sm:$0xff] }
 0x111   : > { %v2511_v10 = vpop.f32.mrf.mxu1  ;;  %v2513_v9 = vpop.f32.mrf.mxu0 }
 0x112   : > { %v981_v41 = vadd.f32 %v932_v61, %v813_v23  ;;  %v1318_v57 = vadd.f32 %v2110_v15, %v1150_v55  ;;  %v654_v61 = vadd.f32 %v2467_v54, %v484_v43  ;;  %v820_v54 = vadd.f32 %v2479_v2, %v652_v58  ;;  %v2636_v55 = vld [vmem:[#allocation4_spill] sm:$0xff] }
 0x113   : > { %v2516_v18 = vpop.f32.mrf.mxu1  ;;  %v2518_v20 = vpop.f32.mrf.mxu0  ;;  %v2631_v14 = vld [vmem:[#allocation8_spill] sm:$0xff]  ;;  %v821_v12 = vadd.f32 %v2636_v55, %v653_v51 }
 0x114   : > { %v1149_v45 = vadd.f32 %v1100_v13, %v981_v41  ;;  %v1154_v15 = vadd.f32 %v2631_v14, %v986_v62  ;;  %v822_v23 = vadd.f32 %v2632_v19, %v654_v61  ;;  %v988_v26 = vadd.f32 %v2633_v25, %v820_v54 }
 0x115   : > { %v2523_v39 = vpop.f32.mrf.mxu1  ;;  %v2525_v22 = vpop.f32.mrf.mxu0  ;;  %v2634_v2 = vld [vmem:[#allocation9_spill] sm:$0xff]  ;;  %v2635_v4 = vld [vmem:[#allocation10_spill] sm:$0xff] }
 0x116   : > { %v1317_v31 = vadd.f32 %v1268_v17, %v1149_v45  ;;  %v1153_v35 = vadd.f32 %v2634_v2, %v985_v0  ;;  %v1319_v28 = vadd.f32 %v2635_v4, %v1151_v1  ;;  %v1322_v16 = vadd.f32 %v2509_v24, %v1154_v15 }
 0x117   : > { %v2533_v42 = vpop.f32.mrf.mxu0  ;;  %v2129_v36 = vpop.f32.mrf.mxu1  ;;  %v2637_v32 = vld [vmem:[#allocation11_spill] sm:$0xff] }
 0x118   : > { %v1486_v50 = vadd.f32 %v2129_v36, %v1318_v57  ;;  %v1156_v40 = vadd.f32 %v2637_v32, %v988_v26  ;;  %v1321_v34 = vadd.f32 %v2513_v9, %v1153_v35 }
 0x119   : > { %v2542_v47 = vpop.f32.mrf.mxu0  ;;  %v1436_v48 = vpop.f32.mrf.mxu1 }
 0x11a   : > { %v1485_v7 = vadd.f32 %v1436_v48, %v1317_v31  ;;  %v990_v48 = vadd.f32 %v2639_v29, %v822_v23  ;;  %v1324_v9 = vadd.f32 %v2518_v20, %v1156_v40 }
 0x11b   : > { %v2132_v53 = vpop.f32.mrf.mxu1  ;;  %v2148_v60 = vpop.f32.mrf.mxu0 }
 0x11c   : > { %v1654_v8 = vadd.f32 %v2148_v60, %v1486_v50  ;;  %v1488_v17 = vadd.f32 %v2132_v53, %v1320_v6  ;;  %v989_v53 = vadd.f32 %v2640_v52, %v821_v12  ;;  %v1155_v60 = vadd.f32 %v2511_v10, %v987_v46 }
 0x11d   : > { %v1446_v11 = vpop.f32.mrf.mxu1  ;;  %v1604_v13 = vpop.f32.mrf.mxu0  ;;  %v1158_v62 = vadd.f32 %v2516_v18, %v990_v48 }
 0x11e   : > { %v1671_v21 = vadd.f32 %v2552_v63, %v1654_v8  ;;  %v1653_v3 = vadd.f32 %v1604_v13, %v1485_v7  ;;  %v1487_v36 = vadd.f32 %v1446_v11, %v1319_v28  ;;  %v1157_v1 = vadd.f32 %v2523_v39, %v989_v53 }
 0x11f   : > { %v2135_v5 = vpop.f32.mrf.mxu1  ;;  %v2151_v37 = vpop.f32.mrf.mxu0  ;;  %v1323_v11 = vadd.f32 %v2525_v22, %v1155_v60  ;;  %v1326_v18 = vadd.f32 %v2533_v42, %v1158_v62 }
 0x120   : > { %v1681_v30 = vmul.f32 0.01, %v1671_v21  ;;  %v1670_v38 = vadd.f32 %v2552_v63, %v1653_v3  ;;  %v1656_v41 = vadd.f32 %v2151_v37, %v1488_v17  ;;  %v1490_v57 = vadd.f32 %v2135_v5, %v1322_v16 }
 0x121   : > { %v1456_v43 = vpop.f32.mrf.mxu1  ;;  %v1614_v44 = vpop.f32.mrf.mxu0  ;;  %v1325_v3 = vadd.f32 %v2542_v47, %v1157_v1 }
 0x122   : > { %v1691_v24 = vmax.f32 %v1671_v21, %v1681_v30  ;;  %v1680_v45 = vmul.f32 0.01, %v1670_v38  ;;  %v1673_v58 = vadd.f32 %v2552_v63, %v1656_v41  ;;  %v1655_v49 = vadd.f32 %v1614_v44, %v1487_v36 }
 0x123   : > { %v2138_v59 = vpop.f32.mrf.mxu1  ;;  %v2154_v31 = vpop.f32.mrf.mxu0  ;;  %v1489_v51 = vadd.f32 %v1456_v43, %v1321_v34 }
 0x124   : > { %1702 = vst.msk [vmem:[%s2574_s6 + $0x8] sm:$0xff] %vm1700_vm1, %v1691_v24  ;;  %v1690_v50 = vmax.f32 %v1670_v38, %v1680_v45  ;;  %v1683_v61 = vmul.f32 0.01, %v1673_v58  ;;  %v1658_v33 = vadd.f32 %v2154_v31, %v1490_v57  ;;  %v1672_v6 = vadd.f32 %v2552_v63, %v1655_v49 }
 0x125   : > { %v1466_v7 = vpop.f32.mrf.mxu1  ;;  %v1624_v20 = vpop.f32.mrf.mxu0  ;;  %v1492_v54 = vadd.f32 %v2138_v59, %v1324_v9 }
 0x126   : > { %1701 = vst.msk [vmem:[%s2574_s6] sm:$0xff] %vm1700_vm1, %v1690_v50  ;;  %v1693_v8 = vmax.f32 %v1673_v58, %v1683_v61  ;;  %v1675_v56 = vadd.f32 %v2552_v63, %v1658_v33  ;;  %v1657_v0 = vadd.f32 %v1624_v20, %v1489_v51  ;;  %v1682_v13 = vmul.f32 0.01, %v1672_v6 }
 0x127   : > { %v2141_v10 = vpop.f32.mrf.mxu1  ;;  %v2157_v14 = vpop.f32.mrf.mxu0  ;;  %v1491_v23 = vadd.f32 %v1466_v7, %v1323_v11 }
 0x128   : > { %1704 = vst.msk [vmem:[%s2574_s6 + $0x18] sm:$0xff] %vm1700_vm1, %v1693_v8  ;;  %v1685_v15 = vmul.f32 0.01, %v1675_v56  ;;  %v1674_v17 = vadd.f32 %v2552_v63, %v1657_v0  ;;  %v1660_v21 = vadd.f32 %v2157_v14, %v1492_v54  ;;  %v1692_v19 = vmax.f32 %v1672_v6, %v1682_v13 }
 0x129   : > { %v1476_v39 = vpop.f32.mrf.mxu1  ;;  %v1634_v22 = vpop.f32.mrf.mxu0  ;;  %v1494_v2 = vadd.f32 %v2141_v10, %v1326_v18 }
 0x12a   : > { %v1695_v25 = vmax.f32 %v1675_v56, %v1685_v15  ;;  %v1684_v26 = vmul.f32 0.01, %v1674_v17  ;;  %v1677_v35 = vadd.f32 %v2552_v63, %v1660_v21  ;;  %1703 = vst.msk [vmem:[%s2574_s6 + $0x10] sm:$0xff] %vm1700_vm1, %v1692_v19  ;;  %v1659_v42 = vadd.f32 %v1634_v22, %v1491_v23 }
 0x12b   : > { %v2160_v4 = vpop.f32.mrf.mxu0  ;;  %v1493_v47 = vadd.f32 %v1476_v39, %v1325_v3 }
 0x12c   : > { %1706 = vst.msk [vmem:[%s2574_s6 + $0x28] sm:$0xff] %vm1700_vm1, %v1695_v25  ;;  %v1694_v28 = vmax.f32 %v1674_v17, %v1684_v26  ;;  %v1687_v5 = vmul.f32 0.01, %v1677_v35  ;;  %v1662_v37 = vadd.f32 %v2160_v4, %v1494_v2  ;;  %v1676_v16 = vadd.f32 %v2552_v63, %v1659_v42 }
 0x12d   : > { %v1644_v30 = vpop.f32.mrf.mxu0 }
 0x12e   : > { %1705 = vst.msk [vmem:[%s2574_s6 + $0x20] sm:$0xff] %vm1700_vm1, %v1694_v28  ;;  %v1697_v38 = vmax.f32 %v1677_v35, %v1687_v5  ;;  %v1679_v41 = vadd.f32 %v2552_v63, %v1662_v37  ;;  %v1661_v55 = vadd.f32 %v1644_v30, %v1493_v47  ;;  %v1686_v12 = vmul.f32 0.01, %v1676_v16 }
 0x130   : > { %1708 = vst.msk [vmem:[%s2574_s6 + $0x38] sm:$0xff] %vm1700_vm1, %v1697_v38  ;;  %v1689_v32 = vmul.f32 0.01, %v1679_v41  ;;  %v1678_v40 = vadd.f32 %v2552_v63, %v1661_v55  ;;  %v1696_v34 = vmax.f32 %v1676_v16, %v1686_v12 }
 0x132   : > { %v1699_v36 = vmax.f32 %v1679_v41, %v1689_v32  ;;  %v1688_v43 = vmul.f32 0.01, %v1678_v40  ;;  %1707 = vst.msk [vmem:[%s2574_s6 + $0x30] sm:$0xff] %vm1700_vm1, %v1696_v34 }
 0x134   : > { %1710 = vst.msk [vmem:[%s2574_s6 + $0x48] sm:$0xff] %vm1700_vm1, %v1699_v36  ;;  %v1698_v44 = vmax.f32 %v1678_v40, %v1688_v43 }
 0x136   : > { %1709 = vst.msk [vmem:[%s2574_s6 + $0x40] sm:$0xff] %vm1700_vm1, %v1698_v44 }
 0x137 PF: > { %s13_s12 = sadd.s32 1, %s2181_s12  }
 0x138   : > { %p10_p4 = scmp.ge.s32.totalorder %s13_s12, 4  }
 0x13a   :  { %12 = sbr.rel (!%p10_p4) target bundleno = 1 (0x1), region = 70 }

// kernel: sliding_projection_net_forward.5
= control target key start
LH: loop header
LB: loop body
LE: loop exit
PB: predicated region body
PF: predicated region fallthrough
CT: control target
= control target key end

     0   :  { %13 = vsyncpa [#allocation3], 0  ;;  %s2357_s0 = inlined_call_operand.vmem [shape: f32[2,42,32], index: 0, kind: input, shape index: {}]   ;;  %s2358_s1 = inlined_call_operand.vmem [shape: f32[9,32,64], index: 1, kind: input, shape index: {}]   ;;  %s2359_s2 = inlined_call_operand.vmem [shape: f32[1,64], index: 2, kind: input, shape index: {}]   ;;  %s2360_s3 = inlined_call_operand.vmem [shape: f32[1,24], index: 3, kind: input, shape index: {}]   ;;  %s2361_s4 = inlined_call_operand.vmem [shape: f32[64,10], index: 4, kind: input, shape index: {}]   ;;  %s2362_s5 = inlined_call_operand.vmem [shape: f32[1,10], index: 5, kind: input, shape index: {}]   ;;  %s2363_s6 = inlined_call_operand.vmem [shape: f32[2,24,64], index: 6, kind: output, shape index: {0}]   ;;  %s2364_s7 = inlined_call_operand.hbm [shape: f32[2,1,10], index: 7, kind: output, shape index: {1}]  }
   0x1   :  { %15 = vsyncpa [#allocation3 + $0x1], 0  ;;  %s1939_s24 = smov 0   ;;  %s1941_s25 = smov 0  }
   0x2   :  { %s1943_s26 = smov 0   ;;  %s1945_s27 = smov 0  }
   0x3 LB: > { %s1960_s28 = sadd.s32 4294967295, %s1894_s27   ;;  %s1463_s29 = sadd.s32 4294967294, %s1894_s27   ;;  %s1894_s27 = sphi %s1945_s27, %s2370_s27   ;;  %s1890_s26 = sphi %s1943_s26, %s2369_s26   ;;  %s1886_s25 = sphi %s1941_s25, %s2368_s25   ;;  %s1882_s24 = sphi %s1939_s24, %s2367_s24  }
   0x4   : > { %s1964_s30 = sadd.s32 1, %s1894_s27   ;;  %s185_s8 = sadd.s32 1, %s1890_s26 }
   0x5   : > { %s182_s9 = ssub.s32 %s1894_s27, %s1964_s30  ;;  %p195_p0 = scmp.ne.s32.totalorder %s1890_s26, %s1886_s25 }
   0x6   : > { %p183_p1 = scmp.eq.s32.totalorder %s182_s9, 0  ;;  %p196_p2 = scmp.eq.s32.totalorder %s1960_s28, 1 }
   0x7   : > { %p201_p3 = scmp.ne.s32.totalorder %s1886_s25, %s1882_s24  ;;  %p202_p4 = scmp.eq.s32.totalorder %s1463_s29, 1 }
   0x8   : > { %s1975_s10 = scalar_select %p183_p1, %s1890_s26, %s185_s8  }
   0x9   : > { %p1977_p5 = por %p196_p2, %p195_p0  ;;  %p1981_p6 = por %p202_p4, %p201_p3 }
   0xa   : > { %p1466_p7 = scmp.ge.s32.totalorder %s1894_s27, 1  ;;  %p243_p8 = scmp.lt.s32.totalorder %s1894_s27, 3 }
   0xc   : > { %p244_p9 = pnand %p1466_p7, %p243_p8 }
   0xd   : > { %p279_p10 = scmp.lt.s32.totalorder (!%p244_p9), %s1960_s28, 1  ;;  %s277_s9 = sand.u32 (!%p244_p9), 1, %s1886_s25  }
   0xe   : > { %247 = sbr.rel (%p244_p9) target bundleno = 695 (0x2b7), region = 44  ;;  %s1531_s15 = sshll.u32 (!%p244_p9), %s1960_s28, 4 }
   0xf   : > { %s278_s16 = scalar_lea.vmem (!%p244_p9), [#allocation2], %s277_s9  ;;  %s2322_s21 = scalar_lea.hbm (!%p244_p9), %s2364_s7, %s1531_s15 }
  0x10   : > { %s1383_s18 = sshll.u32 (!%p244_p9), %s278_s16, 4  ;;  %s1384_s18 = int_to_ptr.vmem [resolvable:$true] %s1383_s18 }
  0x13   : > { %v1472_v0 = vld [vmem:[%s2358_s1 + $0x38] sm:$0xff]  ;;  %v1896_v1 = vmov 0.0   ;;  %v1471_v2 = vld [vmem:[%s2358_s1 + $0x30] sm:$0xff]  ;;  %vm1897_vm0 = vmmov 0   ;;  %s2001_s19 = scalar_select %p279_p10, %s1960_s28, 1  ;;  %v1470_v5 = vld [vmem:[%s2358_s1 + $0x28] sm:$0xff] }
  0x14   : > { %1610 = vmatprep.subr.mxu1 %v1896_v1  ;;  %1618 = vmatprep.mubr.msk.f32.mxu1 %vm1897_vm0, %v1896_v1  ;;  %v1482_v3 = vld [vmem:[%s2358_s1 + $0x58] sm:$0xff]  ;;  %v1481_v4 = vld [vmem:[%s2358_s1 + $0x50] sm:$0xff]  ;;  %v1480_v6 = vld [vmem:[%s2358_s1 + $0x48] sm:$0xff]  ;;  %vm304_vm1 = vcmask 261120   ;;  %vm1199_vm2 = vcmask 523264   ;;  %vm1204_vm3 = vcmask 195584  }
  0x15   : > { %1611 = vmatpush3.msra.mxu1 %v1472_v0  ;;  %1644 = vmatprep.subr.mxu0 %v1896_v1  ;;  %s1791_s29 = smul.u32 48, %s2001_s19  ;;  %v1469_v7 = vld [vmem:[%s2358_s1 + $0x20] sm:$0xff]  ;;  %v295_v9 = vld [vmem:[%s2358_s1 + $0x18] sm:$0xff]  ;;  %v294_v11 = vld [vmem:[%s2358_s1 + $0x10] sm:$0xff]  ;;  %vm1360_vm4 = vcmask 73728   ;;  %s1898_s28 = smov [#allocation2]  }
  0x16   : > { %1612 = vmatprep.subr.mxu1 %v1896_v1  ;;  %1645 = vmatpush3.msra.mxu0 %v1482_v3  ;;  %v1479_v10 = vld [vmem:[%s2358_s1 + $0x40] sm:$0xff]  ;;  %v293_v13 = vld [vmem:[%s2358_s1 + $0x8] sm:$0xff]  ;;  %v1496_v18 = vld [vmem:[%s2358_s1 + $0x98] sm:$0xff]  ;;  %s1792_s20 = smul.u32 24, %s2001_s19  ;;  %s1834_s19 = scalar_lea.vmem %s1384_s18, 16 }
  0x17   : > { %1613 = vmatpush3.msra.mxu1 %v1471_v2  ;;  %1646 = vmatprep.subr.mxu0 %v1896_v1  ;;  %s2023_s17 = scalar_lea.vmem %s2357_s0, %s1791_s29  ;;  %v292_v15 = vld [vmem:[%s2358_s1] sm:$0xff]  ;;  %v1489_v20 = vld [vmem:[%s2358_s1 + $0x78] sm:$0xff]  ;;  %v1495_v21 = vld [vmem:[%s2358_s1 + $0x90] sm:$0xff]  ;;  %p1835_p11 = scmp.ne.s32.totalorder %s1384_s18, %s1834_s19 }
  0x18   : > { %1614 = vmatprep.subr.mxu1 %v1896_v1  ;;  %1647 = vmatpush3.msra.mxu0 %v1481_v4  ;;  %v296_v8 = vld [vmem:[%s2023_s17 + $0x1] sm:$0xff]  ;;  %v297_v12 = vld [vmem:[%s2023_s17 + $0x9] sm:$0xff]  ;;  %v298_v16 = vld [vmem:[%s2023_s17 + $0x11] sm:$0xff]  ;;  %s288_s22 = scalar_lea.vmem %s2363_s6, %s1792_s20  ;;  %s1838_s23 = sshll.u32 %s1898_s28, 4  ;;  %s1839_s23 = int_to_ptr.vmem [resolvable:$false] %s1838_s23 }
  0x19   : > { %1615 = vmatpush3.msra.mxu1 %v1470_v5  ;;  %1648 = vmatprep.subr.mxu0 %v1896_v1  ;;  %v483_v14 = vld [vmem:[%s2023_s17 + $0x2] sm:$0xff]  ;;  %v484_v17 = vld [vmem:[%s2023_s17 + $0xa] sm:$0xff]  ;;  %v485_v23 = vld [vmem:[%s2023_s17 + $0x12] sm:$0xff]  ;;  %p1836_p12 = pnand %p1835_p11, %p1977_p5  ;;  %s1840_s29 = scalar_lea.vmem %s1839_s23, 32 }
  0x1a   : > { %1616 = vmatprep.subr.mxu1 %v1896_v1  ;;  %1649 = vmatpush3.msra.mxu0 %v1480_v6  ;;  %v289_v19 = vld [vmem:[%s2023_s17] sm:$0xff]  ;;  %v1488_v22 = vld [vmem:[%s2358_s1 + $0x70] sm:$0xff]  ;;  %v2090_v24 = vld [vmem:[%s2023_s17 + $0x8] sm:$0xff]  ;;  %p1841_p0 = scmp.lt.s32.totalorder %s1384_s18, %s1839_s23  ;;  %p1842_p1 = scmp.lt.s32.totalorder %s1840_s29, %s1834_s19 }
  0x1b   : > { %1617 = vmatpush3.msra.mxu1 %v1469_v7  ;;  %1650 = vmatprep.subr.mxu0 %v1896_v1  ;;  %v1487_v25 = vld [vmem:[%s2358_s1 + $0x68] sm:$0xff]  ;;  %v2106_v27 = vld [vmem:[%s2023_s17 + $0x10] sm:$0xff]  ;;  %v1493_v28 = vld [vmem:[%s2358_s1 + $0x80] sm:$0xff]  ;;  %p1837_p13 = pneg %p1836_p12 }
  0x1c   : > { %1619 = vmatmul.mubr.msk.f32.vlgmr.msra.gmra.mxu1 %vm304_vm1, %v296_v8  ;;  %1627 = vmatprep.subr.mxu1 %v1896_v1  ;;  %v1494_v26 = vld [vmem:[%s2358_s1 + $0x88] sm:$0xff]  ;;  %v1486_v29 = vld [vmem:[%s2358_s1 + $0x60] sm:$0xff]  ;;  %v1503_v32 = vld [vmem:[%s2358_s1 + $0xb8] sm:$0xff]  ;;  %p1843_p2 = por %p1842_p1, %p1841_p0 }
  0x1d   : > { %1621 = vmatprep.mubr.msk.f32.mxu1 %vm1897_vm0, %v1896_v1  ;;  %1628 = vmatpush3.msra.mxu1 %v295_v9  ;;  %v683_v30 = vld [vmem:[%s2023_s17 + $0x7] sm:$0xff]  ;;  %v1510_v33 = vld [vmem:[%s2358_s1 + $0xd8] sm:$0xff]  ;;  %v684_v34 = vld [vmem:[%s2023_s17 + $0xf] sm:$0xff] }
  0x1e   : > { %1629 = vmatprep.subr.mxu1 %v1896_v1  ;;  %1651 = vmatpush3.msra.mxu0 %v1479_v10  ;;  %v583_v31 = vld [vmem:[%s2023_s17 + $0x6] sm:$0xff]  ;;  %v2141_v35 = vld [vmem:[%s2023_s17 + $0xe] sm:$0xff]  ;;  %v685_v38 = vld [vmem:[%s2023_s17 + $0x17] sm:$0xff]  ;;  %p1844_p3 = pnand %p1843_p2, %p1837_p13 }
  0x1f   : > { %1630 = vmatpush3.msra.mxu1 %v294_v11  ;;  %1652 = vmatprep.mubr.msk.f32.mxu0 %vm1897_vm0, %v1896_v1  ;;  %v1502_v36 = vld [vmem:[%s2358_s1 + $0xb0] sm:$0xff]  ;;  %v1508_v40 = vld [vmem:[%s2358_s1 + $0xc8] sm:$0xff]  ;;  %v1500_v42 = vld [vmem:[%s2358_s1 + $0xa0] sm:$0xff] }
  0x20   : > { %1622 = vmatmul.mubr.msk.f32.gmra.mxu1 %vm304_vm1, %v297_v12  ;;  %1631 = vmatprep.subr.mxu1 %v1896_v1  ;;  %v1509_v37 = vld [vmem:[%s2358_s1 + $0xd0] sm:$0xff]  ;;  %v1501_v41 = vld [vmem:[%s2358_s1 + $0xa8] sm:$0xff]  ;;  %v1507_v43 = vld [vmem:[%s2358_s1 + $0xc0] sm:$0xff] }
  0x21   : > { %1624 = vmatprep.mubr.msk.f32.mxu1 %vm1897_vm0, %v1896_v1  ;;  %1632 = vmatpush3.msra.mxu1 %v293_v13  ;;  %v2160_v39 = vld [vmem:[%s2023_s17 + $0x16] sm:$0xff]  ;;  %v883_v44 = vld [vmem:[%s2023_s17 + $0xc] sm:$0xff]  ;;  %v1514_v54 = vld [vmem:[%s2358_s1 + $0xe0] sm:$0xff] }
  0x22   : > { %1633 = vmatprep.subr.mxu1 %v1896_v1  ;;  %1653 = vmatmul.mubr.msk.f32.vlgmr.msra.gmra.mxu0 %vm304_vm1, %v483_v14  ;;  %v1517_v45 = vld [vmem:[%s2358_s1 + $0xf8] sm:$0xff]  ;;  %v1516_v48 = vld [vmem:[%s2358_s1 + $0xf0] sm:$0xff]  ;;  %v1515_v52 = vld [vmem:[%s2358_s1 + $0xe8] sm:$0xff] }
  0x23   : > { %1634 = vmatpush3.msra.mxu1 %v292_v15  ;;  %1655 = vmatprep.mubr.msk.f32.mxu0 %vm1897_vm0, %v1896_v1  ;;  %v1524_v46 = vld [vmem:[%s2358_s1 + $0x118] sm:$0xff]  ;;  %v1523_v49 = vld [vmem:[%s2358_s1 + $0x110] sm:$0xff]  ;;  %v1522_v53 = vld [vmem:[%s2358_s1 + $0x108] sm:$0xff] }
  0x24   : > { %1625 = vmatmul.mubr.msk.f32.gmra.mxu1 %vm304_vm1, %v298_v16  ;;  %1661 = vmatprep.subr.mxu1 %v1896_v1  ;;  %v884_v47 = vld [vmem:[%s2023_s17 + $0x14] sm:$0xff]  ;;  %v885_v51 = vld [vmem:[%s2023_s17 + $0x1c] sm:$0xff]  ;;  %v1283_v62 = vld [vmem:[%s2361_s4 + $0x28] sm:$0xff] }
  0x25   : > { %1635 = vmatprep.mubr.msk.f32.mxu1 %vm1897_vm0, %v1896_v1  ;;  %1678 = vmatprep.subr.mxu0 %v1896_v1  ;;  %v785_v50 = vld [vmem:[%s2023_s17 + $0x18] sm:$0xff]  ;;  %v1521_v55 = vld [vmem:[%s2358_s1 + $0x100] sm:$0xff]  ;;  %v983_v56 = vld [vmem:[%s2023_s17 + $0xd] sm:$0xff] }
  0x26   : > { %1656 = vmatmul.mubr.msk.f32.gmra.mxu0 %vm304_vm1, %v484_v17  ;;  %v984_v57 = vld [vmem:[%s2023_s17 + $0x15] sm:$0xff]  ;;  %v985_v58 = vld [vmem:[%s2023_s17 + $0x1d] sm:$0xff]  ;;  %v1279_v3 = vld [vmem:[%s2361_s4 + $0x8] sm:$0xff] }
  0x27   : > { %1679 = vmatpush3.msra.mxu0 %v1496_v18  ;;  %1658 = vmatprep.mubr.msk.f32.mxu0 %vm1897_vm0, %v1896_v1  ;;  %v1085_v59 = vld [vmem:[%s2023_s17 + $0x1e] sm:$0xff]  ;;  %v1284_v61 = vld [vmem:[%s2361_s4 + $0x30] sm:$0xff] }
  0x28   : > { %1636 = vmatmul.mubr.msk.f32.vlgmr.msra.gmra.mxu1 %vm304_vm1, %v289_v19  ;;  %1680 = vmatprep.subr.mxu0 %v1896_v1  ;;  %v1285_v60 = vld [vmem:[%s2361_s4 + $0x38] sm:$0xff]  ;;  %v1282_v63 = vld [vmem:[%s2361_s4 + $0x20] sm:$0xff]  ;;  %v1280_v2 = vld [vmem:[%s2361_s4 + $0x10] sm:$0xff] }
  0x29   : > { %1638 = vmatprep.mubr.msk.f32.mxu1 %vm1897_vm0, %v1896_v1  ;;  %1662 = vmatpush3.msra.mxu1 %v1489_v20  ;;  %v1281_v0 = vld [vmem:[%s2361_s4 + $0x18] sm:$0xff] }
  0x2a   : > { %1663 = vmatprep.subr.mxu1 %v1896_v1  ;;  %1681 = vmatpush3.msra.mxu0 %v1495_v21 }
  0x2b   : > { %1664 = vmatpush3.msra.mxu1 %v1488_v22  ;;  %1659 = vmatmul.mubr.msk.f32.gmra.mxu0 %vm304_vm1, %v485_v23 }
  0x2c   : > { %1639 = vmatmul.mubr.msk.f32.gmra.mxu1 %vm304_vm1, %v2090_v24  ;;  %1665 = vmatprep.subr.mxu1 %v1896_v1 }
  0x2d   : > { %1641 = vmatprep.mubr.msk.f32.mxu1 %vm1897_vm0, %v1896_v1  ;;  %1682 = vmatprep.subr.mxu0 %v1896_v1 }
  0x2e   : > { %1666 = vmatpush3.msra.mxu1 %v1487_v25  ;;  %1683 = vmatpush3.msra.mxu0 %v1494_v26 }
  0x2f   : > { %1667 = vmatprep.subr.mxu1 %v1896_v1  ;;  %1684 = vmatprep.subr.mxu0 %v1896_v1 }
  0x30   : > { %1642 = vmatmul.mubr.msk.f32.gmra.mxu1 %vm304_vm1, %v2106_v27  ;;  %1685 = vmatpush3.msra.mxu0 %v1493_v28 }
  0x31   : > { %1668 = vmatpush3.msra.mxu1 %v1486_v29  ;;  %1669 = vmatprep.mubr.msk.f32.mxu1 %vm1897_vm0, %v1896_v1 }
  0x32   : > { %1686 = vmatprep.mubr.msk.f32.mxu0 %vm1897_vm0, %v1896_v1  ;;  %1695 = vmatprep.subr.mxu1 %v1896_v1 }
  0x33   : > { %1687 = vmatmul.mubr.msk.f32.vlgmr.msra.gmra.mxu0 %vm304_vm1, %v683_v30  ;;  %1712 = vmatprep.subr.mxu0 %v1896_v1 }
  0x34   : > { %1670 = vmatmul.mubr.msk.f32.vlgmr.msra.gmra.mxu1 %vm304_vm1, %v583_v31  ;;  %1689 = vmatprep.mubr.msk.f32.mxu0 %vm1897_vm0, %v1896_v1 }
  0x35   : > { %1672 = vmatprep.mubr.msk.f32.mxu1 %vm1897_vm0, %v1896_v1  ;;  %1696 = vmatpush3.msra.mxu1 %v1503_v32 }
  0x36   : > { %1713 = vmatpush3.msra.mxu0 %v1510_v33  ;;  %1697 = vmatprep.subr.mxu1 %v1896_v1 }
  0x37   : > { %1690 = vmatmul.mubr.msk.f32.gmra.mxu0 %vm304_vm1, %v684_v34  ;;  %1714 = vmatprep.subr.mxu0 %v1896_v1 }
  0x38   : > { %1673 = vmatmul.mubr.msk.f32.gmra.mxu1 %vm304_vm1, %v2141_v35  ;;  %1692 = vmatprep.mubr.msk.f32.mxu0 %vm1897_vm0, %v1896_v1 }
  0x39   : > { %1675 = vmatprep.mubr.msk.f32.mxu1 %vm1897_vm0, %v1896_v1  ;;  %1698 = vmatpush3.msra.mxu1 %v1502_v36 }
  0x3a   : > { %1715 = vmatpush3.msra.mxu0 %v1509_v37  ;;  %1699 = vmatprep.subr.mxu1 %v1896_v1 }
  0x3b   : > { %1693 = vmatmul.mubr.msk.f32.gmra.mxu0 %vm304_vm1, %v685_v38  ;;  %1716 = vmatprep.subr.mxu0 %v1896_v1 }
  0x3c   : > { %1676 = vmatmul.mubr.msk.f32.gmra.mxu1 %vm304_vm1, %v2160_v39  ;;  %1717 = vmatpush3.msra.mxu0 %v1508_v40 }
  0x3d   : > { %1700 = vmatpush3.msra.mxu1 %v1501_v41  ;;  %1718 = vmatprep.subr.mxu0 %v1896_v1 }
  0x3e   : > { %1701 = vmatprep.subr.mxu1 %v1896_v1  ;;  %1703 = vmatprep.mubr.msk.f32.mxu1 %vm1897_vm0, %v1896_v1 }
  0x3f   : > { %1702 = vmatpush3.msra.mxu1 %v1500_v42  ;;  %1719 = vmatpush3.msra.mxu0 %v1507_v43 }
  0x40   : > { %1720 = vmatprep.mubr.msk.f32.mxu0 %vm1897_vm0, %v1896_v1  ;;  %1704 = vmatmul.mubr.msk.f32.vlgmr.msra.gmra.mxu1 %vm304_vm1, %v2090_v24 }
  0x41   : > { %1721 = vmatmul.mubr.msk.f32.vlgmr.msra.gmra.mxu0 %vm304_vm1, %v883_v44  ;;  %1706 = vmatprep.mubr.msk.f32.mxu1 %vm1897_vm0, %v1896_v1 }
  0x42   : > { %1723 = vmatprep.mubr.msk.f32.mxu0 %vm1897_vm0, %v1896_v1  ;;  %1729 = vmatprep.subr.mxu1 %v1896_v1 }
  0x43   : > { %1746 = vmatprep.subr.mxu0 %v1896_v1  ;;  %1730 = vmatpush3.msra.mxu1 %v1517_v45 }
  0x44   : > { %1707 = vmatmul.mubr.msk.f32.gmra.mxu1 %vm304_vm1, %v2106_v27  ;;  %1747 = vmatpush3.msra.mxu0 %v1524_v46 }
  0x45   : > { %1724 = vmatmul.mubr.msk.f32.gmra.mxu0 %vm304_vm1, %v884_v47  ;;  %1731 = vmatprep.subr.mxu1 %v1896_v1 }
  0x46   : > { %1748 = vmatprep.subr.mxu0 %v1896_v1  ;;  %1709 = vmatprep.mubr.msk.f32.mxu1 %vm1897_vm0, %v1896_v1 }
  0x47   : > { %1726 = vmatprep.mubr.msk.f32.mxu0 %vm1897_vm0, %v1896_v1  ;;  %1732 = vmatpush3.msra.mxu1 %v1516_v48 }
  0x48   : > { %1749 = vmatpush3.msra.mxu0 %v1523_v49  ;;  %1710 = vmatmul.mubr.msk.f32.gmra.mxu1 %vm304_vm1, %v785_v50 }
  0x49   : > { %1727 = vmatmul.mubr.msk.f32.gmra.mxu0 %vm304_vm1, %v885_v51  ;;  %1733 = vmatprep.subr.mxu1 %v1896_v1 }
  0x4a   : > { %1750 = vmatprep.subr.mxu0 %v1896_v1  ;;  %1734 = vmatpush3.msra.mxu1 %v1515_v52 }
  0x4b   : > { %1751 = vmatpush3.msra.mxu0 %v1522_v53  ;;  %1735 = vmatprep.subr.mxu1 %v1896_v1 }
  0x4c   : > { %1752 = vmatprep.subr.mxu0 %v1896_v1  ;;  %1736 = vmatpush3.msra.mxu1 %v1514_v54 }
  0x4d   : > { %1737 = vmatprep.mubr.msk.f32.mxu1 %vm1897_vm0, %v1896_v1  ;;  %1753 = vmatpush3.msra.mxu0 %v1521_v55 }
  0x4e   : > { %1754 = vmatprep.mubr.msk.f32.mxu0 %vm1897_vm0, %v1896_v1  ;;  %1738 = vmatmul.mubr.msk.f32.vlgmr.msra.gmra.mxu1 %vm304_vm1, %v983_v56 }
  0x4f   : > { %1755 = vmatmul.mubr.msk.f32.vlgmr.msra.gmra.mxu0 %vm304_vm1, %v2141_v35  ;;  %1740 = vmatprep.mubr.msk.f32.mxu1 %vm1897_vm0, %v1896_v1 }
  0x50   : > { %1757 = vmatprep.mubr.msk.f32.mxu0 %vm1897_vm0, %v1896_v1  ;;  %1763 = vmatprep.subr.mxu1 %v1896_v1 }
  0x51   : > { %1772 = vmatprep.subr.mxu0 %v1896_v1 }
  0x52   : > { %1741 = vmatmul.mubr.msk.f32.gmra.mxu1 %vm304_vm1, %v984_v57  ;;  %1773 = vmatpush3.msra.mxu0 %v1285_v60 }
  0x53   : > { %1758 = vmatmul.mubr.msk.f32.gmra.mxu0 %vm304_vm1, %v2160_v39  ;;  %1743 = vmatprep.mubr.msk.f32.mxu1 %vm1897_vm0, %v1896_v1 }
  0x54   : > { %1760 = vmatprep.mubr.msk.f32.mxu0 %vm1897_vm0, %v1896_v1  ;;  %1774 = vmatprep.subr.mxu0 %v1896_v1 }
  0x55   : > { %1775 = vmatpush3.msra.mxu0 %v1284_v61 }
  0x56   : > { %1744 = vmatmul.mubr.msk.f32.gmra.mxu1 %vm304_vm1, %v985_v58  ;;  %1776 = vmatprep.subr.mxu0 %v1896_v1 }
  0x57   : > { %1761 = vmatmul.mubr.msk.f32.gmra.mxu0 %vm304_vm1, %v1085_v59  ;;  %1769 = vmatprep.mubr.msk.f32.mxu1 %vm1897_vm0, %v1896_v1 }
  0x58   : > { %1788 = vmatprep.mubr.msk.f32.mxu0 %vm1897_vm0, %v1896_v1  ;;  %1777 = vmatpush3.msra.mxu0 %v1283_v62 }
  0x59   : > { %1778 = vmatprep.subr.mxu0 %v1896_v1 }
  0x5a   : > { %1779 = vmatpush3.msra.mxu0 %v1282_v63 }
  0x5b   : > { %1780 = vmatprep.subr.mxu0 %v1896_v1 }
  0x5c   : > { %1781 = vmatpush3.msra.mxu0 %v1281_v0  ;;  %v1528_v0 = vld [vmem:[%s2359_s2] ss:$0 sm:$0xff] }
  0x5d   : > { %1782 = vmatprep.subr.mxu0 %v1896_v1 }
  0x5e   : > { %1783 = vmatpush3.msra.mxu0 %v1280_v2 }
  0x5f   : > { %1784 = vmatprep.subr.mxu0 %v1896_v1 }
  0x60   : > { %1785 = vmatpush3.msra.mxu0 %v1279_v3 }
  0x61   : > { %1786 = vmatprep.subr.mxu0 %v1896_v1 }
  0xdc   : > { %v380_v4 = vpop.f32.mrf.mxu1 }
  0xde   : > { %v1620_v5 = vpop.f32.mrf.mxu1 }
  0xe0   : > { %v385_v6 = vpop.f32.mrf.mxu1 }
  0xe2   : > { %v1623_v7 = vpop.f32.mrf.mxu1  ;;  %v566_v8 = vpop.f32.mrf.mxu0 }
  0xe4   : > { %v390_v9 = vpop.f32.mrf.mxu1  ;;  %v1654_v10 = vpop.f32.mrf.mxu0 }
  0xe6   : > { %v1626_v11 = vpop.f32.mrf.mxu1  ;;  %v571_v12 = vpop.f32.mrf.mxu0 }
  0xe8   : > { %v469_v13 = vpop.f32.mrf.mxu1  ;;  %v1657_v14 = vpop.f32.mrf.mxu0 }
  0xe9   : > { %v470_v32 = vadd.f32 %v469_v13, %v380_v4 }
  0xea   : > { %v1637_v15 = vpop.f32.mrf.mxu1 }
  0xeb   : > { %v576_v16 = vpop.f32.mrf.mxu0  ;;  %v580_v36 = vadd.f32 %v566_v8, %v470_v32 }
  0xec   : > { %v474_v17 = vpop.f32.mrf.mxu1 }
  0xed   : > { %v1660_v18 = vpop.f32.mrf.mxu0  ;;  %v475_v37 = vadd.f32 %v474_v17, %v385_v6 }
  0xee   : > { %v1640_v19 = vpop.f32.mrf.mxu1 }
  0xef   : > { %v581_v43 = vadd.f32 %v571_v12, %v475_v37 }
  0xf0   : > { %v479_v20 = vpop.f32.mrf.mxu1 }
  0xf1   : > { %v480_v44 = vadd.f32 %v479_v20, %v390_v9 }
  0xf2   : > { %v1643_v21 = vpop.f32.mrf.mxu1 }
  0xf3   : > { %v766_v22 = vpop.f32.mrf.mxu0  ;;  %v582_v51 = vadd.f32 %v576_v16, %v480_v44 }
  0xf4   : > { %v666_v23 = vpop.f32.mrf.mxu1 }
  0xf5   : > { %v1688_v24 = vpop.f32.mrf.mxu0  ;;  %v680_v40 = vadd.f32 %v666_v23, %v580_v36 }
  0xf6   : > { %v1671_v25 = vpop.f32.mrf.mxu1 }
  0xf7   : > { %v771_v26 = vpop.f32.mrf.mxu0  ;;  %v780_v47 = vadd.f32 %v766_v22, %v680_v40 }
  0xf8   : > { %v671_v27 = vpop.f32.mrf.mxu1 }
  0xf9   : > { %v1691_v28 = vpop.f32.mrf.mxu0  ;;  %v681_v48 = vadd.f32 %v671_v27, %v581_v43 }
  0xfa   : > { %v1674_v29 = vpop.f32.mrf.mxu1 }
  0xfb   : > { %v776_v30 = vpop.f32.mrf.mxu0  ;;  %v781_v55 = vadd.f32 %v771_v26, %v681_v48  ;;  %v1203_v29 = vld [vmem:[%s2360_s3] sm:$0x1] }
  0xfc   : > { %v676_v31 = vpop.f32.mrf.mxu1 }
  0xfd   : > { %v1694_v33 = vpop.f32.mrf.mxu0  ;;  %v682_v56 = vadd.f32 %v676_v31, %v582_v51 }
  0xfe   : > { %v1677_v34 = vpop.f32.mrf.mxu1  ;;  %v1286_v33 = vld [vmem:[%s2362_s5] sm:$0x1] }
  0xff   : > { %v782_v61 = vadd.f32 %v776_v30, %v682_v56  ;;  %v1278_v30 = vld [vmem:[%s2361_s4] sm:$0xff] }
 0x100   : > { %v866_v35 = vpop.f32.mrf.mxu1  ;;  %1787 = vmatpush3.msra.mxu0 %v1278_v30 }
 0x101   : > { %v966_v38 = vpop.f32.mrf.mxu0  ;;  %v880_v52 = vadd.f32 %v866_v35, %v780_v47 }
 0x102   : > { %v1705_v39 = vpop.f32.mrf.mxu1 }
 0x103   : > { %v1722_v41 = vpop.f32.mrf.mxu0  ;;  %v980_v58 = vadd.f32 %v966_v38, %v880_v52 }
 0x104   : > { %v871_v42 = vpop.f32.mrf.mxu1 }
 0x105   : > { %v971_v45 = vpop.f32.mrf.mxu0  ;;  %v881_v59 = vadd.f32 %v871_v42, %v781_v55 }
 0x106   : > { %v1708_v46 = vpop.f32.mrf.mxu1 }
 0x107   : > { %v1725_v49 = vpop.f32.mrf.mxu0  ;;  %v981_v3 = vadd.f32 %v971_v45, %v881_v59 }
 0x108   : > { %v876_v50 = vpop.f32.mrf.mxu1 }
 0x109   : > { %v976_v53 = vpop.f32.mrf.mxu0  ;;  %v882_v4 = vadd.f32 %v876_v50, %v782_v61 }
 0x10a   : > { %v1711_v54 = vpop.f32.mrf.mxu1 }
 0x10b   : > { %v1728_v57 = vpop.f32.mrf.mxu0  ;;  %v982_v12 = vadd.f32 %v976_v53, %v882_v4 }
 0x10e   : > { %v1066_v60 = vpop.f32.mrf.mxu1 }
 0x10f   : > { %v1080_v62 = vadd.f32 %v1066_v60, %v980_v58  ;;  %v1166_v63 = vpop.f32.mrf.mxu0 }
 0x110   : > { %v1739_v2 = vpop.f32.mrf.mxu1 }
 0x111   : > { %v1180_v5 = vadd.f32 %v1166_v63, %v1080_v62  ;;  %v1756_v6 = vpop.f32.mrf.mxu0 }
 0x112   : > { %v1071_v7 = vpop.f32.mrf.mxu1 }
 0x113   : > { %v1190_v8 = vadd.f32 %v1528_v0, %v1180_v5  ;;  %v1081_v9 = vadd.f32 %v1071_v7, %v981_v3  ;;  %v1171_v10 = vpop.f32.mrf.mxu0 }
 0x114   : > { %v1742_v11 = vpop.f32.mrf.mxu1 }
 0x115   : > { %v1193_v13 = vmul.f32 0.01, %v1190_v8  ;;  %v1181_v14 = vadd.f32 %v1171_v10, %v1081_v9  ;;  %v1759_v15 = vpop.f32.mrf.mxu0 }
 0x116   : > { %v1076_v16 = vpop.f32.mrf.mxu1 }
 0x117   : > { %v1196_v17 = vmax.f32 %v1190_v8, %v1193_v13  ;;  %v1191_v18 = vadd.f32 %v1528_v0, %v1181_v14  ;;  %v1082_v19 = vadd.f32 %v1076_v16, %v982_v12  ;;  %v1176_v20 = vpop.f32.mrf.mxu0 }
 0x118   : > { %v1745_v21 = vpop.f32.mrf.mxu1 }
 0x119   : > { %v1194_v22 = vmul.f32 0.01, %v1191_v18  ;;  %v1182_v23 = vadd.f32 %v1176_v20, %v1082_v19  ;;  %v1762_v24 = vpop.f32.mrf.mxu0  ;;  %1200 = vst.msk [vmem:[%s288_s22] sm:$0xff] %vm1199_vm2, %v1196_v17 }
 0x11b   : > { %v1197_v25 = vmax.f32 %v1191_v18, %v1194_v22  ;;  %v1192_v26 = vadd.f32 %v1528_v0, %v1182_v23 }
 0x11d   : > { %v1195_v27 = vmul.f32 0.01, %v1192_v26  ;;  %1201 = vst.msk [vmem:[%s288_s22 + $0x8] sm:$0xff] %vm1199_vm2, %v1197_v25 }
 0x11f   : > { %v1198_v28 = vmax.f32 %v1192_v26, %v1195_v27 }
 0x121   : > { %1764 = vmatpush3.msra.mxu1 %v1198_v28  ;;  %1202 = vst.msk [vmem:[%s288_s22 + $0x10] sm:$0xff] %vm1199_vm2, %v1198_v28  ;;  %s1368_s22 = scalar_lea.sflag [#allocation3], %s277_s9 }
 0x122   : > { %1765 = vmatprep.subr.mxu1 %v1896_v1 }
 0x123   : > { %1766 = vmatpush3.msra.mxu1 %v1197_v25 }
 0x124   : > { %1767 = vmatprep.subr.mxu1 %v1896_v1 }
 0x125   : > { %1768 = vmatpush3.msra.mxu1 %v1196_v17 }
 0x126   : > { %1770 = vmatmul.mubr.msk.f32.vlgmr.msra.gmra.mxu1 %vm1204_vm3, %v1203_v29 }
 0x1e6   : > { %v1274_v31 = vpop.f32.mrf.mxu1 }
 0x1e7   : > { %1789 = vmatmul.mubr.msk.f32.vlgmr.msra.gmra.mxu0 %vm1199_vm2, %v1274_v31 }
 0x1e8   : > { %v1771_v32 = vpop.f32.mrf.mxu1 }
 0x2a7   : > { %v1356_v1 = vpop.f32.mrf.mxu0 }
 0x2a8   : > { %v1357_v34 = vadd.f32 %v1356_v1, %v1286_v33 }
 0x2a9   : > { %v1790_v35 = vpop.f32.mrf.mxu0 }
 0x2aa   : > { %1361 = vst.msk [vmem:[%s278_s16] sm:$0x1] %vm1360_vm4, %v1357_v34 }
 0x2ab   : > { %1847 = shalt.err (!%p1844_p3)
}
 0x2ac   : > { %s1848_s8 = scalar_lea.hbm %s2322_s21, 16  ;;  %s1852_s14 = scalar_lea.hbm %s2364_s7, 32 }
 0x2ad   : > { %p1849_p4 = scmp.ne.s32.totalorder %s2322_s21, %s1848_s8  ;;  %p1853_p9 = scmp.lt.s32.totalorder %s2322_s21, %s2364_s7 }
 0x2ae   : > { %p1854_p10 = scmp.lt.s32.totalorder %s1852_s14, %s1848_s8 }
 0x2af   : > { %p1850_p7 = pnand %p1849_p4, %p1977_p5 }
 0x2b0   : > { %p1855_p11 = por %p1854_p10, %p1853_p9 }
 0x2b1   : > { %p1851_p8 = pneg %p1850_p7 }
 0x2b3   : > { %p1856_p12 = pnand %p1855_p11, %p1851_p8 }
 0x2b5   : > { %1859 = shalt.err (!%p1856_p12)
}
 0x2b6   : > { %1793 = dma.vmem_to_hbm [thread:$0]  (%p1977_p5), %s1384_s18, 16, %s2322_s21, %s1368_s22  }
 0x2b7 PF: > { %p1799_p13 = scmp.ge.s32.totalorder %s1894_s27, 2  ;;  %s1403_s20 = sand.u32 1, %s1882_s24  }
 0x2b8   : > { %s1404_s17 = scalar_lea.sflag [#allocation3], %s1403_s20 }
 0x2b9   : > { %p1796_p0 = pnand %p1799_p13, %p1981_p6 }
 0x2bb   : > { %p1797_p1 = pneg %p1796_p0 }
 0x2bd   : > { %1877 = dma.done.wait (%p1797_p1), %s1404_s17, 16  }
 0x2be   : > { %1879 = vsyncadd (%p1797_p1), %s1404_s17, 4294967280  ;;  %p18_p2 = scmp.ge.s32.totalorder %s1964_s30, 4   ;;  %s2367_s24 = smov %s1886_s25 }
 0x2bf   : > { %s2368_s25 = smov %s1890_s26  ;;  %s2369_s26 = smov %s1975_s10 }
 0x2c0   : > { %s2370_s27 = smov %s1964_s30  ;;  %20 = sbr.rel (!%p18_p2) target bundleno = 3 (0x3), region = 99 }
 0x2c5   :  { %1408 = vsyncpa [#allocation3], 1 }
 0x2c6   :  { %1410 = vsyncpa [#allocation3 + $0x1], 1 }

</bundles_post_ra>
